<compile_context>
chip_gen: v6e
topology: v6e:2x2x1
jax: 0.10.0
libtpu: 0.0.40
codegen_flags: <defaults>
</compile_context>

<pallas_src>
import functools
import math

import jax
import jax.numpy as jnp
from jax.experimental import pallas as pl
from jax.experimental.pallas import tpu as pltpu

_LN_EPS = 1e-5


# ----------------------------------------------------------------------------
# In-kernel attention block (batched over heads, residual + LayerNorm fused)
# ----------------------------------------------------------------------------
def _attention_block(x_q, x_kv, mask_f,
                     wq_ref, bq_ref, wkv_ref, bkv_ref, wo_ref, bo_ref,
                     g_ref, be_ref, n_head):
    """x_q: (Sq, D) f32 residual stream.  x_kv: (Sk, D) f32.
    mask_f: float array broadcastable to (H, Sq, Sk); nonzero => masked out.
    All head work is batched over a leading head axis (no per-head matmul loop,
    no dh-wide activation slices, no concatenate)."""
    Sq, D = x_q.shape
    Sk = x_kv.shape[0]
    dh = D // n_head

    xq_b = jnp.broadcast_to(x_q.astype(jnp.bfloat16), (n_head, Sq, D))
    xkv_b = jnp.broadcast_to(x_kv.astype(jnp.bfloat16), (n_head, Sk, D))

    # Per-head projections as batched matmuls.  1/sqrt(dh) is folded into
    # wq/bq at prepare time; K and V share one fused (H, D, 2*dh) matmul.
    q = jax.lax.dot_general(xq_b, wq_ref[...], (((2,), (1,)), ((0,), (0,))),
                            preferred_element_type=jnp.float32) + bq_ref[...]
    kv = jax.lax.dot_general(xkv_b, wkv_ref[...], (((2,), (1,)), ((0,), (0,))),
                             preferred_element_type=jnp.float32) + bkv_ref[...]
    k = kv[:, :, :dh]
    v = kv[:, :, dh:]

    # scores: (H, Sq, Sk), contraction over dh, batched over heads.
    s = jax.lax.dot_general(q.astype(jnp.bfloat16), k.astype(jnp.bfloat16),
                            (((2,), (2,)), ((0,), (0,))),
                            preferred_element_type=jnp.float32)
    mask_b = jnp.broadcast_to(mask_f, s.shape)
    s = jnp.where(mask_b != 0.0, jnp.float32(-1e9), s)

    m = jnp.max(s, axis=-1, keepdims=True)
    e = jnp.exp(s - m)
    denom = jnp.sum(e, axis=-1, keepdims=True)
    p = e * pl.reciprocal(denom, approx=True)

    # context: (H, Sq, dh)
    ctx = jax.lax.dot_general(p.astype(jnp.bfloat16), v.astype(jnp.bfloat16),
                              (((2,), (1,)), ((0,), (0,))),
                              preferred_element_type=jnp.float32)

    # Output projection with per-head weight slabs: (H,Sq,dh) x (H,dh,D)
    # -> (H,Sq,D), summed over heads.  This replaces concat-then-matmul.
    o_h = jax.lax.dot_general(ctx.astype(jnp.bfloat16), wo_ref[...],
                              (((2,), (1,)), ((0,), (0,))),
                              preferred_element_type=jnp.float32)
    o = o_h[0]
    for h in range(1, n_head):       # head-sum of the projection (adds only)
        o = o + o_h[h]
    o = o + bo_ref[...]

    # Residual + LayerNorm (eps matches torch default 1e-5).
    y = o + x_q
    mean = jnp.mean(y, axis=-1, keepdims=True)
    var = jnp.mean((y - mean) ** 2, axis=-1, keepdims=True)
    return (y - mean) * jax.lax.rsqrt(var + _LN_EPS) * g_ref[...] + be_ref[...]


# ----------------------------------------------------------------------------
# Fused DecoderLayer kernel (self-attn -> cross-attn -> FFN), one batch element
# ----------------------------------------------------------------------------
def _decoder_layer_kernel(
        yz_ref, xz_ref, pad_ref,
        wq0_ref, bq0_ref, wkv0_ref, bkv0_ref, wo0_ref, bo0_ref, g0_ref, be0_ref,
        wq1_ref, bq1_ref, wkv1_ref, bkv1_ref, wo1_ref, bo1_ref, g1_ref, be1_ref,
        w1_ref, b1_ref, w2_ref, b2_ref, g2_ref, be2_ref,
        o_ref, *, n_head):
    yz = yz_ref[0]          # (Sy, D) f32
    xz = xz_ref[0]          # (Sx, D) f32
    Sy = yz.shape[0]

    # Causal (look-ahead) mask generated in-kernel: key pos > query pos.
    row = jax.lax.broadcasted_iota(jnp.int32, (1, Sy, Sy), 1)
    col = jax.lax.broadcasted_iota(jnp.int32, (1, Sy, Sy), 2)
    causal_mask = jnp.where(col > row, 1.0, 0.0)          # (1, Sy, Sy) f32

    # Masked self-attention: same yz tile used for Q and K/V (no duplicate DMA).
    dec = _attention_block(yz, yz, causal_mask,
                           wq0_ref, bq0_ref, wkv0_ref, bkv0_ref,
                           wo0_ref, bo0_ref, g0_ref, be0_ref, n_head)

    # Cross-attention: encoder pad mask is a per-key vector, broadcast in-kernel.
    pad_mask = pad_ref[...]                                # (1, 1, Sx) f32
    dec = _attention_block(dec, xz, pad_mask,
                           wq1_ref, bq1_ref, wkv1_ref, bkv1_ref,
                           wo1_ref, bo1_ref, g1_ref, be1_ref, n_head)

    # Position-wise FFN + residual + LayerNorm.
    h = jnp.dot(dec.astype(jnp.bfloat16), w1_ref[...],
                preferred_element_type=jnp.float32) + b1_ref[...]
    h = jnp.maximum(h, 0.0)
    y = jnp.dot(h.astype(jnp.bfloat16), w2_ref[...],
                preferred_element_type=jnp.float32) + b2_ref[...]
    y = dec + y
    mean = jnp.mean(y, axis=-1, keepdims=True)
    var = jnp.mean((y - mean) ** 2, axis=-1, keepdims=True)
    o_ref[0] = (y - mean) * jax.lax.rsqrt(var + _LN_EPS) * g2_ref[...] + be2_ref[...]


def decoder_layer_forward(p, yz, xz, xz_pad, n_head, *, single_buffer_weights=True):
    """One fused pallas_call per decoder layer.
    yz: (B, Sy, D) f32; xz: (B, Sx, D) f32; xz_pad: (B, 1, Sx) f32 (nonzero=pad)."""
    B, Sy, D = yz.shape
    Sx = xz.shape[1]
    H = n_head
    dh = D // H
    Dff = p["ffn"]["w1"].shape[1]

    def _act_spec(S):
        return pl.BlockSpec((1, S, D), lambda b: (b, 0, 0))

    def _const_spec(shape):
        # Constant-index weight/bias/LN blocks: single-buffered when supported
        # (they are re-used every grid step; double-buffering only wastes VMEM).
        imap = (lambda b: (0, 0)) if len(shape) == 2 else (lambda b: (0, 0, 0))
        if single_buffer_weights:
            return pl.BlockSpec(shape, imap, pipeline_mode=pl.Buffered(1))
        return pl.BlockSpec(shape, imap)

    def _mha_specs():
        return [
            _const_spec((H, D, dh)),       # wq  (per-head slabs, bf16)
            _const_spec((H, 1, dh)),       # bq
            _const_spec((H, D, 2 * dh)),   # wkv (K/V fused, bf16)
            _const_spec((H, 1, 2 * dh)),   # bkv
            _const_spec((H, dh, D)),       # wo  (per-head slabs, bf16)
            _const_spec((1, D)),           # bo
            _const_spec((1, D)),           # ln gamma
            _const_spec((1, D)),           # ln beta
        ]

    in_specs = ([_act_spec(Sy), _act_spec(Sx),
                 pl.BlockSpec((1, 1, Sx), lambda b: (b, 0, 0))]     # pad vector
                + _mha_specs() + _mha_specs()
                + [_const_spec((D, Dff)), _const_spec((1, Dff)),
                   _const_spec((Dff, D)), _const_spec((1, D)),
                   _const_spec((1, D)), _const_spec((1, D))])

    m0, m1, f = p["mha0"], p["mha1"], p["ffn"]
    kern = functools.partial(_decoder_layer_kernel, n_head=H)
    return pl.pallas_call(
        kern,
        out_shape=jax.ShapeDtypeStruct((B, Sy, D), jnp.float32),
        grid=(B,),
        in_specs=in_specs,
        out_specs=pl.BlockSpec((1, Sy, D), lambda b: (b, 0, 0)),
        compiler_params=pltpu.CompilerParams(
            dimension_semantics=("parallel",),
            vmem_limit_bytes=48 * 1024 * 1024),
    )(yz, xz, xz_pad,
      m0["wq"], m0["bq"], m0["wkv"], m0["bkv"], m0["wo"], m0["bo"],
      m0["ln_g"], m0["ln_b"],
      m1["wq"], m1["bq"], m1["wkv"], m1["bkv"], m1["wo"], m1["bo"],
      m1["ln_g"], m1["ln_b"],
      f["w1"], f["b1"], f["w2"], f["b2"], f["ln_g"], f["ln_b"])


def decoder_forward(params, yz, xz, yz_look_ahead_mask, xz_pad_mask, n_head,
                    *, single_buffer_weights=True):
    # The canonical causal mask is generated in-kernel (iota); the argument is
    # kept for API parity with the PyTorch module.
    del yz_look_ahead_mask
    B = yz.shape[0]
    Sx = xz.shape[1]
    # Dense (B,1,Sq,Sk) pad mask broadcasts over queries -> DMA only the
    # per-key (B,1,Sk) vector.
    xz_pad = xz_pad_mask[:, 0, 0, :].reshape(B, 1, Sx).astype(jnp.float32)
    for layer_params in params:
        yz = decoder_layer_forward(layer_params, yz, xz, xz_pad, n_head,
                                   single_buffer_weights=single_buffer_weights)
    return yz


# ----------------------------------------------------------------------------
# Parameter construction (raw "torch-like" params) + kernel-ready preparation
# ----------------------------------------------------------------------------
def init_mha_params(key, d_model):
    ks = jax.random.split(key, 4)
    init = lambda k, shp: (0.02 * jax.random.normal(k, shp)).astype(jnp.float32)
    return {
        "wq": init(ks[0], (d_model, d_model)), "bq": jnp.zeros((d_model,), jnp.float32),
        "wk": init(ks[1], (d_model, d_model)), "bk": jnp.zeros((d_model,), jnp.float32),
        "wv": init(ks[2], (d_model, d_model)), "bv": jnp.zeros((d_model,), jnp.float32),
        "wo": init(ks[3], (d_model, d_model)), "bo": jnp.zeros((d_model,), jnp.float32),
        "ln_g": jnp.ones((d_model,), jnp.float32),
        "ln_b": jnp.zeros((d_model,), jnp.float32),
    }


def init_ffn_params(key, d_model):
    dff = 4 * d_model
    k1, k2 = jax.random.split(key)
    init = lambda k, shp: (0.02 * jax.random.normal(k, shp)).astype(jnp.float32)
    return {
        "w1": init(k1, (d_model, dff)), "b1": jnp.zeros((dff,), jnp.float32),
        "w2": init(k2, (dff, d_model)), "b2": jnp.zeros((d_model,), jnp.float32),
        "ln_g": jnp.ones((d_model,), jnp.float32),
        "ln_b": jnp.zeros((d_model,), jnp.float32),
    }


def init_decoder_params(key, n_layer, d_model):
    params = []
    for _ in range(n_layer):
        key, k0, k1, k2 = jax.random.split(key, 4)
        params.append({
            "mha0": init_mha_params(k0, d_model),
            "mha1": init_mha_params(k1, d_model),
            "ffn": init_ffn_params(k2, d_model),
        })
    return params


def _prepare_mha(p, d_model, n_head):
    """Kernel-ready layout: per-head weight slabs (batched-head matmuls),
    K/V fused, 1/sqrt(dh) folded into Q, matmul weights cast to bf16."""
    D, H = d_model, n_head
    dh = D // H
    scale = 1.0 / math.sqrt(dh)
    wq_h = (p["wq"] * scale).reshape(D, H, dh).transpose(1, 0, 2)   # (H, D, dh)
    wk_h = p["wk"].reshape(D, H, dh).transpose(1, 0, 2)
    wv_h = p["wv"].reshape(D, H, dh).transpose(1, 0, 2)
    return {
        "wq": wq_h.astype(jnp.bfloat16),
        "bq": (p["bq"] * scale).reshape(H, 1, dh).astype(jnp.float32),
        "wkv": jnp.concatenate([wk_h, wv_h], axis=2).astype(jnp.bfloat16),
        "bkv": jnp.concatenate([p["bk"].reshape(H, 1, dh),
                                p["bv"].reshape(H, 1, dh)], axis=2).astype(jnp.float32),
        "wo": p["wo"].reshape(H, dh, D).astype(jnp.bfloat16),        # (H, dh, D)
        "bo": p["bo"].reshape(1, D),
        "ln_g": p["ln_g"].reshape(1, D),
        "ln_b": p["ln_b"].reshape(1, D),
    }


def _prepare_ffn(p, d_model):
    Dff = p["w1"].shape[1]
    return {
        "w1": p["w1"].astype(jnp.bfloat16),
        "w2": p["w2"].astype(jnp.bfloat16),
        "b1": p["b1"].reshape(1, Dff),
        "b2": p["b2"].reshape(1, d_model),
        "ln_g": p["ln_g"].reshape(1, d_model),
        "ln_b": p["ln_b"].reshape(1, d_model),
    }


def prepare_decoder_params(params, d_model, n_head):
    return [{
        "mha0": _prepare_mha(lp["mha0"], d_model, n_head),
        "mha1": _prepare_mha(lp["mha1"], d_model, n_head),
        "ffn": _prepare_ffn(lp["ffn"], d_model),
    } for lp in params]


# ----------------------------------------------------------------------------
# Main
# ----------------------------------------------------------------------------
if __name__ == "__main__":
    B, S_y, S_x = 2, 8, 8
    d_model, n_head, n_layer = 32, 4, 2
    dropout = 0.0  # inference mode

    key = jax.random.PRNGKey(0)
    k_p, k_y, k_x = jax.random.split(key, 3)

    raw_params = init_decoder_params(k_p, n_layer, d_model)
    params = prepare_decoder_params(raw_params, d_model, n_head)

    yz = jax.random.normal(k_y, (B, S_y, d_model), dtype=jnp.float32)
    xz = jax.random.normal(k_x, (B, S_x, d_model), dtype=jnp.float32)

    # look-ahead mask: 1 where the key position is ahead of the query position
    la = jnp.triu(jnp.ones((S_y, S_y), jnp.float32), k=1)
    yz_look_ahead_mask = jnp.broadcast_to(la, (B, 1, S_y, S_y))

    # pad mask on the encoder side: mark the last 2 xz positions as padding
    pad = jnp.concatenate(
        [jnp.zeros((S_x - 2,), jnp.float32), jnp.ones((2,), jnp.float32)])
    xz_pad_mask = jnp.broadcast_to(pad[None, None, None, :], (B, 1, S_y, S_x))

    try:
        out = jax.block_until_ready(
            decoder_forward(params, yz, xz, yz_look_ahead_mask, xz_pad_mask,
                            n_head, single_buffer_weights=True))
    except Exception:
        # pl.Buffered(1) single-buffering of constant-index weight blocks is a
        # newer Pallas feature; fall back to default double buffering.
        out = jax.block_until_ready(
            decoder_forward(params, yz, xz, yz_look_ahead_mask, xz_pad_mask,
                            n_head, single_buffer_weights=False))

    assert out.shape == (B, S_y, d_model)
    assert bool(jnp.all(jnp.isfinite(out)))
    print("KERNEL_OK")
</pallas_src>

<mosaic_0001>
module attributes {stable_mosaic.version = 11 : i64} {
  func.func @_decoder_layer_kernel(%arg0: i32, %arg1: memref<1x8x32xf32, #tpu.memory_space<vmem>>, %arg2: memref<1x8x32xf32, #tpu.memory_space<vmem>>, %arg3: memref<1x1x8xf32, #tpu.memory_space<vmem>>, %arg4: memref<4x32x8xbf16, #tpu.memory_space<vmem>>, %arg5: memref<4x1x8xf32, #tpu.memory_space<vmem>>, %arg6: memref<4x32x16xbf16, #tpu.memory_space<vmem>>, %arg7: memref<4x1x16xf32, #tpu.memory_space<vmem>>, %arg8: memref<4x8x32xbf16, #tpu.memory_space<vmem>>, %arg9: memref<1x32xf32, #tpu.memory_space<vmem>>, %arg10: memref<1x32xf32, #tpu.memory_space<vmem>>, %arg11: memref<1x32xf32, #tpu.memory_space<vmem>>, %arg12: memref<4x32x8xbf16, #tpu.memory_space<vmem>>, %arg13: memref<4x1x8xf32, #tpu.memory_space<vmem>>, %arg14: memref<4x32x16xbf16, #tpu.memory_space<vmem>>, %arg15: memref<4x1x16xf32, #tpu.memory_space<vmem>>, %arg16: memref<4x8x32xbf16, #tpu.memory_space<vmem>>, %arg17: memref<1x32xf32, #tpu.memory_space<vmem>>, %arg18: memref<1x32xf32, #tpu.memory_space<vmem>>, %arg19: memref<1x32xf32, #tpu.memory_space<vmem>>, %arg20: memref<32x128xbf16, #tpu.memory_space<vmem>>, %arg21: memref<1x128xf32, #tpu.memory_space<vmem>>, %arg22: memref<128x32xbf16, #tpu.memory_space<vmem>>, %arg23: memref<1x32xf32, #tpu.memory_space<vmem>>, %arg24: memref<1x32xf32, #tpu.memory_space<vmem>>, %arg25: memref<1x32xf32, #tpu.memory_space<vmem>>, %arg26: memref<1x8x32xf32, #tpu.memory_space<vmem>>) attributes {dimension_semantics = [#tpu.dimension_semantics<parallel>], iteration_bounds = array<i64: 2>, scalar_prefetch = 0 : i64, scratch_operands = 0 : i64, tpu.core_type = #tpu.core_type<tc>, window_params = [{transform_indices = @transform_0, window_bounds = array<i64: 1, 8, 32>}, {transform_indices = @transform_1, window_bounds = array<i64: 1, 8, 32>}, {transform_indices = @transform_2, window_bounds = array<i64: 1, 1, 8>}, {pipeline_mode = #tpu.pipeline_mode<synchronous>, transform_indices = @transform_3, window_bounds = array<i64: 4, 32, 8>}, {pipeline_mode = #tpu.pipeline_mode<synchronous>, transform_indices = @transform_4, window_bounds = array<i64: 4, 1, 8>}, {pipeline_mode = #tpu.pipeline_mode<synchronous>, transform_indices = @transform_5, window_bounds = array<i64: 4, 32, 16>}, {pipeline_mode = #tpu.pipeline_mode<synchronous>, transform_indices = @transform_6, window_bounds = array<i64: 4, 1, 16>}, {pipeline_mode = #tpu.pipeline_mode<synchronous>, transform_indices = @transform_7, window_bounds = array<i64: 4, 8, 32>}, {pipeline_mode = #tpu.pipeline_mode<synchronous>, transform_indices = @transform_8, window_bounds = array<i64: 1, 32>}, {pipeline_mode = #tpu.pipeline_mode<synchronous>, transform_indices = @transform_9, window_bounds = array<i64: 1, 32>}, {pipeline_mode = #tpu.pipeline_mode<synchronous>, transform_indices = @transform_10, window_bounds = array<i64: 1, 32>}, {pipeline_mode = #tpu.pipeline_mode<synchronous>, transform_indices = @transform_11, window_bounds = array<i64: 4, 32, 8>}, {pipeline_mode = #tpu.pipeline_mode<synchronous>, transform_indices = @transform_12, window_bounds = array<i64: 4, 1, 8>}, {pipeline_mode = #tpu.pipeline_mode<synchronous>, transform_indices = @transform_13, window_bounds = array<i64: 4, 32, 16>}, {pipeline_mode = #tpu.pipeline_mode<synchronous>, transform_indices = @transform_14, window_bounds = array<i64: 4, 1, 16>}, {pipeline_mode = #tpu.pipeline_mode<synchronous>, transform_indices = @transform_15, window_bounds = array<i64: 4, 8, 32>}, {pipeline_mode = #tpu.pipeline_mode<synchronous>, transform_indices = @transform_16, window_bounds = array<i64: 1, 32>}, {pipeline_mode = #tpu.pipeline_mode<synchronous>, transform_indices = @transform_17, window_bounds = array<i64: 1, 32>}, {pipeline_mode = #tpu.pipeline_mode<synchronous>, transform_indices = @transform_18, window_bounds = array<i64: 1, 32>}, {pipeline_mode = #tpu.pipeline_mode<synchronous>, transform_indices = @transform_19, window_bounds = array<i64: 32, 128>}, {pipeline_mode = #tpu.pipeline_mode<synchronous>, transform_indices = @transform_20, window_bounds = array<i64: 1, 128>}, {pipeline_mode = #tpu.pipeline_mode<synchronous>, transform_indices = @transform_21, window_bounds = array<i64: 128, 32>}, {pipeline_mode = #tpu.pipeline_mode<synchronous>, transform_indices = @transform_22, window_bounds = array<i64: 1, 32>}, {pipeline_mode = #tpu.pipeline_mode<synchronous>, transform_indices = @transform_23, window_bounds = array<i64: 1, 32>}, {pipeline_mode = #tpu.pipeline_mode<synchronous>, transform_indices = @transform_24, window_bounds = array<i64: 1, 32>}, {transform_indices = @transform_25, window_bounds = array<i64: 1, 8, 32>}]} {
    %c0 = arith.constant 0 : index
    %c0_0 = arith.constant 0 : index
    %c0_1 = arith.constant 0 : index
    %0 = vector.load %arg1[%c0, %c0_0, %c0_1] : memref<1x8x32xf32, #tpu.memory_space<vmem>>, vector<1x8x32xf32>
    %1 = vector.shape_cast %0 : vector<1x8x32xf32> to vector<8x32xf32>
    %c0_2 = arith.constant 0 : index
    %c0_3 = arith.constant 0 : index
    %c0_4 = arith.constant 0 : index
    %2 = vector.load %arg2[%c0_2, %c0_3, %c0_4] : memref<1x8x32xf32, #tpu.memory_space<vmem>>, vector<1x8x32xf32>
    %3 = vector.shape_cast %2 : vector<1x8x32xf32> to vector<8x32xf32>
    %4 = tpu.iota {dimensions = array<i32: 1>} : vector<1x8x8xi32>
    %5 = tpu.iota {dimensions = array<i32: 2>} : vector<1x8x8xi32>
    %6 = arith.cmpi sgt, %5, %4 : vector<1x8x8xi32>
    %cst = arith.constant 1.000000e+00 : f32
    %cst_5 = arith.constant 0.000000e+00 : f32
    %7 = vector.broadcast %cst : f32 to vector<1x8x8xf32>
    %8 = vector.broadcast %cst_5 : f32 to vector<1x8x8xf32>
    %9 = arith.select %6, %7, %8 : vector<1x8x8xi1>, vector<1x8x8xf32>
    %10 = arith.truncf %1 : vector<8x32xf32> to vector<8x32xbf16>
    %11 = vector.shape_cast %10 : vector<8x32xbf16> to vector<1x8x32xbf16>
    %12 = vector.broadcast %11 : vector<1x8x32xbf16> to vector<4x8x32xbf16>
    %13 = arith.truncf %1 : vector<8x32xf32> to vector<8x32xbf16>
    %14 = vector.shape_cast %13 : vector<8x32xbf16> to vector<1x8x32xbf16>
    %15 = vector.broadcast %14 : vector<1x8x32xbf16> to vector<4x8x32xbf16>
    %c0_6 = arith.constant 0 : index
    %c0_7 = arith.constant 0 : index
    %c0_8 = arith.constant 0 : index
    %16 = vector.load %arg4[%c0_6, %c0_7, %c0_8] : memref<4x32x8xbf16, #tpu.memory_space<vmem>>, vector<4x32x8xbf16>
    %cst_9 = arith.constant dense<0.000000e+00> : vector<4x8x8xf32>
    %17 = tpu.matmul %12, %16, %cst_9 {dimension_numbers = #tpu.dot_dimension_numbers<[2], [1], [1], [2], [0, 0, 0, 1, 1, 2], [0], [0]>} : vector<4x8x32xbf16>, vector<4x32x8xbf16>, vector<4x8x8xf32> -> vector<4x8x8xf32>
    %c0_10 = arith.constant 0 : index
    %c0_11 = arith.constant 0 : index
    %c0_12 = arith.constant 0 : index
    %18 = vector.load %arg5[%c0_10, %c0_11, %c0_12] : memref<4x1x8xf32, #tpu.memory_space<vmem>>, vector<4x1x8xf32>
    %19 = vector.broadcast %18 : vector<4x1x8xf32> to vector<4x8x8xf32>
    %20 = arith.addf %17, %19 : vector<4x8x8xf32>
    %c0_13 = arith.constant 0 : index
    %c0_14 = arith.constant 0 : index
    %c0_15 = arith.constant 0 : index
    %21 = vector.load %arg6[%c0_13, %c0_14, %c0_15] : memref<4x32x16xbf16, #tpu.memory_space<vmem>>, vector<4x32x16xbf16>
    %cst_16 = arith.constant dense<0.000000e+00> : vector<4x8x16xf32>
    %22 = tpu.matmul %15, %21, %cst_16 {dimension_numbers = #tpu.dot_dimension_numbers<[2], [1], [1], [2], [0, 0, 0, 1, 1, 2], [0], [0]>} : vector<4x8x32xbf16>, vector<4x32x16xbf16>, vector<4x8x16xf32> -> vector<4x8x16xf32>
    %c0_17 = arith.constant 0 : index
    %c0_18 = arith.constant 0 : index
    %c0_19 = arith.constant 0 : index
    %23 = vector.load %arg7[%c0_17, %c0_18, %c0_19] : memref<4x1x16xf32, #tpu.memory_space<vmem>>, vector<4x1x16xf32>
    %24 = vector.broadcast %23 : vector<4x1x16xf32> to vector<4x8x16xf32>
    %25 = arith.addf %22, %24 : vector<4x8x16xf32>
    %26 = vector.extract_strided_slice %25 {offsets = [0, 0, 0], sizes = [4, 8, 8], strides = [1, 1, 1]} : vector<4x8x16xf32> to vector<4x8x8xf32>
    %27 = vector.extract_strided_slice %25 {offsets = [0, 0, 8], sizes = [4, 8, 8], strides = [1, 1, 1]} : vector<4x8x16xf32> to vector<4x8x8xf32>
    %28 = arith.truncf %20 : vector<4x8x8xf32> to vector<4x8x8xbf16>
    %29 = arith.truncf %26 : vector<4x8x8xf32> to vector<4x8x8xbf16>
    %cst_20 = arith.constant dense<0.000000e+00> : vector<4x8x8xf32>
    %30 = tpu.matmul %28, %29, %cst_20 {dimension_numbers = #tpu.dot_dimension_numbers<[2], [2], [1], [1], [0, 0, 0, 1, 1, 1], [0], [0]>} : vector<4x8x8xbf16>, vector<4x8x8xbf16>, vector<4x8x8xf32> -> vector<4x8x8xf32>
    %31 = vector.shape_cast %9 : vector<1x8x8xf32> to vector<1x8x8xf32>
    %32 = vector.broadcast %31 : vector<1x8x8xf32> to vector<4x8x8xf32>
    %cst_21 = arith.constant 0.000000e+00 : f32
    %33 = vector.broadcast %cst_21 : f32 to vector<4x8x8xf32>
    %34 = arith.cmpf one, %32, %33 : vector<4x8x8xf32>
    %cst_22 = arith.constant -1.000000e+09 : f32
    %35 = vector.broadcast %cst_22 : f32 to vector<4x8x8xf32>
    %36 = arith.select %34, %35, %30 : vector<4x8x8xi1>, vector<4x8x8xf32>
    %cst_23 = arith.constant dense<0xFF800000> : vector<4x8xf32>
    %37 = vector.multi_reduction <maximumf>, %36, %cst_23 [2] : vector<4x8x8xf32> to vector<4x8xf32>
    %38 = vector.shape_cast %37 : vector<4x8xf32> to vector<4x8x1xf32>
    %39 = vector.broadcast %38 : vector<4x8x1xf32> to vector<4x8x8xf32>
    %40 = arith.subf %36, %39 : vector<4x8x8xf32>
    %41 = math.exp %40 : vector<4x8x8xf32>
    %cst_24 = arith.constant dense<0.000000e+00> : vector<4x8xf32>
    %42 = vector.multi_reduction <add>, %41, %cst_24 [2] : vector<4x8x8xf32> to vector<4x8xf32>
    %43 = vector.shape_cast %42 : vector<4x8xf32> to vector<4x8x1xf32>
    %44 = tpu.reciprocal %43 {approx = true} : vector<4x8x1xf32> -> vector<4x8x1xf32>
    %45 = vector.broadcast %44 : vector<4x8x1xf32> to vector<4x8x8xf32>
    %46 = arith.mulf %41, %45 : vector<4x8x8xf32>
    %47 = arith.truncf %46 : vector<4x8x8xf32> to vector<4x8x8xbf16>
    %48 = arith.truncf %27 : vector<4x8x8xf32> to vector<4x8x8xbf16>
    %cst_25 = arith.constant dense<0.000000e+00> : vector<4x8x8xf32>
    %49 = tpu.matmul %47, %48, %cst_25 {dimension_numbers = #tpu.dot_dimension_numbers<[2], [1], [1], [2], [0, 0, 0, 1, 1, 2], [0], [0]>} : vector<4x8x8xbf16>, vector<4x8x8xbf16>, vector<4x8x8xf32> -> vector<4x8x8xf32>
    %50 = arith.truncf %49 : vector<4x8x8xf32> to vector<4x8x8xbf16>
    %c0_26 = arith.constant 0 : index
    %c0_27 = arith.constant 0 : index
    %c0_28 = arith.constant 0 : index
    %51 = vector.load %arg8[%c0_26, %c0_27, %c0_28] : memref<4x8x32xbf16, #tpu.memory_space<vmem>>, vector<4x8x32xbf16>
    %cst_29 = arith.constant dense<0.000000e+00> : vector<4x8x32xf32>
    %52 = tpu.matmul %50, %51, %cst_29 {dimension_numbers = #tpu.dot_dimension_numbers<[2], [1], [1], [2], [0, 0, 0, 1, 1, 2], [0], [0]>} : vector<4x8x8xbf16>, vector<4x8x32xbf16>, vector<4x8x32xf32> -> vector<4x8x32xf32>
    %53 = vector.extract_strided_slice %52 {offsets = [0, 0, 0], sizes = [1, 8, 32], strides = [1, 1, 1]} : vector<4x8x32xf32> to vector<1x8x32xf32>
    %54 = vector.shape_cast %53 : vector<1x8x32xf32> to vector<8x32xf32>
    %55 = vector.extract_strided_slice %52 {offsets = [1, 0, 0], sizes = [1, 8, 32], strides = [1, 1, 1]} : vector<4x8x32xf32> to vector<1x8x32xf32>
    %56 = vector.shape_cast %55 : vector<1x8x32xf32> to vector<8x32xf32>
    %57 = arith.addf %54, %56 : vector<8x32xf32>
    %58 = vector.extract_strided_slice %52 {offsets = [2, 0, 0], sizes = [1, 8, 32], strides = [1, 1, 1]} : vector<4x8x32xf32> to vector<1x8x32xf32>
    %59 = vector.shape_cast %58 : vector<1x8x32xf32> to vector<8x32xf32>
    %60 = arith.addf %57, %59 : vector<8x32xf32>
    %61 = vector.extract_strided_slice %52 {offsets = [3, 0, 0], sizes = [1, 8, 32], strides = [1, 1, 1]} : vector<4x8x32xf32> to vector<1x8x32xf32>
    %62 = vector.shape_cast %61 : vector<1x8x32xf32> to vector<8x32xf32>
    %63 = arith.addf %60, %62 : vector<8x32xf32>
    %c0_30 = arith.constant 0 : index
    %c0_31 = arith.constant 0 : index
    %64 = vector.load %arg9[%c0_30, %c0_31] : memref<1x32xf32, #tpu.memory_space<vmem>>, vector<1x32xf32>
    %65 = vector.broadcast %64 : vector<1x32xf32> to vector<8x32xf32>
    %66 = arith.addf %63, %65 : vector<8x32xf32>
    %67 = arith.addf %66, %1 : vector<8x32xf32>
    %cst_32 = arith.constant dense<0.000000e+00> : vector<8xf32>
    %68 = vector.multi_reduction <add>, %67, %cst_32 [1] : vector<8x32xf32> to vector<8xf32>
    %69 = vector.shape_cast %68 : vector<8xf32> to vector<8x1xf32>
    %cst_33 = arith.constant 3.200000e+01 : f32
    %70 = vector.broadcast %cst_33 : f32 to vector<8x1xf32>
    %71 = arith.divf %69, %70 : vector<8x1xf32>
    %72 = vector.broadcast %71 : vector<8x1xf32> to vector<8x32xf32>
    %73 = arith.subf %67, %72 : vector<8x32xf32>
    %74 = arith.mulf %73, %73 : vector<8x32xf32>
    %cst_34 = arith.constant dense<0.000000e+00> : vector<8xf32>
    %75 = vector.multi_reduction <add>, %74, %cst_34 [1] : vector<8x32xf32> to vector<8xf32>
    %76 = vector.shape_cast %75 : vector<8xf32> to vector<8x1xf32>
    %cst_35 = arith.constant 3.200000e+01 : f32
    %77 = vector.broadcast %cst_35 : f32 to vector<8x1xf32>
    %78 = arith.divf %76, %77 : vector<8x1xf32>
    %79 = vector.broadcast %71 : vector<8x1xf32> to vector<8x32xf32>
    %80 = arith.subf %67, %79 : vector<8x32xf32>
    %cst_36 = arith.constant 9.99999974E-6 : f32
    %81 = vector.broadcast %cst_36 : f32 to vector<8x1xf32>
    %82 = arith.addf %78, %81 : vector<8x1xf32>
    %83 = math.rsqrt %82 : vector<8x1xf32>
    %84 = vector.broadcast %83 : vector<8x1xf32> to vector<8x32xf32>
    %85 = arith.mulf %80, %84 : vector<8x32xf32>
    %c0_37 = arith.constant 0 : index
    %c0_38 = arith.constant 0 : index
    %86 = vector.load %arg10[%c0_37, %c0_38] : memref<1x32xf32, #tpu.memory_space<vmem>>, vector<1x32xf32>
    %87 = vector.broadcast %86 : vector<1x32xf32> to vector<8x32xf32>
    %88 = arith.mulf %85, %87 : vector<8x32xf32>
    %c0_39 = arith.constant 0 : index
    %c0_40 = arith.constant 0 : index
    %89 = vector.load %arg11[%c0_39, %c0_40] : memref<1x32xf32, #tpu.memory_space<vmem>>, vector<1x32xf32>
    %90 = vector.broadcast %89 : vector<1x32xf32> to vector<8x32xf32>
    %91 = arith.addf %88, %90 : vector<8x32xf32>
    %c0_41 = arith.constant 0 : index
    %c0_42 = arith.constant 0 : index
    %c0_43 = arith.constant 0 : index
    %92 = vector.load %arg3[%c0_41, %c0_42, %c0_43] : memref<1x1x8xf32, #tpu.memory_space<vmem>>, vector<1x1x8xf32>
    %93 = arith.truncf %91 : vector<8x32xf32> to vector<8x32xbf16>
    %94 = vector.shape_cast %93 : vector<8x32xbf16> to vector<1x8x32xbf16>
    %95 = vector.broadcast %94 : vector<1x8x32xbf16> to vector<4x8x32xbf16>
    %96 = arith.truncf %3 : vector<8x32xf32> to vector<8x32xbf16>
    %97 = vector.shape_cast %96 : vector<8x32xbf16> to vector<1x8x32xbf16>
    %98 = vector.broadcast %97 : vector<1x8x32xbf16> to vector<4x8x32xbf16>
    %c0_44 = arith.constant 0 : index
    %c0_45 = arith.constant 0 : index
    %c0_46 = arith.constant 0 : index
    %99 = vector.load %arg12[%c0_44, %c0_45, %c0_46] : memref<4x32x8xbf16, #tpu.memory_space<vmem>>, vector<4x32x8xbf16>
    %cst_47 = arith.constant dense<0.000000e+00> : vector<4x8x8xf32>
    %100 = tpu.matmul %95, %99, %cst_47 {dimension_numbers = #tpu.dot_dimension_numbers<[2], [1], [1], [2], [0, 0, 0, 1, 1, 2], [0], [0]>} : vector<4x8x32xbf16>, vector<4x32x8xbf16>, vector<4x8x8xf32> -> vector<4x8x8xf32>
    %c0_48 = arith.constant 0 : index
    %c0_49 = arith.constant 0 : index
    %c0_50 = arith.constant 0 : index
    %101 = vector.load %arg13[%c0_48, %c0_49, %c0_50] : memref<4x1x8xf32, #tpu.memory_space<vmem>>, vector<4x1x8xf32>
    %102 = vector.broadcast %101 : vector<4x1x8xf32> to vector<4x8x8xf32>
    %103 = arith.addf %100, %102 : vector<4x8x8xf32>
    %c0_51 = arith.constant 0 : index
    %c0_52 = arith.constant 0 : index
    %c0_53 = arith.constant 0 : index
    %104 = vector.load %arg14[%c0_51, %c0_52, %c0_53] : memref<4x32x16xbf16, #tpu.memory_space<vmem>>, vector<4x32x16xbf16>
    %cst_54 = arith.constant dense<0.000000e+00> : vector<4x8x16xf32>
    %105 = tpu.matmul %98, %104, %cst_54 {dimension_numbers = #tpu.dot_dimension_numbers<[2], [1], [1], [2], [0, 0, 0, 1, 1, 2], [0], [0]>} : vector<4x8x32xbf16>, vector<4x32x16xbf16>, vector<4x8x16xf32> -> vector<4x8x16xf32>
    %c0_55 = arith.constant 0 : index
    %c0_56 = arith.constant 0 : index
    %c0_57 = arith.constant 0 : index
    %106 = vector.load %arg15[%c0_55, %c0_56, %c0_57] : memref<4x1x16xf32, #tpu.memory_space<vmem>>, vector<4x1x16xf32>
    %107 = vector.broadcast %106 : vector<4x1x16xf32> to vector<4x8x16xf32>
    %108 = arith.addf %105, %107 : vector<4x8x16xf32>
    %109 = vector.extract_strided_slice %108 {offsets = [0, 0, 0], sizes = [4, 8, 8], strides = [1, 1, 1]} : vector<4x8x16xf32> to vector<4x8x8xf32>
    %110 = vector.extract_strided_slice %108 {offsets = [0, 0, 8], sizes = [4, 8, 8], strides = [1, 1, 1]} : vector<4x8x16xf32> to vector<4x8x8xf32>
    %111 = arith.truncf %103 : vector<4x8x8xf32> to vector<4x8x8xbf16>
    %112 = arith.truncf %109 : vector<4x8x8xf32> to vector<4x8x8xbf16>
    %cst_58 = arith.constant dense<0.000000e+00> : vector<4x8x8xf32>
    %113 = tpu.matmul %111, %112, %cst_58 {dimension_numbers = #tpu.dot_dimension_numbers<[2], [2], [1], [1], [0, 0, 0, 1, 1, 1], [0], [0]>} : vector<4x8x8xbf16>, vector<4x8x8xbf16>, vector<4x8x8xf32> -> vector<4x8x8xf32>
    %114 = vector.shape_cast %92 : vector<1x1x8xf32> to vector<1x1x8xf32>
    %115 = vector.broadcast %114 : vector<1x1x8xf32> to vector<4x8x8xf32>
    %cst_59 = arith.constant 0.000000e+00 : f32
    %116 = vector.broadcast %cst_59 : f32 to vector<4x8x8xf32>
    %117 = arith.cmpf one, %115, %116 : vector<4x8x8xf32>
    %cst_60 = arith.constant -1.000000e+09 : f32
    %118 = vector.broadcast %cst_60 : f32 to vector<4x8x8xf32>
    %119 = arith.select %117, %118, %113 : vector<4x8x8xi1>, vector<4x8x8xf32>
    %cst_61 = arith.constant dense<0xFF800000> : vector<4x8xf32>
    %120 = vector.multi_reduction <maximumf>, %119, %cst_61 [2] : vector<4x8x8xf32> to vector<4x8xf32>
    %121 = vector.shape_cast %120 : vector<4x8xf32> to vector<4x8x1xf32>
    %122 = vector.broadcast %121 : vector<4x8x1xf32> to vector<4x8x8xf32>
    %123 = arith.subf %119, %122 : vector<4x8x8xf32>
    %124 = math.exp %123 : vector<4x8x8xf32>
    %cst_62 = arith.constant dense<0.000000e+00> : vector<4x8xf32>
    %125 = vector.multi_reduction <add>, %124, %cst_62 [2] : vector<4x8x8xf32> to vector<4x8xf32>
    %126 = vector.shape_cast %125 : vector<4x8xf32> to vector<4x8x1xf32>
    %127 = tpu.reciprocal %126 {approx = true} : vector<4x8x1xf32> -> vector<4x8x1xf32>
    %128 = vector.broadcast %127 : vector<4x8x1xf32> to vector<4x8x8xf32>
    %129 = arith.mulf %124, %128 : vector<4x8x8xf32>
    %130 = arith.truncf %129 : vector<4x8x8xf32> to vector<4x8x8xbf16>
    %131 = arith.truncf %110 : vector<4x8x8xf32> to vector<4x8x8xbf16>
    %cst_63 = arith.constant dense<0.000000e+00> : vector<4x8x8xf32>
    %132 = tpu.matmul %130, %131, %cst_63 {dimension_numbers = #tpu.dot_dimension_numbers<[2], [1], [1], [2], [0, 0, 0, 1, 1, 2], [0], [0]>} : vector<4x8x8xbf16>, vector<4x8x8xbf16>, vector<4x8x8xf32> -> vector<4x8x8xf32>
    %133 = arith.truncf %132 : vector<4x8x8xf32> to vector<4x8x8xbf16>
    %c0_64 = arith.constant 0 : index
    %c0_65 = arith.constant 0 : index
    %c0_66 = arith.constant 0 : index
    %134 = vector.load %arg16[%c0_64, %c0_65, %c0_66] : memref<4x8x32xbf16, #tpu.memory_space<vmem>>, vector<4x8x32xbf16>
    %cst_67 = arith.constant dense<0.000000e+00> : vector<4x8x32xf32>
    %135 = tpu.matmul %133, %134, %cst_67 {dimension_numbers = #tpu.dot_dimension_numbers<[2], [1], [1], [2], [0, 0, 0, 1, 1, 2], [0], [0]>} : vector<4x8x8xbf16>, vector<4x8x32xbf16>, vector<4x8x32xf32> -> vector<4x8x32xf32>
    %136 = vector.extract_strided_slice %135 {offsets = [0, 0, 0], sizes = [1, 8, 32], strides = [1, 1, 1]} : vector<4x8x32xf32> to vector<1x8x32xf32>
    %137 = vector.shape_cast %136 : vector<1x8x32xf32> to vector<8x32xf32>
    %138 = vector.extract_strided_slice %135 {offsets = [1, 0, 0], sizes = [1, 8, 32], strides = [1, 1, 1]} : vector<4x8x32xf32> to vector<1x8x32xf32>
    %139 = vector.shape_cast %138 : vector<1x8x32xf32> to vector<8x32xf32>
    %140 = arith.addf %137, %139 : vector<8x32xf32>
    %141 = vector.extract_strided_slice %135 {offsets = [2, 0, 0], sizes = [1, 8, 32], strides = [1, 1, 1]} : vector<4x8x32xf32> to vector<1x8x32xf32>
    %142 = vector.shape_cast %141 : vector<1x8x32xf32> to vector<8x32xf32>
    %143 = arith.addf %140, %142 : vector<8x32xf32>
    %144 = vector.extract_strided_slice %135 {offsets = [3, 0, 0], sizes = [1, 8, 32], strides = [1, 1, 1]} : vector<4x8x32xf32> to vector<1x8x32xf32>
    %145 = vector.shape_cast %144 : vector<1x8x32xf32> to vector<8x32xf32>
    %146 = arith.addf %143, %145 : vector<8x32xf32>
    %c0_68 = arith.constant 0 : index
    %c0_69 = arith.constant 0 : index
    %147 = vector.load %arg17[%c0_68, %c0_69] : memref<1x32xf32, #tpu.memory_space<vmem>>, vector<1x32xf32>
    %148 = vector.broadcast %147 : vector<1x32xf32> to vector<8x32xf32>
    %149 = arith.addf %146, %148 : vector<8x32xf32>
    %150 = arith.addf %149, %91 : vector<8x32xf32>
    %cst_70 = arith.constant dense<0.000000e+00> : vector<8xf32>
    %151 = vector.multi_reduction <add>, %150, %cst_70 [1] : vector<8x32xf32> to vector<8xf32>
    %152 = vector.shape_cast %151 : vector<8xf32> to vector<8x1xf32>
    %cst_71 = arith.constant 3.200000e+01 : f32
    %153 = vector.broadcast %cst_71 : f32 to vector<8x1xf32>
    %154 = arith.divf %152, %153 : vector<8x1xf32>
    %155 = vector.broadcast %154 : vector<8x1xf32> to vector<8x32xf32>
    %156 = arith.subf %150, %155 : vector<8x32xf32>
    %157 = arith.mulf %156, %156 : vector<8x32xf32>
    %cst_72 = arith.constant dense<0.000000e+00> : vector<8xf32>
    %158 = vector.multi_reduction <add>, %157, %cst_72 [1] : vector<8x32xf32> to vector<8xf32>
    %159 = vector.shape_cast %158 : vector<8xf32> to vector<8x1xf32>
    %cst_73 = arith.constant 3.200000e+01 : f32
    %160 = vector.broadcast %cst_73 : f32 to vector<8x1xf32>
    %161 = arith.divf %159, %160 : vector<8x1xf32>
    %162 = vector.broadcast %154 : vector<8x1xf32> to vector<8x32xf32>
    %163 = arith.subf %150, %162 : vector<8x32xf32>
    %cst_74 = arith.constant 9.99999974E-6 : f32
    %164 = vector.broadcast %cst_74 : f32 to vector<8x1xf32>
    %165 = arith.addf %161, %164 : vector<8x1xf32>
    %166 = math.rsqrt %165 : vector<8x1xf32>
    %167 = vector.broadcast %166 : vector<8x1xf32> to vector<8x32xf32>
    %168 = arith.mulf %163, %167 : vector<8x32xf32>
    %c0_75 = arith.constant 0 : index
    %c0_76 = arith.constant 0 : index
    %169 = vector.load %arg18[%c0_75, %c0_76] : memref<1x32xf32, #tpu.memory_space<vmem>>, vector<1x32xf32>
    %170 = vector.broadcast %169 : vector<1x32xf32> to vector<8x32xf32>
    %171 = arith.mulf %168, %170 : vector<8x32xf32>
    %c0_77 = arith.constant 0 : index
    %c0_78 = arith.constant 0 : index
    %172 = vector.load %arg19[%c0_77, %c0_78] : memref<1x32xf32, #tpu.memory_space<vmem>>, vector<1x32xf32>
    %173 = vector.broadcast %172 : vector<1x32xf32> to vector<8x32xf32>
    %174 = arith.addf %171, %173 : vector<8x32xf32>
    %175 = arith.truncf %174 : vector<8x32xf32> to vector<8x32xbf16>
    %c0_79 = arith.constant 0 : index
    %c0_80 = arith.constant 0 : index
    %176 = vector.load %arg20[%c0_79, %c0_80] : memref<32x128xbf16, #tpu.memory_space<vmem>>, vector<32x128xbf16>
    %cst_81 = arith.constant dense<0.000000e+00> : vector<8x128xf32>
    %177 = tpu.matmul %175, %176, %cst_81 {dimension_numbers = #tpu.dot_dimension_numbers<[1], [0], [0], [1], [0, 0, 1, 1], [], []>} : vector<8x32xbf16>, vector<32x128xbf16>, vector<8x128xf32> -> vector<8x128xf32>
    %c0_82 = arith.constant 0 : index
    %c0_83 = arith.constant 0 : index
    %178 = vector.load %arg21[%c0_82, %c0_83] : memref<1x128xf32, #tpu.memory_space<vmem>>, vector<1x128xf32>
    %179 = vector.broadcast %178 : vector<1x128xf32> to vector<8x128xf32>
    %180 = arith.addf %177, %179 : vector<8x128xf32>
    %cst_84 = arith.constant 0.000000e+00 : f32
    %181 = vector.broadcast %cst_84 : f32 to vector<8x128xf32>
    %182 = arith.maximumf %180, %181 : vector<8x128xf32>
    %183 = arith.truncf %182 : vector<8x128xf32> to vector<8x128xbf16>
    %c0_85 = arith.constant 0 : index
    %c0_86 = arith.constant 0 : index
    %184 = vector.load %arg22[%c0_85, %c0_86] : memref<128x32xbf16, #tpu.memory_space<vmem>>, vector<128x32xbf16>
    %cst_87 = arith.constant dense<0.000000e+00> : vector<8x32xf32>
    %185 = tpu.matmul %183, %184, %cst_87 {dimension_numbers = #tpu.dot_dimension_numbers<[1], [0], [0], [1], [0, 0, 1, 1], [], []>} : vector<8x128xbf16>, vector<128x32xbf16>, vector<8x32xf32> -> vector<8x32xf32>
    %c0_88 = arith.constant 0 : index
    %c0_89 = arith.constant 0 : index
    %186 = vector.load %arg23[%c0_88, %c0_89] : memref<1x32xf32, #tpu.memory_space<vmem>>, vector<1x32xf32>
    %187 = vector.broadcast %186 : vector<1x32xf32> to vector<8x32xf32>
    %188 = arith.addf %185, %187 : vector<8x32xf32>
    %189 = arith.addf %174, %188 : vector<8x32xf32>
    %cst_90 = arith.constant dense<0.000000e+00> : vector<8xf32>
    %190 = vector.multi_reduction <add>, %189, %cst_90 [1] : vector<8x32xf32> to vector<8xf32>
    %191 = vector.shape_cast %190 : vector<8xf32> to vector<8x1xf32>
    %cst_91 = arith.constant 3.200000e+01 : f32
    %192 = vector.broadcast %cst_91 : f32 to vector<8x1xf32>
    %193 = arith.divf %191, %192 : vector<8x1xf32>
    %194 = vector.broadcast %193 : vector<8x1xf32> to vector<8x32xf32>
    %195 = arith.subf %189, %194 : vector<8x32xf32>
    %196 = arith.mulf %195, %195 : vector<8x32xf32>
    %cst_92 = arith.constant dense<0.000000e+00> : vector<8xf32>
    %197 = vector.multi_reduction <add>, %196, %cst_92 [1] : vector<8x32xf32> to vector<8xf32>
    %198 = vector.shape_cast %197 : vector<8xf32> to vector<8x1xf32>
    %cst_93 = arith.constant 3.200000e+01 : f32
    %199 = vector.broadcast %cst_93 : f32 to vector<8x1xf32>
    %200 = arith.divf %198, %199 : vector<8x1xf32>
    %201 = vector.broadcast %193 : vector<8x1xf32> to vector<8x32xf32>
    %202 = arith.subf %189, %201 : vector<8x32xf32>
    %cst_94 = arith.constant 9.99999974E-6 : f32
    %203 = vector.broadcast %cst_94 : f32 to vector<8x1xf32>
    %204 = arith.addf %200, %203 : vector<8x1xf32>
    %205 = math.rsqrt %204 : vector<8x1xf32>
    %206 = vector.broadcast %205 : vector<8x1xf32> to vector<8x32xf32>
    %207 = arith.mulf %202, %206 : vector<8x32xf32>
    %c0_95 = arith.constant 0 : index
    %c0_96 = arith.constant 0 : index
    %208 = vector.load %arg24[%c0_95, %c0_96] : memref<1x32xf32, #tpu.memory_space<vmem>>, vector<1x32xf32>
    %209 = vector.broadcast %208 : vector<1x32xf32> to vector<8x32xf32>
    %210 = arith.mulf %207, %209 : vector<8x32xf32>
    %c0_97 = arith.constant 0 : index
    %c0_98 = arith.constant 0 : index
    %211 = vector.load %arg25[%c0_97, %c0_98] : memref<1x32xf32, #tpu.memory_space<vmem>>, vector<1x32xf32>
    %212 = vector.broadcast %211 : vector<1x32xf32> to vector<8x32xf32>
    %213 = arith.addf %210, %212 : vector<8x32xf32>
    %c0_99 = arith.constant 0 : index
    %c0_100 = arith.constant 0 : index
    %c0_101 = arith.constant 0 : index
    %214 = vector.load %arg26[%c0_99, %c0_100, %c0_101] : memref<1x8x32xf32, #tpu.memory_space<vmem>>, vector<1x8x32xf32>
    %215 = vector.shape_cast %214 : vector<1x8x32xf32> to vector<8x32xf32>
    %216 = vector.shape_cast %213 : vector<8x32xf32> to vector<1x8x32xf32>
    tpu.vector_store %arg26[%c0_99, %c0_100, %c0_101], %216 {strides = array<i32>} : memref<1x8x32xf32, #tpu.memory_space<vmem>>, vector<1x8x32xf32>,
    return
  }
  func.func @transform_0(%arg0: i32) -> (i32, i32, i32) {
    %c0_i32 = arith.constant 0 : i32
    %c0_i32_0 = arith.constant 0 : i32
    %c0_i32_1 = arith.constant 0 : i32
    return %arg0, %c0_i32, %c0_i32_0 : i32, i32, i32
  }
  func.func @transform_1(%arg0: i32) -> (i32, i32, i32) {
    %c0_i32 = arith.constant 0 : i32
    %c0_i32_0 = arith.constant 0 : i32
    %c0_i32_1 = arith.constant 0 : i32
    return %arg0, %c0_i32, %c0_i32_0 : i32, i32, i32
  }
  func.func @transform_2(%arg0: i32) -> (i32, i32, i32) {
    %c0_i32 = arith.constant 0 : i32
    %c0_i32_0 = arith.constant 0 : i32
    %c0_i32_1 = arith.constant 0 : i32
    return %arg0, %c0_i32, %c0_i32_0 : i32, i32, i32
  }
  func.func @transform_3(%arg0: i32) -> (i32, i32, i32) {
    %c0_i32 = arith.constant 0 : i32
    %c0_i32_0 = arith.constant 0 : i32
    %c0_i32_1 = arith.constant 0 : i32
    %c0_i32_2 = arith.constant 0 : i32
    return %c0_i32, %c0_i32_0, %c0_i32_1 : i32, i32, i32
  }
  func.func @transform_4(%arg0: i32) -> (i32, i32, i32) {
    %c0_i32 = arith.constant 0 : i32
    %c0_i32_0 = arith.constant 0 : i32
    %c0_i32_1 = arith.constant 0 : i32
    %c0_i32_2 = arith.constant 0 : i32
    return %c0_i32, %c0_i32_0, %c0_i32_1 : i32, i32, i32
  }
  func.func @transform_5(%arg0: i32) -> (i32, i32, i32) {
    %c0_i32 = arith.constant 0 : i32
    %c0_i32_0 = arith.constant 0 : i32
    %c0_i32_1 = arith.constant 0 : i32
    %c0_i32_2 = arith.constant 0 : i32
    return %c0_i32, %c0_i32_0, %c0_i32_1 : i32, i32, i32
  }
  func.func @transform_6(%arg0: i32) -> (i32, i32, i32) {
    %c0_i32 = arith.constant 0 : i32
    %c0_i32_0 = arith.constant 0 : i32
    %c0_i32_1 = arith.constant 0 : i32
    %c0_i32_2 = arith.constant 0 : i32
    return %c0_i32, %c0_i32_0, %c0_i32_1 : i32, i32, i32
  }
  func.func @transform_7(%arg0: i32) -> (i32, i32, i32) {
    %c0_i32 = arith.constant 0 : i32
    %c0_i32_0 = arith.constant 0 : i32
    %c0_i32_1 = arith.constant 0 : i32
    %c0_i32_2 = arith.constant 0 : i32
    return %c0_i32, %c0_i32_0, %c0_i32_1 : i32, i32, i32
  }
  func.func @transform_8(%arg0: i32) -> (i32, i32) {
    %c0_i32 = arith.constant 0 : i32
    %c0_i32_0 = arith.constant 0 : i32
    %c0_i32_1 = arith.constant 0 : i32
    return %c0_i32, %c0_i32_0 : i32, i32
  }
  func.func @transform_9(%arg0: i32) -> (i32, i32) {
    %c0_i32 = arith.constant 0 : i32
    %c0_i32_0 = arith.constant 0 : i32
    %c0_i32_1 = arith.constant 0 : i32
    return %c0_i32, %c0_i32_0 : i32, i32
  }
  func.func @transform_10(%arg0: i32) -> (i32, i32) {
    %c0_i32 = arith.constant 0 : i32
    %c0_i32_0 = arith.constant 0 : i32
    %c0_i32_1 = arith.constant 0 : i32
    return %c0_i32, %c0_i32_0 : i32, i32
  }
  func.func @transform_11(%arg0: i32) -> (i32, i32, i32) {
    %c0_i32 = arith.constant 0 : i32
    %c0_i32_0 = arith.constant 0 : i32
    %c0_i32_1 = arith.constant 0 : i32
    %c0_i32_2 = arith.constant 0 : i32
    return %c0_i32, %c0_i32_0, %c0_i32_1 : i32, i32, i32
  }
  func.func @transform_12(%arg0: i32) -> (i32, i32, i32) {
    %c0_i32 = arith.constant 0 : i32
    %c0_i32_0 = arith.constant 0 : i32
    %c0_i32_1 = arith.constant 0 : i32
    %c0_i32_2 = arith.constant 0 : i32
    return %c0_i32, %c0_i32_0, %c0_i32_1 : i32, i32, i32
  }
  func.func @transform_13(%arg0: i32) -> (i32, i32, i32) {
    %c0_i32 = arith.constant 0 : i32
    %c0_i32_0 = arith.constant 0 : i32
    %c0_i32_1 = arith.constant 0 : i32
    %c0_i32_2 = arith.constant 0 : i32
    return %c0_i32, %c0_i32_0, %c0_i32_1 : i32, i32, i32
  }
  func.func @transform_14(%arg0: i32) -> (i32, i32, i32) {
    %c0_i32 = arith.constant 0 : i32
    %c0_i32_0 = arith.constant 0 : i32
    %c0_i32_1 = arith.constant 0 : i32
    %c0_i32_2 = arith.constant 0 : i32
    return %c0_i32, %c0_i32_0, %c0_i32_1 : i32, i32, i32
  }
  func.func @transform_15(%arg0: i32) -> (i32, i32, i32) {
    %c0_i32 = arith.constant 0 : i32
    %c0_i32_0 = arith.constant 0 : i32
    %c0_i32_1 = arith.constant 0 : i32
    %c0_i32_2 = arith.constant 0 : i32
    return %c0_i32, %c0_i32_0, %c0_i32_1 : i32, i32, i32
  }
  func.func @transform_16(%arg0: i32) -> (i32, i32) {
    %c0_i32 = arith.constant 0 : i32
    %c0_i32_0 = arith.constant 0 : i32
    %c0_i32_1 = arith.constant 0 : i32
    return %c0_i32, %c0_i32_0 : i32, i32
  }
  func.func @transform_17(%arg0: i32) -> (i32, i32) {
    %c0_i32 = arith.constant 0 : i32
    %c0_i32_0 = arith.constant 0 : i32
    %c0_i32_1 = arith.constant 0 : i32
    return %c0_i32, %c0_i32_0 : i32, i32
  }
  func.func @transform_18(%arg0: i32) -> (i32, i32) {
    %c0_i32 = arith.constant 0 : i32
    %c0_i32_0 = arith.constant 0 : i32
    %c0_i32_1 = arith.constant 0 : i32
    return %c0_i32, %c0_i32_0 : i32, i32
  }
  func.func @transform_19(%arg0: i32) -> (i32, i32) {
    %c0_i32 = arith.constant 0 : i32
    %c0_i32_0 = arith.constant 0 : i32
    %c0_i32_1 = arith.constant 0 : i32
    return %c0_i32, %c0_i32_0 : i32, i32
  }
  func.func @transform_20(%arg0: i32) -> (i32, i32) {
    %c0_i32 = arith.constant 0 : i32
    %c0_i32_0 = arith.constant 0 : i32
    %c0_i32_1 = arith.constant 0 : i32
    return %c0_i32, %c0_i32_0 : i32, i32
  }
  func.func @transform_21(%arg0: i32) -> (i32, i32) {
    %c0_i32 = arith.constant 0 : i32
    %c0_i32_0 = arith.constant 0 : i32
    %c0_i32_1 = arith.constant 0 : i32
    return %c0_i32, %c0_i32_0 : i32, i32
  }
  func.func @transform_22(%arg0: i32) -> (i32, i32) {
    %c0_i32 = arith.constant 0 : i32
    %c0_i32_0 = arith.constant 0 : i32
    %c0_i32_1 = arith.constant 0 : i32
    return %c0_i32, %c0_i32_0 : i32, i32
  }
  func.func @transform_23(%arg0: i32) -> (i32, i32) {
    %c0_i32 = arith.constant 0 : i32
    %c0_i32_0 = arith.constant 0 : i32
    %c0_i32_1 = arith.constant 0 : i32
    return %c0_i32, %c0_i32_0 : i32, i32
  }
  func.func @transform_24(%arg0: i32) -> (i32, i32) {
    %c0_i32 = arith.constant 0 : i32
    %c0_i32_0 = arith.constant 0 : i32
    %c0_i32_1 = arith.constant 0 : i32
    return %c0_i32, %c0_i32_0 : i32, i32
  }
  func.func @transform_25(%arg0: i32) -> (i32, i32, i32) {
    %c0_i32 = arith.constant 0 : i32
    %c0_i32_0 = arith.constant 0 : i32
    %c0_i32_1 = arith.constant 0 : i32
    return %arg0, %c0_i32, %c0_i32_0 : i32, i32, i32
  }
}

module attributes {stable_mosaic.version = 11 : i64} {
  func.func @_decoder_layer_kernel(%arg0: i32, %arg1: memref<1x8x32xf32, #tpu.memory_space<vmem>>, %arg2: memref<1x8x32xf32, #tpu.memory_space<vmem>>, %arg3: memref<1x1x8xf32, #tpu.memory_space<vmem>>, %arg4: memref<4x32x8xbf16, #tpu.memory_space<vmem>>, %arg5: memref<4x1x8xf32, #tpu.memory_space<vmem>>, %arg6: memref<4x32x16xbf16, #tpu.memory_space<vmem>>, %arg7: memref<4x1x16xf32, #tpu.memory_space<vmem>>, %arg8: memref<4x8x32xbf16, #tpu.memory_space<vmem>>, %arg9: memref<1x32xf32, #tpu.memory_space<vmem>>, %arg10: memref<1x32xf32, #tpu.memory_space<vmem>>, %arg11: memref<1x32xf32, #tpu.memory_space<vmem>>, %arg12: memref<4x32x8xbf16, #tpu.memory_space<vmem>>, %arg13: memref<4x1x8xf32, #tpu.memory_space<vmem>>, %arg14: memref<4x32x16xbf16, #tpu.memory_space<vmem>>, %arg15: memref<4x1x16xf32, #tpu.memory_space<vmem>>, %arg16: memref<4x8x32xbf16, #tpu.memory_space<vmem>>, %arg17: memref<1x32xf32, #tpu.memory_space<vmem>>, %arg18: memref<1x32xf32, #tpu.memory_space<vmem>>, %arg19: memref<1x32xf32, #tpu.memory_space<vmem>>, %arg20: memref<32x128xbf16, #tpu.memory_space<vmem>>, %arg21: memref<1x128xf32, #tpu.memory_space<vmem>>, %arg22: memref<128x32xbf16, #tpu.memory_space<vmem>>, %arg23: memref<1x32xf32, #tpu.memory_space<vmem>>, %arg24: memref<1x32xf32, #tpu.memory_space<vmem>>, %arg25: memref<1x32xf32, #tpu.memory_space<vmem>>, %arg26: memref<1x8x32xf32, #tpu.memory_space<vmem>>) attributes {dimension_semantics = [#tpu.dimension_semantics<parallel>], iteration_bounds = array<i64: 2>, scalar_prefetch = 0 : i64, scratch_operands = 0 : i64, tpu.core_type = #tpu.core_type<tc>, window_params = [{transform_indices = @transform_0, window_bounds = array<i64: 1, 8, 32>}, {transform_indices = @transform_1, window_bounds = array<i64: 1, 8, 32>}, {transform_indices = @transform_2, window_bounds = array<i64: 1, 1, 8>}, {pipeline_mode = #tpu.pipeline_mode<synchronous>, transform_indices = @transform_3, window_bounds = array<i64: 4, 32, 8>}, {pipeline_mode = #tpu.pipeline_mode<synchronous>, transform_indices = @transform_4, window_bounds = array<i64: 4, 1, 8>}, {pipeline_mode = #tpu.pipeline_mode<synchronous>, transform_indices = @transform_5, window_bounds = array<i64: 4, 32, 16>}, {pipeline_mode = #tpu.pipeline_mode<synchronous>, transform_indices = @transform_6, window_bounds = array<i64: 4, 1, 16>}, {pipeline_mode = #tpu.pipeline_mode<synchronous>, transform_indices = @transform_7, window_bounds = array<i64: 4, 8, 32>}, {pipeline_mode = #tpu.pipeline_mode<synchronous>, transform_indices = @transform_8, window_bounds = array<i64: 1, 32>}, {pipeline_mode = #tpu.pipeline_mode<synchronous>, transform_indices = @transform_9, window_bounds = array<i64: 1, 32>}, {pipeline_mode = #tpu.pipeline_mode<synchronous>, transform_indices = @transform_10, window_bounds = array<i64: 1, 32>}, {pipeline_mode = #tpu.pipeline_mode<synchronous>, transform_indices = @transform_11, window_bounds = array<i64: 4, 32, 8>}, {pipeline_mode = #tpu.pipeline_mode<synchronous>, transform_indices = @transform_12, window_bounds = array<i64: 4, 1, 8>}, {pipeline_mode = #tpu.pipeline_mode<synchronous>, transform_indices = @transform_13, window_bounds = array<i64: 4, 32, 16>}, {pipeline_mode = #tpu.pipeline_mode<synchronous>, transform_indices = @transform_14, window_bounds = array<i64: 4, 1, 16>}, {pipeline_mode = #tpu.pipeline_mode<synchronous>, transform_indices = @transform_15, window_bounds = array<i64: 4, 8, 32>}, {pipeline_mode = #tpu.pipeline_mode<synchronous>, transform_indices = @transform_16, window_bounds = array<i64: 1, 32>}, {pipeline_mode = #tpu.pipeline_mode<synchronous>, transform_indices = @transform_17, window_bounds = array<i64: 1, 32>}, {pipeline_mode = #tpu.pipeline_mode<synchronous>, transform_indices = @transform_18, window_bounds = array<i64: 1, 32>}, {pipeline_mode = #tpu.pipeline_mode<synchronous>, transform_indices = @transform_19, window_bounds = array<i64: 32, 128>}, {pipeline_mode = #tpu.pipeline_mode<synchronous>, transform_indices = @transform_20, window_bounds = array<i64: 1, 128>}, {pipeline_mode = #tpu.pipeline_mode<synchronous>, transform_indices = @transform_21, window_bounds = array<i64: 128, 32>}, {pipeline_mode = #tpu.pipeline_mode<synchronous>, transform_indices = @transform_22, window_bounds = array<i64: 1, 32>}, {pipeline_mode = #tpu.pipeline_mode<synchronous>, transform_indices = @transform_23, window_bounds = array<i64: 1, 32>}, {pipeline_mode = #tpu.pipeline_mode<synchronous>, transform_indices = @transform_24, window_bounds = array<i64: 1, 32>}, {transform_indices = @transform_25, window_bounds = array<i64: 1, 8, 32>}]} {
    %c0 = arith.constant 0 : index
    %c0_0 = arith.constant 0 : index
    %c0_1 = arith.constant 0 : index
    %0 = vector.load %arg1[%c0, %c0_0, %c0_1] : memref<1x8x32xf32, #tpu.memory_space<vmem>>, vector<1x8x32xf32>
    %1 = vector.shape_cast %0 : vector<1x8x32xf32> to vector<8x32xf32>
    %c0_2 = arith.constant 0 : index
    %c0_3 = arith.constant 0 : index
    %c0_4 = arith.constant 0 : index
    %2 = vector.load %arg2[%c0_2, %c0_3, %c0_4] : memref<1x8x32xf32, #tpu.memory_space<vmem>>, vector<1x8x32xf32>
    %3 = vector.shape_cast %2 : vector<1x8x32xf32> to vector<8x32xf32>
    %4 = tpu.iota {dimensions = array<i32: 1>} : vector<1x8x8xi32>
    %5 = tpu.iota {dimensions = array<i32: 2>} : vector<1x8x8xi32>
    %6 = arith.cmpi sgt, %5, %4 : vector<1x8x8xi32>
    %cst = arith.constant 1.000000e+00 : f32
    %cst_5 = arith.constant 0.000000e+00 : f32
    %7 = vector.broadcast %cst : f32 to vector<1x8x8xf32>
    %8 = vector.broadcast %cst_5 : f32 to vector<1x8x8xf32>
    %9 = arith.select %6, %7, %8 : vector<1x8x8xi1>, vector<1x8x8xf32>
    %10 = arith.truncf %1 : vector<8x32xf32> to vector<8x32xbf16>
    %11 = vector.shape_cast %10 : vector<8x32xbf16> to vector<1x8x32xbf16>
    %12 = vector.broadcast %11 : vector<1x8x32xbf16> to vector<4x8x32xbf16>
    %13 = arith.truncf %1 : vector<8x32xf32> to vector<8x32xbf16>
    %14 = vector.shape_cast %13 : vector<8x32xbf16> to vector<1x8x32xbf16>
    %15 = vector.broadcast %14 : vector<1x8x32xbf16> to vector<4x8x32xbf16>
    %c0_6 = arith.constant 0 : index
    %c0_7 = arith.constant 0 : index
    %c0_8 = arith.constant 0 : index
    %16 = vector.load %arg4[%c0_6, %c0_7, %c0_8] : memref<4x32x8xbf16, #tpu.memory_space<vmem>>, vector<4x32x8xbf16>
    %cst_9 = arith.constant dense<0.000000e+00> : vector<4x8x8xf32>
    %17 = tpu.matmul %12, %16, %cst_9 {dimension_numbers = #tpu.dot_dimension_numbers<[2], [1], [1], [2], [0, 0, 0, 1, 1, 2], [0], [0]>} : vector<4x8x32xbf16>, vector<4x32x8xbf16>, vector<4x8x8xf32> -> vector<4x8x8xf32>
    %c0_10 = arith.constant 0 : index
    %c0_11 = arith.constant 0 : index
    %c0_12 = arith.constant 0 : index
    %18 = vector.load %arg5[%c0_10, %c0_11, %c0_12] : memref<4x1x8xf32, #tpu.memory_space<vmem>>, vector<4x1x8xf32>
    %19 = vector.broadcast %18 : vector<4x1x8xf32> to vector<4x8x8xf32>
    %20 = arith.addf %17, %19 : vector<4x8x8xf32>
    %c0_13 = arith.constant 0 : index
    %c0_14 = arith.constant 0 : index
    %c0_15 = arith.constant 0 : index
    %21 = vector.load %arg6[%c0_13, %c0_14, %c0_15] : memref<4x32x16xbf16, #tpu.memory_space<vmem>>, vector<4x32x16xbf16>
    %cst_16 = arith.constant dense<0.000000e+00> : vector<4x8x16xf32>
    %22 = tpu.matmul %15, %21, %cst_16 {dimension_numbers = #tpu.dot_dimension_numbers<[2], [1], [1], [2], [0, 0, 0, 1, 1, 2], [0], [0]>} : vector<4x8x32xbf16>, vector<4x32x16xbf16>, vector<4x8x16xf32> -> vector<4x8x16xf32>
    %c0_17 = arith.constant 0 : index
    %c0_18 = arith.constant 0 : index
    %c0_19 = arith.constant 0 : index
    %23 = vector.load %arg7[%c0_17, %c0_18, %c0_19] : memref<4x1x16xf32, #tpu.memory_space<vmem>>, vector<4x1x16xf32>
    %24 = vector.broadcast %23 : vector<4x1x16xf32> to vector<4x8x16xf32>
    %25 = arith.addf %22, %24 : vector<4x8x16xf32>
    %26 = vector.extract_strided_slice %25 {offsets = [0, 0, 0], sizes = [4, 8, 8], strides = [1, 1, 1]} : vector<4x8x16xf32> to vector<4x8x8xf32>
    %27 = vector.extract_strided_slice %25 {offsets = [0, 0, 8], sizes = [4, 8, 8], strides = [1, 1, 1]} : vector<4x8x16xf32> to vector<4x8x8xf32>
    %28 = arith.truncf %20 : vector<4x8x8xf32> to vector<4x8x8xbf16>
    %29 = arith.truncf %26 : vector<4x8x8xf32> to vector<4x8x8xbf16>
    %cst_20 = arith.constant dense<0.000000e+00> : vector<4x8x8xf32>
    %30 = tpu.matmul %28, %29, %cst_20 {dimension_numbers = #tpu.dot_dimension_numbers<[2], [2], [1], [1], [0, 0, 0, 1, 1, 1], [0], [0]>} : vector<4x8x8xbf16>, vector<4x8x8xbf16>, vector<4x8x8xf32> -> vector<4x8x8xf32>
    %31 = vector.shape_cast %9 : vector<1x8x8xf32> to vector<1x8x8xf32>
    %32 = vector.broadcast %31 : vector<1x8x8xf32> to vector<4x8x8xf32>
    %cst_21 = arith.constant 0.000000e+00 : f32
    %33 = vector.broadcast %cst_21 : f32 to vector<4x8x8xf32>
    %34 = arith.cmpf one, %32, %33 : vector<4x8x8xf32>
    %cst_22 = arith.constant -1.000000e+09 : f32
    %35 = vector.broadcast %cst_22 : f32 to vector<4x8x8xf32>
    %36 = arith.select %34, %35, %30 : vector<4x8x8xi1>, vector<4x8x8xf32>
    %cst_23 = arith.constant dense<0xFF800000> : vector<4x8xf32>
    %37 = vector.multi_reduction <maximumf>, %36, %cst_23 [2] : vector<4x8x8xf32> to vector<4x8xf32>
    %38 = vector.shape_cast %37 : vector<4x8xf32> to vector<4x8x1xf32>
    %39 = vector.broadcast %38 : vector<4x8x1xf32> to vector<4x8x8xf32>
    %40 = arith.subf %36, %39 : vector<4x8x8xf32>
    %41 = math.exp %40 : vector<4x8x8xf32>
    %cst_24 = arith.constant dense<0.000000e+00> : vector<4x8xf32>
    %42 = vector.multi_reduction <add>, %41, %cst_24 [2] : vector<4x8x8xf32> to vector<4x8xf32>
    %43 = vector.shape_cast %42 : vector<4x8xf32> to vector<4x8x1xf32>
    %44 = tpu.reciprocal %43 {approx = true} : vector<4x8x1xf32> -> vector<4x8x1xf32>
    %45 = vector.broadcast %44 : vector<4x8x1xf32> to vector<4x8x8xf32>
    %46 = arith.mulf %41, %45 : vector<4x8x8xf32>
    %47 = arith.truncf %46 : vector<4x8x8xf32> to vector<4x8x8xbf16>
    %48 = arith.truncf %27 : vector<4x8x8xf32> to vector<4x8x8xbf16>
    %cst_25 = arith.constant dense<0.000000e+00> : vector<4x8x8xf32>
    %49 = tpu.matmul %47, %48, %cst_25 {dimension_numbers = #tpu.dot_dimension_numbers<[2], [1], [1], [2], [0, 0, 0, 1, 1, 2], [0], [0]>} : vector<4x8x8xbf16>, vector<4x8x8xbf16>, vector<4x8x8xf32> -> vector<4x8x8xf32>
    %50 = arith.truncf %49 : vector<4x8x8xf32> to vector<4x8x8xbf16>
    %c0_26 = arith.constant 0 : index
    %c0_27 = arith.constant 0 : index
    %c0_28 = arith.constant 0 : index
    %51 = vector.load %arg8[%c0_26, %c0_27, %c0_28] : memref<4x8x32xbf16, #tpu.memory_space<vmem>>, vector<4x8x32xbf16>
    %cst_29 = arith.constant dense<0.000000e+00> : vector<4x8x32xf32>
    %52 = tpu.matmul %50, %51, %cst_29 {dimension_numbers = #tpu.dot_dimension_numbers<[2], [1], [1], [2], [0, 0, 0, 1, 1, 2], [0], [0]>} : vector<4x8x8xbf16>, vector<4x8x32xbf16>, vector<4x8x32xf32> -> vector<4x8x32xf32>
    %53 = vector.extract_strided_slice %52 {offsets = [0, 0, 0], sizes = [1, 8, 32], strides = [1, 1, 1]} : vector<4x8x32xf32> to vector<1x8x32xf32>
    %54 = vector.shape_cast %53 : vector<1x8x32xf32> to vector<8x32xf32>
    %55 = vector.extract_strided_slice %52 {offsets = [1, 0, 0], sizes = [1, 8, 32], strides = [1, 1, 1]} : vector<4x8x32xf32> to vector<1x8x32xf32>
    %56 = vector.shape_cast %55 : vector<1x8x32xf32> to vector<8x32xf32>
    %57 = arith.addf %54, %56 : vector<8x32xf32>
    %58 = vector.extract_strided_slice %52 {offsets = [2, 0, 0], sizes = [1, 8, 32], strides = [1, 1, 1]} : vector<4x8x32xf32> to vector<1x8x32xf32>
    %59 = vector.shape_cast %58 : vector<1x8x32xf32> to vector<8x32xf32>
    %60 = arith.addf %57, %59 : vector<8x32xf32>
    %61 = vector.extract_strided_slice %52 {offsets = [3, 0, 0], sizes = [1, 8, 32], strides = [1, 1, 1]} : vector<4x8x32xf32> to vector<1x8x32xf32>
    %62 = vector.shape_cast %61 : vector<1x8x32xf32> to vector<8x32xf32>
    %63 = arith.addf %60, %62 : vector<8x32xf32>
    %c0_30 = arith.constant 0 : index
    %c0_31 = arith.constant 0 : index
    %64 = vector.load %arg9[%c0_30, %c0_31] : memref<1x32xf32, #tpu.memory_space<vmem>>, vector<1x32xf32>
    %65 = vector.broadcast %64 : vector<1x32xf32> to vector<8x32xf32>
    %66 = arith.addf %63, %65 : vector<8x32xf32>
    %67 = arith.addf %66, %1 : vector<8x32xf32>
    %cst_32 = arith.constant dense<0.000000e+00> : vector<8xf32>
    %68 = vector.multi_reduction <add>, %67, %cst_32 [1] : vector<8x32xf32> to vector<8xf32>
    %69 = vector.shape_cast %68 : vector<8xf32> to vector<8x1xf32>
    %cst_33 = arith.constant 3.200000e+01 : f32
    %70 = vector.broadcast %cst_33 : f32 to vector<8x1xf32>
    %71 = arith.divf %69, %70 : vector<8x1xf32>
    %72 = vector.broadcast %71 : vector<8x1xf32> to vector<8x32xf32>
    %73 = arith.subf %67, %72 : vector<8x32xf32>
    %74 = arith.mulf %73, %73 : vector<8x32xf32>
    %cst_34 = arith.constant dense<0.000000e+00> : vector<8xf32>
    %75 = vector.multi_reduction <add>, %74, %cst_34 [1] : vector<8x32xf32> to vector<8xf32>
    %76 = vector.shape_cast %75 : vector<8xf32> to vector<8x1xf32>
    %cst_35 = arith.constant 3.200000e+01 : f32
    %77 = vector.broadcast %cst_35 : f32 to vector<8x1xf32>
    %78 = arith.divf %76, %77 : vector<8x1xf32>
    %79 = vector.broadcast %71 : vector<8x1xf32> to vector<8x32xf32>
    %80 = arith.subf %67, %79 : vector<8x32xf32>
    %cst_36 = arith.constant 9.99999974E-6 : f32
    %81 = vector.broadcast %cst_36 : f32 to vector<8x1xf32>
    %82 = arith.addf %78, %81 : vector<8x1xf32>
    %83 = math.rsqrt %82 : vector<8x1xf32>
    %84 = vector.broadcast %83 : vector<8x1xf32> to vector<8x32xf32>
    %85 = arith.mulf %80, %84 : vector<8x32xf32>
    %c0_37 = arith.constant 0 : index
    %c0_38 = arith.constant 0 : index
    %86 = vector.load %arg10[%c0_37, %c0_38] : memref<1x32xf32, #tpu.memory_space<vmem>>, vector<1x32xf32>
    %87 = vector.broadcast %86 : vector<1x32xf32> to vector<8x32xf32>
    %88 = arith.mulf %85, %87 : vector<8x32xf32>
    %c0_39 = arith.constant 0 : index
    %c0_40 = arith.constant 0 : index
    %89 = vector.load %arg11[%c0_39, %c0_40] : memref<1x32xf32, #tpu.memory_space<vmem>>, vector<1x32xf32>
    %90 = vector.broadcast %89 : vector<1x32xf32> to vector<8x32xf32>
    %91 = arith.addf %88, %90 : vector<8x32xf32>
    %c0_41 = arith.constant 0 : index
    %c0_42 = arith.constant 0 : index
    %c0_43 = arith.constant 0 : index
    %92 = vector.load %arg3[%c0_41, %c0_42, %c0_43] : memref<1x1x8xf32, #tpu.memory_space<vmem>>, vector<1x1x8xf32>
    %93 = arith.truncf %91 : vector<8x32xf32> to vector<8x32xbf16>
    %94 = vector.shape_cast %93 : vector<8x32xbf16> to vector<1x8x32xbf16>
    %95 = vector.broadcast %94 : vector<1x8x32xbf16> to vector<4x8x32xbf16>
    %96 = arith.truncf %3 : vector<8x32xf32> to vector<8x32xbf16>
    %97 = vector.shape_cast %96 : vector<8x32xbf16> to vector<1x8x32xbf16>
    %98 = vector.broadcast %97 : vector<1x8x32xbf16> to vector<4x8x32xbf16>
    %c0_44 = arith.constant 0 : index
    %c0_45 = arith.constant 0 : index
    %c0_46 = arith.constant 0 : index
    %99 = vector.load %arg12[%c0_44, %c0_45, %c0_46] : memref<4x32x8xbf16, #tpu.memory_space<vmem>>, vector<4x32x8xbf16>
    %cst_47 = arith.constant dense<0.000000e+00> : vector<4x8x8xf32>
    %100 = tpu.matmul %95, %99, %cst_47 {dimension_numbers = #tpu.dot_dimension_numbers<[2], [1], [1], [2], [0, 0, 0, 1, 1, 2], [0], [0]>} : vector<4x8x32xbf16>, vector<4x32x8xbf16>, vector<4x8x8xf32> -> vector<4x8x8xf32>
    %c0_48 = arith.constant 0 : index
    %c0_49 = arith.constant 0 : index
    %c0_50 = arith.constant 0 : index
    %101 = vector.load %arg13[%c0_48, %c0_49, %c0_50] : memref<4x1x8xf32, #tpu.memory_space<vmem>>, vector<4x1x8xf32>
    %102 = vector.broadcast %101 : vector<4x1x8xf32> to vector<4x8x8xf32>
    %103 = arith.addf %100, %102 : vector<4x8x8xf32>
    %c0_51 = arith.constant 0 : index
    %c0_52 = arith.constant 0 : index
    %c0_53 = arith.constant 0 : index
    %104 = vector.load %arg14[%c0_51, %c0_52, %c0_53] : memref<4x32x16xbf16, #tpu.memory_space<vmem>>, vector<4x32x16xbf16>
    %cst_54 = arith.constant dense<0.000000e+00> : vector<4x8x16xf32>
    %105 = tpu.matmul %98, %104, %cst_54 {dimension_numbers = #tpu.dot_dimension_numbers<[2], [1], [1], [2], [0, 0, 0, 1, 1, 2], [0], [0]>} : vector<4x8x32xbf16>, vector<4x32x16xbf16>, vector<4x8x16xf32> -> vector<4x8x16xf32>
    %c0_55 = arith.constant 0 : index
    %c0_56 = arith.constant 0 : index
    %c0_57 = arith.constant 0 : index
    %106 = vector.load %arg15[%c0_55, %c0_56, %c0_57] : memref<4x1x16xf32, #tpu.memory_space<vmem>>, vector<4x1x16xf32>
    %107 = vector.broadcast %106 : vector<4x1x16xf32> to vector<4x8x16xf32>
    %108 = arith.addf %105, %107 : vector<4x8x16xf32>
    %109 = vector.extract_strided_slice %108 {offsets = [0, 0, 0], sizes = [4, 8, 8], strides = [1, 1, 1]} : vector<4x8x16xf32> to vector<4x8x8xf32>
    %110 = vector.extract_strided_slice %108 {offsets = [0, 0, 8], sizes = [4, 8, 8], strides = [1, 1, 1]} : vector<4x8x16xf32> to vector<4x8x8xf32>
    %111 = arith.truncf %103 : vector<4x8x8xf32> to vector<4x8x8xbf16>
    %112 = arith.truncf %109 : vector<4x8x8xf32> to vector<4x8x8xbf16>
    %cst_58 = arith.constant dense<0.000000e+00> : vector<4x8x8xf32>
    %113 = tpu.matmul %111, %112, %cst_58 {dimension_numbers = #tpu.dot_dimension_numbers<[2], [2], [1], [1], [0, 0, 0, 1, 1, 1], [0], [0]>} : vector<4x8x8xbf16>, vector<4x8x8xbf16>, vector<4x8x8xf32> -> vector<4x8x8xf32>
    %114 = vector.shape_cast %92 : vector<1x1x8xf32> to vector<1x1x8xf32>
    %115 = vector.broadcast %114 : vector<1x1x8xf32> to vector<4x8x8xf32>
    %cst_59 = arith.constant 0.000000e+00 : f32
    %116 = vector.broadcast %cst_59 : f32 to vector<4x8x8xf32>
    %117 = arith.cmpf one, %115, %116 : vector<4x8x8xf32>
    %cst_60 = arith.constant -1.000000e+09 : f32
    %118 = vector.broadcast %cst_60 : f32 to vector<4x8x8xf32>
    %119 = arith.select %117, %118, %113 : vector<4x8x8xi1>, vector<4x8x8xf32>
    %cst_61 = arith.constant dense<0xFF800000> : vector<4x8xf32>
    %120 = vector.multi_reduction <maximumf>, %119, %cst_61 [2] : vector<4x8x8xf32> to vector<4x8xf32>
    %121 = vector.shape_cast %120 : vector<4x8xf32> to vector<4x8x1xf32>
    %122 = vector.broadcast %121 : vector<4x8x1xf32> to vector<4x8x8xf32>
    %123 = arith.subf %119, %122 : vector<4x8x8xf32>
    %124 = math.exp %123 : vector<4x8x8xf32>
    %cst_62 = arith.constant dense<0.000000e+00> : vector<4x8xf32>
    %125 = vector.multi_reduction <add>, %124, %cst_62 [2] : vector<4x8x8xf32> to vector<4x8xf32>
    %126 = vector.shape_cast %125 : vector<4x8xf32> to vector<4x8x1xf32>
    %127 = tpu.reciprocal %126 {approx = true} : vector<4x8x1xf32> -> vector<4x8x1xf32>
    %128 = vector.broadcast %127 : vector<4x8x1xf32> to vector<4x8x8xf32>
    %129 = arith.mulf %124, %128 : vector<4x8x8xf32>
    %130 = arith.truncf %129 : vector<4x8x8xf32> to vector<4x8x8xbf16>
    %131 = arith.truncf %110 : vector<4x8x8xf32> to vector<4x8x8xbf16>
    %cst_63 = arith.constant dense<0.000000e+00> : vector<4x8x8xf32>
    %132 = tpu.matmul %130, %131, %cst_63 {dimension_numbers = #tpu.dot_dimension_numbers<[2], [1], [1], [2], [0, 0, 0, 1, 1, 2], [0], [0]>} : vector<4x8x8xbf16>, vector<4x8x8xbf16>, vector<4x8x8xf32> -> vector<4x8x8xf32>
    %133 = arith.truncf %132 : vector<4x8x8xf32> to vector<4x8x8xbf16>
    %c0_64 = arith.constant 0 : index
    %c0_65 = arith.constant 0 : index
    %c0_66 = arith.constant 0 : index
    %134 = vector.load %arg16[%c0_64, %c0_65, %c0_66] : memref<4x8x32xbf16, #tpu.memory_space<vmem>>, vector<4x8x32xbf16>
    %cst_67 = arith.constant dense<0.000000e+00> : vector<4x8x32xf32>
    %135 = tpu.matmul %133, %134, %cst_67 {dimension_numbers = #tpu.dot_dimension_numbers<[2], [1], [1], [2], [0, 0, 0, 1, 1, 2], [0], [0]>} : vector<4x8x8xbf16>, vector<4x8x32xbf16>, vector<4x8x32xf32> -> vector<4x8x32xf32>
    %136 = vector.extract_strided_slice %135 {offsets = [0, 0, 0], sizes = [1, 8, 32], strides = [1, 1, 1]} : vector<4x8x32xf32> to vector<1x8x32xf32>
    %137 = vector.shape_cast %136 : vector<1x8x32xf32> to vector<8x32xf32>
    %138 = vector.extract_strided_slice %135 {offsets = [1, 0, 0], sizes = [1, 8, 32], strides = [1, 1, 1]} : vector<4x8x32xf32> to vector<1x8x32xf32>
    %139 = vector.shape_cast %138 : vector<1x8x32xf32> to vector<8x32xf32>
    %140 = arith.addf %137, %139 : vector<8x32xf32>
    %141 = vector.extract_strided_slice %135 {offsets = [2, 0, 0], sizes = [1, 8, 32], strides = [1, 1, 1]} : vector<4x8x32xf32> to vector<1x8x32xf32>
    %142 = vector.shape_cast %141 : vector<1x8x32xf32> to vector<8x32xf32>
    %143 = arith.addf %140, %142 : vector<8x32xf32>
    %144 = vector.extract_strided_slice %135 {offsets = [3, 0, 0], sizes = [1, 8, 32], strides = [1, 1, 1]} : vector<4x8x32xf32> to vector<1x8x32xf32>
    %145 = vector.shape_cast %144 : vector<1x8x32xf32> to vector<8x32xf32>
    %146 = arith.addf %143, %145 : vector<8x32xf32>
    %c0_68 = arith.constant 0 : index
    %c0_69 = arith.constant 0 : index
    %147 = vector.load %arg17[%c0_68, %c0_69] : memref<1x32xf32, #tpu.memory_space<vmem>>, vector<1x32xf32>
    %148 = vector.broadcast %147 : vector<1x32xf32> to vector<8x32xf32>
    %149 = arith.addf %146, %148 : vector<8x32xf32>
    %150 = arith.addf %149, %91 : vector<8x32xf32>
    %cst_70 = arith.constant dense<0.000000e+00> : vector<8xf32>
    %151 = vector.multi_reduction <add>, %150, %cst_70 [1] : vector<8x32xf32> to vector<8xf32>
    %152 = vector.shape_cast %151 : vector<8xf32> to vector<8x1xf32>
    %cst_71 = arith.constant 3.200000e+01 : f32
    %153 = vector.broadcast %cst_71 : f32 to vector<8x1xf32>
    %154 = arith.divf %152, %153 : vector<8x1xf32>
    %155 = vector.broadcast %154 : vector<8x1xf32> to vector<8x32xf32>
    %156 = arith.subf %150, %155 : vector<8x32xf32>
    %157 = arith.mulf %156, %156 : vector<8x32xf32>
    %cst_72 = arith.constant dense<0.000000e+00> : vector<8xf32>
    %158 = vector.multi_reduction <add>, %157, %cst_72 [1] : vector<8x32xf32> to vector<8xf32>
    %159 = vector.shape_cast %158 : vector<8xf32> to vector<8x1xf32>
    %cst_73 = arith.constant 3.200000e+01 : f32
    %160 = vector.broadcast %cst_73 : f32 to vector<8x1xf32>
    %161 = arith.divf %159, %160 : vector<8x1xf32>
    %162 = vector.broadcast %154 : vector<8x1xf32> to vector<8x32xf32>
    %163 = arith.subf %150, %162 : vector<8x32xf32>
    %cst_74 = arith.constant 9.99999974E-6 : f32
    %164 = vector.broadcast %cst_74 : f32 to vector<8x1xf32>
    %165 = arith.addf %161, %164 : vector<8x1xf32>
    %166 = math.rsqrt %165 : vector<8x1xf32>
    %167 = vector.broadcast %166 : vector<8x1xf32> to vector<8x32xf32>
    %168 = arith.mulf %163, %167 : vector<8x32xf32>
    %c0_75 = arith.constant 0 : index
    %c0_76 = arith.constant 0 : index
    %169 = vector.load %arg18[%c0_75, %c0_76] : memref<1x32xf32, #tpu.memory_space<vmem>>, vector<1x32xf32>
    %170 = vector.broadcast %169 : vector<1x32xf32> to vector<8x32xf32>
    %171 = arith.mulf %168, %170 : vector<8x32xf32>
    %c0_77 = arith.constant 0 : index
    %c0_78 = arith.constant 0 : index
    %172 = vector.load %arg19[%c0_77, %c0_78] : memref<1x32xf32, #tpu.memory_space<vmem>>, vector<1x32xf32>
    %173 = vector.broadcast %172 : vector<1x32xf32> to vector<8x32xf32>
    %174 = arith.addf %171, %173 : vector<8x32xf32>
    %175 = arith.truncf %174 : vector<8x32xf32> to vector<8x32xbf16>
    %c0_79 = arith.constant 0 : index
    %c0_80 = arith.constant 0 : index
    %176 = vector.load %arg20[%c0_79, %c0_80] : memref<32x128xbf16, #tpu.memory_space<vmem>>, vector<32x128xbf16>
    %cst_81 = arith.constant dense<0.000000e+00> : vector<8x128xf32>
    %177 = tpu.matmul %175, %176, %cst_81 {dimension_numbers = #tpu.dot_dimension_numbers<[1], [0], [0], [1], [0, 0, 1, 1], [], []>} : vector<8x32xbf16>, vector<32x128xbf16>, vector<8x128xf32> -> vector<8x128xf32>
    %c0_82 = arith.constant 0 : index
    %c0_83 = arith.constant 0 : index
    %178 = vector.load %arg21[%c0_82, %c0_83] : memref<1x128xf32, #tpu.memory_space<vmem>>, vector<1x128xf32>
    %179 = vector.broadcast %178 : vector<1x128xf32> to vector<8x128xf32>
    %180 = arith.addf %177, %179 : vector<8x128xf32>
    %cst_84 = arith.constant 0.000000e+00 : f32
    %181 = vector.broadcast %cst_84 : f32 to vector<8x128xf32>
    %182 = arith.maximumf %180, %181 : vector<8x128xf32>
    %183 = arith.truncf %182 : vector<8x128xf32> to vector<8x128xbf16>
    %c0_85 = arith.constant 0 : index
    %c0_86 = arith.constant 0 : index
    %184 = vector.load %arg22[%c0_85, %c0_86] : memref<128x32xbf16, #tpu.memory_space<vmem>>, vector<128x32xbf16>
    %cst_87 = arith.constant dense<0.000000e+00> : vector<8x32xf32>
    %185 = tpu.matmul %183, %184, %cst_87 {dimension_numbers = #tpu.dot_dimension_numbers<[1], [0], [0], [1], [0, 0, 1, 1], [], []>} : vector<8x128xbf16>, vector<128x32xbf16>, vector<8x32xf32> -> vector<8x32xf32>
    %c0_88 = arith.constant 0 : index
    %c0_89 = arith.constant 0 : index
    %186 = vector.load %arg23[%c0_88, %c0_89] : memref<1x32xf32, #tpu.memory_space<vmem>>, vector<1x32xf32>
    %187 = vector.broadcast %186 : vector<1x32xf32> to vector<8x32xf32>
    %188 = arith.addf %185, %187 : vector<8x32xf32>
    %189 = arith.addf %174, %188 : vector<8x32xf32>
    %cst_90 = arith.constant dense<0.000000e+00> : vector<8xf32>
    %190 = vector.multi_reduction <add>, %189, %cst_90 [1] : vector<8x32xf32> to vector<8xf32>
    %191 = vector.shape_cast %190 : vector<8xf32> to vector<8x1xf32>
    %cst_91 = arith.constant 3.200000e+01 : f32
    %192 = vector.broadcast %cst_91 : f32 to vector<8x1xf32>
    %193 = arith.divf %191, %192 : vector<8x1xf32>
    %194 = vector.broadcast %193 : vector<8x1xf32> to vector<8x32xf32>
    %195 = arith.subf %189, %194 : vector<8x32xf32>
    %196 = arith.mulf %195, %195 : vector<8x32xf32>
    %cst_92 = arith.constant dense<0.000000e+00> : vector<8xf32>
    %197 = vector.multi_reduction <add>, %196, %cst_92 [1] : vector<8x32xf32> to vector<8xf32>
    %198 = vector.shape_cast %197 : vector<8xf32> to vector<8x1xf32>
    %cst_93 = arith.constant 3.200000e+01 : f32
    %199 = vector.broadcast %cst_93 : f32 to vector<8x1xf32>
    %200 = arith.divf %198, %199 : vector<8x1xf32>
    %201 = vector.broadcast %193 : vector<8x1xf32> to vector<8x32xf32>
    %202 = arith.subf %189, %201 : vector<8x32xf32>
    %cst_94 = arith.constant 9.99999974E-6 : f32
    %203 = vector.broadcast %cst_94 : f32 to vector<8x1xf32>
    %204 = arith.addf %200, %203 : vector<8x1xf32>
    %205 = math.rsqrt %204 : vector<8x1xf32>
    %206 = vector.broadcast %205 : vector<8x1xf32> to vector<8x32xf32>
    %207 = arith.mulf %202, %206 : vector<8x32xf32>
    %c0_95 = arith.constant 0 : index
    %c0_96 = arith.constant 0 : index
    %208 = vector.load %arg24[%c0_95, %c0_96] : memref<1x32xf32, #tpu.memory_space<vmem>>, vector<1x32xf32>
    %209 = vector.broadcast %208 : vector<1x32xf32> to vector<8x32xf32>
    %210 = arith.mulf %207, %209 : vector<8x32xf32>
    %c0_97 = arith.constant 0 : index
    %c0_98 = arith.constant 0 : index
    %211 = vector.load %arg25[%c0_97, %c0_98] : memref<1x32xf32, #tpu.memory_space<vmem>>, vector<1x32xf32>
    %212 = vector.broadcast %211 : vector<1x32xf32> to vector<8x32xf32>
    %213 = arith.addf %210, %212 : vector<8x32xf32>
    %c0_99 = arith.constant 0 : index
    %c0_100 = arith.constant 0 : index
    %c0_101 = arith.constant 0 : index
    %214 = vector.load %arg26[%c0_99, %c0_100, %c0_101] : memref<1x8x32xf32, #tpu.memory_space<vmem>>, vector<1x8x32xf32>
    %215 = vector.shape_cast %214 : vector<1x8x32xf32> to vector<8x32xf32>
    %216 = vector.shape_cast %213 : vector<8x32xf32> to vector<1x8x32xf32>
    tpu.vector_store %arg26[%c0_99, %c0_100, %c0_101], %216 {strides = array<i32>} : memref<1x8x32xf32, #tpu.memory_space<vmem>>, vector<1x8x32xf32>,
    return
  }
  func.func @transform_0(%arg0: i32) -> (i32, i32, i32) {
    %c0_i32 = arith.constant 0 : i32
    %c0_i32_0 = arith.constant 0 : i32
    %c0_i32_1 = arith.constant 0 : i32
    return %arg0, %c0_i32, %c0_i32_0 : i32, i32, i32
  }
  func.func @transform_1(%arg0: i32) -> (i32, i32, i32) {
    %c0_i32 = arith.constant 0 : i32
    %c0_i32_0 = arith.constant 0 : i32
    %c0_i32_1 = arith.constant 0 : i32
    return %arg0, %c0_i32, %c0_i32_0 : i32, i32, i32
  }
  func.func @transform_2(%arg0: i32) -> (i32, i32, i32) {
    %c0_i32 = arith.constant 0 : i32
    %c0_i32_0 = arith.constant 0 : i32
    %c0_i32_1 = arith.constant 0 : i32
    return %arg0, %c0_i32, %c0_i32_0 : i32, i32, i32
  }
  func.func @transform_3(%arg0: i32) -> (i32, i32, i32) {
    %c0_i32 = arith.constant 0 : i32
    %c0_i32_0 = arith.constant 0 : i32
    %c0_i32_1 = arith.constant 0 : i32
    %c0_i32_2 = arith.constant 0 : i32
    return %c0_i32, %c0_i32_0, %c0_i32_1 : i32, i32, i32
  }
  func.func @transform_4(%arg0: i32) -> (i32, i32, i32) {
    %c0_i32 = arith.constant 0 : i32
    %c0_i32_0 = arith.constant 0 : i32
    %c0_i32_1 = arith.constant 0 : i32
    %c0_i32_2 = arith.constant 0 : i32
    return %c0_i32, %c0_i32_0, %c0_i32_1 : i32, i32, i32
  }
  func.func @transform_5(%arg0: i32) -> (i32, i32, i32) {
    %c0_i32 = arith.constant 0 : i32
    %c0_i32_0 = arith.constant 0 : i32
    %c0_i32_1 = arith.constant 0 : i32
    %c0_i32_2 = arith.constant 0 : i32
    return %c0_i32, %c0_i32_0, %c0_i32_1 : i32, i32, i32
  }
  func.func @transform_6(%arg0: i32) -> (i32, i32, i32) {
    %c0_i32 = arith.constant 0 : i32
    %c0_i32_0 = arith.constant 0 : i32
    %c0_i32_1 = arith.constant 0 : i32
    %c0_i32_2 = arith.constant 0 : i32
    return %c0_i32, %c0_i32_0, %c0_i32_1 : i32, i32, i32
  }
  func.func @transform_7(%arg0: i32) -> (i32, i32, i32) {
    %c0_i32 = arith.constant 0 : i32
    %c0_i32_0 = arith.constant 0 : i32
    %c0_i32_1 = arith.constant 0 : i32
    %c0_i32_2 = arith.constant 0 : i32
    return %c0_i32, %c0_i32_0, %c0_i32_1 : i32, i32, i32
  }
  func.func @transform_8(%arg0: i32) -> (i32, i32) {
    %c0_i32 = arith.constant 0 : i32
    %c0_i32_0 = arith.constant 0 : i32
    %c0_i32_1 = arith.constant 0 : i32
    return %c0_i32, %c0_i32_0 : i32, i32
  }
  func.func @transform_9(%arg0: i32) -> (i32, i32) {
    %c0_i32 = arith.constant 0 : i32
    %c0_i32_0 = arith.constant 0 : i32
    %c0_i32_1 = arith.constant 0 : i32
    return %c0_i32, %c0_i32_0 : i32, i32
  }
  func.func @transform_10(%arg0: i32) -> (i32, i32) {
    %c0_i32 = arith.constant 0 : i32
    %c0_i32_0 = arith.constant 0 : i32
    %c0_i32_1 = arith.constant 0 : i32
    return %c0_i32, %c0_i32_0 : i32, i32
  }
  func.func @transform_11(%arg0: i32) -> (i32, i32, i32) {
    %c0_i32 = arith.constant 0 : i32
    %c0_i32_0 = arith.constant 0 : i32
    %c0_i32_1 = arith.constant 0 : i32
    %c0_i32_2 = arith.constant 0 : i32
    return %c0_i32, %c0_i32_0, %c0_i32_1 : i32, i32, i32
  }
  func.func @transform_12(%arg0: i32) -> (i32, i32, i32) {
    %c0_i32 = arith.constant 0 : i32
    %c0_i32_0 = arith.constant 0 : i32
    %c0_i32_1 = arith.constant 0 : i32
    %c0_i32_2 = arith.constant 0 : i32
    return %c0_i32, %c0_i32_0, %c0_i32_1 : i32, i32, i32
  }
  func.func @transform_13(%arg0: i32) -> (i32, i32, i32) {
    %c0_i32 = arith.constant 0 : i32
    %c0_i32_0 = arith.constant 0 : i32
    %c0_i32_1 = arith.constant 0 : i32
    %c0_i32_2 = arith.constant 0 : i32
    return %c0_i32, %c0_i32_0, %c0_i32_1 : i32, i32, i32
  }
  func.func @transform_14(%arg0: i32) -> (i32, i32, i32) {
    %c0_i32 = arith.constant 0 : i32
    %c0_i32_0 = arith.constant 0 : i32
    %c0_i32_1 = arith.constant 0 : i32
    %c0_i32_2 = arith.constant 0 : i32
    return %c0_i32, %c0_i32_0, %c0_i32_1 : i32, i32, i32
  }
  func.func @transform_15(%arg0: i32) -> (i32, i32, i32) {
    %c0_i32 = arith.constant 0 : i32
    %c0_i32_0 = arith.constant 0 : i32
    %c0_i32_1 = arith.constant 0 : i32
    %c0_i32_2 = arith.constant 0 : i32
    return %c0_i32, %c0_i32_0, %c0_i32_1 : i32, i32, i32
  }
  func.func @transform_16(%arg0: i32) -> (i32, i32) {
    %c0_i32 = arith.constant 0 : i32
    %c0_i32_0 = arith.constant 0 : i32
    %c0_i32_1 = arith.constant 0 : i32
    return %c0_i32, %c0_i32_0 : i32, i32
  }
  func.func @transform_17(%arg0: i32) -> (i32, i32) {
    %c0_i32 = arith.constant 0 : i32
    %c0_i32_0 = arith.constant 0 : i32
    %c0_i32_1 = arith.constant 0 : i32
    return %c0_i32, %c0_i32_0 : i32, i32
  }
  func.func @transform_18(%arg0: i32) -> (i32, i32) {
    %c0_i32 = arith.constant 0 : i32
    %c0_i32_0 = arith.constant 0 : i32
    %c0_i32_1 = arith.constant 0 : i32
    return %c0_i32, %c0_i32_0 : i32, i32
  }
  func.func @transform_19(%arg0: i32) -> (i32, i32) {
    %c0_i32 = arith.constant 0 : i32
    %c0_i32_0 = arith.constant 0 : i32
    %c0_i32_1 = arith.constant 0 : i32
    return %c0_i32, %c0_i32_0 : i32, i32
  }
  func.func @transform_20(%arg0: i32) -> (i32, i32) {
    %c0_i32 = arith.constant 0 : i32
    %c0_i32_0 = arith.constant 0 : i32
    %c0_i32_1 = arith.constant 0 : i32
    return %c0_i32, %c0_i32_0 : i32, i32
  }
  func.func @transform_21(%arg0: i32) -> (i32, i32) {
    %c0_i32 = arith.constant 0 : i32
    %c0_i32_0 = arith.constant 0 : i32
    %c0_i32_1 = arith.constant 0 : i32
    return %c0_i32, %c0_i32_0 : i32, i32
  }
  func.func @transform_22(%arg0: i32) -> (i32, i32) {
    %c0_i32 = arith.constant 0 : i32
    %c0_i32_0 = arith.constant 0 : i32
    %c0_i32_1 = arith.constant 0 : i32
    return %c0_i32, %c0_i32_0 : i32, i32
  }
  func.func @transform_23(%arg0: i32) -> (i32, i32) {
    %c0_i32 = arith.constant 0 : i32
    %c0_i32_0 = arith.constant 0 : i32
    %c0_i32_1 = arith.constant 0 : i32
    return %c0_i32, %c0_i32_0 : i32, i32
  }
  func.func @transform_24(%arg0: i32) -> (i32, i32) {
    %c0_i32 = arith.constant 0 : i32
    %c0_i32_0 = arith.constant 0 : i32
    %c0_i32_1 = arith.constant 0 : i32
    return %c0_i32, %c0_i32_0 : i32, i32
  }
  func.func @transform_25(%arg0: i32) -> (i32, i32, i32) {
    %c0_i32 = arith.constant 0 : i32
    %c0_i32_0 = arith.constant 0 : i32
    %c0_i32_1 = arith.constant 0 : i32
    return %arg0, %c0_i32, %c0_i32_0 : i32, i32, i32
  }
}

</mosaic_0001>

<bundles_post_ra>
// kernel: tpu_custom_call.1
= control target key start
LH: loop header
LB: loop body
LE: loop exit
PB: predicated region body
PF: predicated region fallthrough
CT: control target
= control target key end

     0   :  { %s4953_s0 = inlined_call_operand.vmem [shape: f32[2,8,32], index: 0, kind: input, shape index: {}]   ;;  %s4954_s1 = inlined_call_operand.vmem [shape: f32[2,8,32], index: 1, kind: input, shape index: {}]   ;;  %s4955_s2 = inlined_call_operand.vmem [shape: f32[2,1,8], index: 2, kind: input, shape index: {}]   ;;  %s4956_s3 = inlined_call_operand.vmem [shape: bf16[4,32,8], index: 3, kind: input, shape index: {}]   ;;  %s4957_s4 = inlined_call_operand.vmem [shape: f32[4,1,8], index: 4, kind: input, shape index: {}]   ;;  %s4958_s5 = inlined_call_operand.vmem [shape: bf16[4,32,16], index: 5, kind: input, shape index: {}]   ;;  %s4959_s6 = inlined_call_operand.vmem [shape: f32[4,1,16], index: 6, kind: input, shape index: {}]   ;;  %s4960_s7 = inlined_call_operand.vmem [shape: bf16[4,8,32], index: 7, kind: input, shape index: {}]   ;;  %s4961_s8 = inlined_call_operand.vmem [shape: f32[1,32], index: 8, kind: input, shape index: {}]   ;;  %s4962_s9 = inlined_call_operand.vmem [shape: f32[1,32], index: 9, kind: input, shape index: {}]   ;;  %s4963_s10 = inlined_call_operand.vmem [shape: f32[1,32], index: 10, kind: input, shape index: {}]   ;;  %s4964_s11 = inlined_call_operand.vmem [shape: bf16[4,32,8], index: 11, kind: input, shape index: {}]   ;;  %s4965_s12 = inlined_call_operand.vmem [shape: f32[4,1,8], index: 12, kind: input, shape index: {}]   ;;  %s4966_s13 = inlined_call_operand.vmem [shape: bf16[4,32,16], index: 13, kind: input, shape index: {}]   ;;  %s4967_s14 = inlined_call_operand.vmem [shape: f32[4,1,16], index: 14, kind: input, shape index: {}]   ;;  %s4968_s15 = inlined_call_operand.vmem [shape: bf16[4,8,32], index: 15, kind: input, shape index: {}]   ;;  %s4969_s16 = inlined_call_operand.vmem [shape: f32[1,32], index: 16, kind: input, shape index: {}]   ;;  %s4970_s17 = inlined_call_operand.vmem [shape: f32[1,32], index: 17, kind: input, shape index: {}]   ;;  %s4971_s18 = inlined_call_operand.vmem [shape: f32[1,32], index: 18, kind: input, shape index: {}]   ;;  %s4972_s19 = inlined_call_operand.vmem [shape: bf16[32,128], index: 19, kind: input, shape index: {}]   ;;  %s4973_s20 = inlined_call_operand.vmem [shape: f32[1,128], index: 20, kind: input, shape index: {}]   ;;  %s4974_s21 = inlined_call_operand.vmem [shape: bf16[128,32], index: 21, kind: input, shape index: {}]   ;;  %s4975_s22 = inlined_call_operand.vmem [shape: f32[1,32], index: 22, kind: input, shape index: {}]   ;;  %s4976_s23 = inlined_call_operand.vmem [shape: f32[1,32], index: 23, kind: input, shape index: {}]   ;;  %s4977_s24 = inlined_call_operand.vmem [shape: f32[1,32], index: 24, kind: input, shape index: {}]   ;;  %s4978_s25 = inlined_call_operand.hbm [shape: f32[2,8,32], index: 25, kind: output, shape index: {}]  }
   0x1   :  { %4997 = sst [smem:[#allocation11_spill]] %s4953_s0 }
   0x2   :  { %4998 = sst [smem:[#allocation12_spill]] %s4954_s1 }
   0x3   :  { %4999 = sst [smem:[#allocation13_spill]] %s4955_s2 }
   0x4   :  { %5000 = sst [smem:[#allocation14_spill]] %s4956_s3 }
   0x5   :  { %5001 = sst [smem:[#allocation15_spill]] %s4957_s4 }
   0x6   :  { %5002 = sst [smem:[#allocation16_spill]] %s4958_s5 }
   0x7   :  { %5003 = sst [smem:[#allocation17_spill]] %s4959_s6 }
   0x8   :  { %5004 = sst [smem:[#allocation18_spill]] %s4960_s7 }
   0x9   :  { %5005 = sst [smem:[#allocation19_spill]] %s4961_s8 }
   0xa   :  { %5006 = sst [smem:[#allocation20_spill]] %s4962_s9 }
   0xb   :  { %5007 = sst [smem:[#allocation21_spill]] %s4963_s10 }
   0xc   :  { %5008 = sst [smem:[#allocation22_spill]] %s4964_s11 }
   0xd   :  { %5009 = sst [smem:[#allocation23_spill]] %s4965_s12 }
   0xe   :  { %5010 = sst [smem:[#allocation24_spill]] %s4978_s25 }
   0xf   :  { %30 = vsyncpa [#allocation3], 0 }
  0x10   :  { %32 = vsyncpa [#allocation3 + $0x1], 0  ;;  %s4331_s29 = smov 0   ;;  %s4333_s2 = smov 0  }
  0x11   :  { %s4335_s6 = smov 0   ;;  %s4337_s30 = smov 0  }
  0x12 LB: > { %5011 = sst [smem:[#allocation5_spill]] %s4183_s29  ;;  %s4352_s7 = sadd.s32 4294967295, %s4195_s30   ;;  %s4195_s30 = sphi %s4337_s30, %s5040_s30   ;;  %s4191_s6 = sphi %s4335_s6, %s5042_s6   ;;  %s4187_s2 = sphi %s4333_s2, %s5044_s2   ;;  %s4183_s29 = sphi %s4331_s29, %s5043_s29  }
  0x13   : > { %5012 = sst [smem:[#allocation6_spill]] %s4191_s6  ;;  %s3484_s3 = sadd.s32 4294967294, %s4195_s30  }
  0x14   : > { %5013 = sst [smem:[#allocation7_spill]] %s4195_s30  ;;  %s4356_s26 = sadd.s32 1, %s4195_s30  }
  0x15   : > { %5014 = sst [smem:[#allocation8_spill]] %s4356_s26  ;;  %s585_s1 = sadd.s32 1, %s4191_s6 }
  0x16   : > { %s582_s8 = ssub.s32 %s4195_s30, %s4356_s26  ;;  %p595_p0 = scmp.ne.s32.totalorder %s4191_s6, %s4187_s2 }
  0x17   : > { %p583_p1 = scmp.eq.s32.totalorder %s582_s8, 0  ;;  %p596_p2 = scmp.eq.s32.totalorder %s4352_s7, 1 }
  0x18   : > { %p601_p3 = scmp.ne.s32.totalorder %s4187_s2, %s4183_s29  ;;  %p602_p4 = scmp.eq.s32.totalorder %s3484_s3, 1 }
  0x19   : > { %s4367_s27 = scalar_select %p583_p1, %s4191_s6, %s585_s1  }
  0x1a   : > { %p4369_p5 = por %p596_p2, %p595_p0  ;;  %p4373_p6 = por %p602_p4, %p601_p3 }
  0x1b   : > { %5015 = sst [smem:[#allocation9_spill]] %s4367_s27  ;;  %p3487_p7 = scmp.ge.s32.totalorder %s4195_s30, 1 }
  0x1c   : > { %s5017_s28 = scalar_select %p4373_p6, 1, 0 }
  0x1d   : > { %p706_p8 = scmp.lt.s32.totalorder %s4195_s30, 3 }
  0x1e   : > { %5018 = sst [smem:[#allocation10_spill]] %s5017_s28 }
  0x1f   : > { %p707_p9 = pnand %p3487_p7, %p706_p8 }
  0x20   : > { %s5019_s0 = sld [smem:[#allocation14_spill]] (!%p707_p9)  ;;  %p780_p10 = scmp.lt.s32.totalorder (!%p707_p9), %s4352_s7, 1 }
  0x21   : > { %710 = sbr.rel (%p707_p9) target bundleno = 3711 (0xe7f), region = 120  ;;  %s5020_s5 = sld [smem:[#allocation11_spill]] (!%p707_p9) }
  0x22   : > { %s5021_s30 = sld [smem:[#allocation16_spill]] (!%p707_p9)  ;;  %s4991_s28 = smov (!%p707_p9), 120  }
  0x23   : > { %s5024_s9 = sld [smem:[#allocation15_spill]] (!%p707_p9) }
  0x24   : > { %s5025_s6 = sld [smem:[#allocation18_spill]] (!%p707_p9) }
  0x25   : > { %s5028_s11 = sld [smem:[#allocation22_spill]] (!%p707_p9) }
  0x26   : > { %v4055_v0 = vld [vmem:[%s5019_s0 + $0x8] sm:$0xff]   ;;  %v4197_v1 = vmov 0.0   ;;  %v4056_v2 = vld [vmem:[%s5019_s0 + $0x38] sm:$0xff]   ;;  %v4057_v3 = vld [vmem:[%s5019_s0] sm:$0xff]   ;;  %vm4198_vm0 = vmmov 0   ;;  %s4401_s3 = scalar_select %p780_p10, %s4352_s7, 1 }
  0x27   : > { %3713 = vmatprep.subr.bf16.mxu0 %v4197_v1  ;;  %3737 = vmatprep.subr.bf16.mxu1 %v4197_v1  ;;  %v4058_v4 = vld [vmem:[%s5019_s0 + $0x30] sm:$0xff]   ;;  %v4059_v5 = vld [vmem:[%s5019_s0 + $0x18] sm:$0xff]   ;;  %vm857_vm1 = vcmask 261120   ;;  %v4063_v11 = vld [vmem:[%s5019_s0 + $0x28] sm:$0xff]   ;;  %vm1317_vm2 = vcmask 64512   ;;  %vm1561_vm5 = vcmask 1043456  }
  0x28   : > { %3714 = vmatpush3.bf16.msra.mxu0 %v4055_v0  ;;  %3717 = vmatprep.mubr.msk.bf16.mxu0 %vm4198_vm0, %v4197_v1  ;;  %s4993_s27 = sshll.u32 %s4401_s3, 3  ;;  %s5022_s25 = smov %s5021_s30  ;;  %v4060_v6 = vld [vmem:[%s5021_s30 + $0x18] sm:$0xff]   ;;  %v4061_v9 = vld [vmem:[%s5019_s0 + $0x10] sm:$0xff]   ;;  %v4065_v13 = vld [vmem:[%s5019_s0 + $0x20] sm:$0xff]  }
  0x29   : > { %3738 = vmatpush3.bf16.msra.mxu1 %v4056_v2  ;;  %3715 = vmatprep.subr.bf16.mxu0 %v4197_v1  ;;  %s783_s26 = scalar_lea.vmem %s5020_s5, %s4993_s27  ;;  %v4062_v10 = vld [vmem:[%s5022_s25 + $0x10] sm:$0xff]   ;;  %v4064_v12 = vld [vmem:[%s5022_s25 + $0x38] sm:$0xff]   ;;  %v4067_v15 = vld [vmem:[%s5022_s25 + $0x8] sm:$0xff]   ;;  %s5029_s8 = sld [smem:[#allocation20_spill]] }
  0x2a   : > { %3739 = vmatprep.subr.bf16.mxu1 %v4197_v1  ;;  %3741 = vmatprep.mubr.msk.bf16.mxu1 %vm4198_vm0, %v4197_v1  ;;  %v4416_v7 = vld [vmem:[%s783_s26] sm:$0xff]  ;;  %v4066_v14 = vld [vmem:[%s5022_s25 + $0x30] sm:$0xff]   ;;  %v4069_v17 = vld [vmem:[%s5022_s25 + $0x28] sm:$0xff]   ;;  %s5023_s26 = sld [smem:[#allocation17_spill]]  ;;  %s5026_s1 = smov %s5025_s6 }
  0x2b   : > { %v800_v8 = vpack.c.bf16 %v4416_v7, %v4416_v7  ;;  %v4068_v16 = vld [vmem:[%s5022_s25] sm:$0xff]   ;;  %s5030_s10 = sld [smem:[#allocation21_spill]]  ;;  %s4200_s30 = smov [#allocation2]  }
  0x2c   : > { %3716 = vmatpush3.bf16.msra.mxu0 %v4057_v3  ;;  %v4070_v18 = vld [vmem:[%s5022_s25 + $0x20] sm:$0xff]   ;;  %s5033_s12 = sld [smem:[#allocation23_spill]] }
  0x2d   : > { %3740 = vmatpush3.bf16.msra.mxu1 %v4058_v4  ;;  %3721 = vmatprep.subr.bf16.mxu0 %v4197_v1  ;;  %v3492_v34 = vld [vmem:[%s5024_s9 + $0x1] ss:$0 sm:$0xff]  ;;  %v3494_v49 = vld [vmem:[%s5024_s9 + $0x3] ss:$0 sm:$0xff]  ;;  %v3491_v62 = vld [vmem:[%s5024_s9] ss:$0 sm:$0xff] }
  0x2e   : > { %3753 = vmatprep.subr.bf16.mxu1 %v4197_v1 }
  0x2f   : > { %3718 = vmatmul.mubr.msk.bf16.vlgmr.msra.gmra.mxu0 %vm857_vm1, %v800_v8 }
  0x30   : > { %3742 = vmatmul.mubr.msk.bf16.vlgmr.msra.gmra.mxu1 %vm857_vm1, %v800_v8  ;;  %3722 = vmatpush3.bf16.msra.mxu0 %v4059_v5  ;;  %v3508_v27 = vld [vmem:[%s5023_s26 + $0x1] ss:$0 sm:$0xff]  ;;  %v3510_v40 = vld [vmem:[%s5023_s26 + $0x3] ss:$0 sm:$0xff]  ;;  %v3507_v54 = vld [vmem:[%s5023_s26] ss:$0 sm:$0xff] }
  0x31   : > { %3754 = vmatpush3.bf16.msra.mxu1 %v4060_v6  ;;  %3723 = vmatprep.subr.bf16.mxu0 %v4197_v1  ;;  %v3509_v3 = vld [vmem:[%s5023_s26 + $0x2] ss:$0 sm:$0xff] }
  0x32   : > { %3755 = vmatprep.subr.bf16.mxu1 %v4197_v1  ;;  %3725 = vmatprep.mubr.msk.bf16.mxu0 %vm4198_vm0, %v4197_v1 }
  0x33   : > { %3757 = vmatprep.mubr.msk.bf16.mxu1 %vm4198_vm0, %v4197_v1 }
  0x34   : > { %3724 = vmatpush3.bf16.msra.mxu0 %v4061_v9 }
  0x35   : > { %3756 = vmatpush3.bf16.msra.mxu1 %v4062_v10  ;;  %3729 = vmatprep.subr.bf16.mxu0 %v4197_v1 }
  0x36   : > { %3769 = vmatprep.subr.bf16.mxu1 %v4197_v1 }
  0x37   : > { %3726 = vmatmul.mubr.msk.bf16.vlgmr.msra.gmra.mxu0 %vm857_vm1, %v800_v8 }
  0x38   : > { %3758 = vmatmul.mubr.msk.bf16.vlgmr.msra.gmra.mxu1 %vm857_vm1, %v800_v8  ;;  %3730 = vmatpush3.bf16.msra.mxu0 %v4063_v11  ;;  %v3493_v11 = vld [vmem:[%s5024_s9 + $0x2] ss:$0 sm:$0xff] }
  0x39   : > { %3770 = vmatpush3.bf16.msra.mxu1 %v4064_v12  ;;  %3731 = vmatprep.subr.bf16.mxu0 %v4197_v1 }
  0x3a   : > { %3771 = vmatprep.subr.bf16.mxu1 %v4197_v1  ;;  %3733 = vmatprep.mubr.msk.bf16.mxu0 %vm4198_vm0, %v4197_v1 }
  0x3b   : > { %3773 = vmatprep.mubr.msk.bf16.mxu1 %vm4198_vm0, %v4197_v1 }
  0x3c   : > { %3732 = vmatpush3.bf16.msra.mxu0 %v4065_v13 }
  0x3d   : > { %3772 = vmatpush3.bf16.msra.mxu1 %v4066_v14  ;;  %3745 = vmatprep.subr.bf16.mxu0 %v4197_v1 }
  0x3e   : > { %3783 = vmatprep.subr.bf16.mxu1 %v4197_v1 }
  0x3f   : > { %3734 = vmatmul.mubr.msk.bf16.vlgmr.msra.gmra.mxu0 %vm857_vm1, %v800_v8 }
  0x40   : > { %3774 = vmatmul.mubr.msk.bf16.vlgmr.msra.gmra.mxu1 %vm857_vm1, %v800_v8  ;;  %3746 = vmatpush3.bf16.msra.mxu0 %v4067_v15 }
  0x41   : > { %3749 = vmatprep.mubr.msk.bf16.mxu0 %vm4198_vm0, %v4197_v1  ;;  %3747 = vmatprep.subr.bf16.mxu0 %v4197_v1 }
  0x42   : > { %3785 = vmatprep.mubr.msk.bf16.mxu1 %vm4198_vm0, %v4197_v1 }
  0x44   : > { %3748 = vmatpush3.bf16.msra.mxu0 %v4068_v16 }
  0x45   : > { %3761 = vmatprep.subr.bf16.mxu0 %v4197_v1 }
  0x47   : > { %3750 = vmatmul.mubr.msk.bf16.vlgmr.msra.gmra.mxu0 %vm857_vm1, %v800_v8 }
  0x48   : > { %3762 = vmatpush3.bf16.msra.mxu0 %v4069_v17  ;;  %3765 = vmatprep.mubr.msk.bf16.mxu0 %vm4198_vm0, %v4197_v1 }
  0x49   : > { %3763 = vmatprep.subr.bf16.mxu0 %v4197_v1 }
  0x4c   : > { %3764 = vmatpush3.bf16.msra.mxu0 %v4070_v18  ;;  %v794_v18 = vlaneseq }
  0x4d   : > { %3777 = vmatprep.subr.bf16.mxu0 %v4197_v1 }
  0x4f   : > { %3766 = vmatmul.mubr.msk.bf16.vlgmr.msra.gmra.mxu0 %vm857_vm1, %v800_v8 }
  0x50   : > { %3779 = vmatprep.mubr.msk.bf16.mxu0 %vm4198_vm0, %v4197_v1 }
  0xef   : > { %v895_v19 = vpop.f32.mrf.mxu0 }
  0xf0   : > { %v1051_v20 = vpop.f32.mrf.mxu1  ;;  %v896_v4 = vadd.f32 %v3491_v62, %v895_v19 }
  0xf1   : > { %v3719_v21 = vpop.f32.mrf.mxu0  ;;  %v1052_v56 = vadd.f32 %v3494_v49, %v1051_v20 }
  0xf2   : > { %v3743_v22 = vpop.f32.mrf.mxu1  ;;  %v1309_v9 = vpack.c.bf16 %v896_v4, %v896_v4  ;;  %v795_v21 = vshrl.u32 %v794_v18, 7 }
  0xf3   : > { %v898_v23 = vpop.f32.mrf.mxu0  ;;  %v1312_v60 = vpack.c.bf16 %v1052_v56, %v1052_v56  ;;  %v797_v22 = vand.u32 127, %v794_v18 }
  0xf4   : > { %v1054_v24 = vpop.f32.mrf.mxu1 }
  0xf5   : > { %v3720_v25 = vpop.f32.mrf.mxu0  ;;  %vm798_vm3 = vcmp.gt.s32.totalorder %v797_v22, %v795_v21 }
  0xf6   : > { %v3744_v26 = vpop.f32.mrf.mxu1 }
  0xf7   : > { %v947_v28 = vpop.f32.mrf.mxu0 }
  0xf8   : > { %v1199_v29 = vpop.f32.mrf.mxu1  ;;  %v948_v41 = vadd.f32 %v3492_v34, %v947_v28 }
  0xf9   : > { %v1200_v30 = vadd.f32 %v3508_v27, %v1199_v29  ;;  %v3727_v31 = vpop.f32.mrf.mxu0  ;;  %v799_v27 = vsel %vm798_vm3, 1.0, %v4197_v1 }
  0xfa   : > { %v3759_v32 = vpop.f32.mrf.mxu1  ;;  %v1310_v47 = vpack.c.bf16 %v948_v41, %v948_v41  ;;  %vm1502_vm4 = vcmp.ne.f32.partialorder %v799_v27, 0.0  ;;  %v1756_v27 = vld [vmem:[%s5025_s6] sm:$0xf]  ;;  %s5027_s6 = sld [smem:[#allocation19_spill]] }
  0xfb   : > { %v4490_v33 = vpack.c.bf16 %v1200_v30, %v1200_v30  ;;  %v950_v35 = vpop.f32.mrf.mxu0 }
  0xfc   : > { %v1202_v36 = vpop.f32.mrf.mxu1 }
  0xfd   : > { %v1368_v37 = vsel %vm1317_vm2, %v4490_v33, 0  ;;  %v3728_v38 = vpop.f32.mrf.mxu0 }
  0xfe   : > { %v3760_v39 = vpop.f32.mrf.mxu1  ;;  %3784 = vmatpush3.bf16.xpose.msra.mxu1 %v1368_v37 }
  0xff   : > { %3795 = vmatprep.subr.bf16.mxu1 %v4197_v1  ;;  %v999_v42 = vpop.f32.mrf.mxu0 }
 0x100   : > { %v1303_v43 = vpop.f32.mrf.mxu1  ;;  %v1000_v15 = vadd.f32 %v3493_v11, %v999_v42 }
 0x101   : > { %v1304_v44 = vadd.f32 %v3510_v40, %v1303_v43  ;;  %v3735_v45 = vpop.f32.mrf.mxu0 }
 0x102   : > { %v3775_v46 = vpop.f32.mrf.mxu1  ;;  %v1311_v16 = vpack.c.bf16 %v1000_v15, %v1000_v15 }
 0x103   : > { %v4501_v48 = vpack.c.bf16 %v1304_v44, %v1304_v44  ;;  %v1002_v50 = vpop.f32.mrf.mxu0 }
 0x104   : > { %v1306_v51 = vpop.f32.mrf.mxu1 }
 0x105   : > { %v1460_v52 = vsel %vm1317_vm2, %v4501_v48, 0  ;;  %3786 = vmatmul.mubr.msk.bf16.vlgmr.msra.gmra.mxu1 %vm1317_vm2, %v1310_v47  ;;  %v3736_v53 = vpop.f32.mrf.mxu0 }
 0x106   : > { %3796 = vmatpush3.bf16.xpose.msra.mxu1 %v1460_v52  ;;  %3797 = vmatprep.mubr.msk.bf16.mxu1 %vm4198_vm0, %v4197_v1  ;;  %v3776_v55 = vpop.f32.mrf.mxu1 }
 0x107   : > { %3807 = vmatprep.subr.bf16.mxu1 %v4197_v1  ;;  %v1147_v57 = vpop.f32.mrf.mxu0 }
 0x108   : > { %v1148_v58 = vadd.f32 %v3507_v54, %v1147_v57 }
 0x109   : > { %v3751_v59 = vpop.f32.mrf.mxu0 }
 0x10a   : > { %v4515_v61 = vpack.c.bf16 %v1148_v58, %v1148_v58 }
 0x10b   : > { %v1150_v63 = vpop.f32.mrf.mxu0 }
 0x10c   : > { %v1322_v0 = vsel %vm1317_vm2, %v4515_v61, 0 }
 0x10d   : > { %3798 = vmatmul.mubr.msk.bf16.vlgmr.msra.gmra.mxu1 %vm1317_vm2, %v1312_v60  ;;  %v3752_v2 = vpop.f32.mrf.mxu0  ;;  %3778 = vmatpush3.bf16.xpose.msra.mxu0 %v1322_v0 }
 0x10e   : > { %3809 = vmatprep.mubr.msk.bf16.mxu1 %vm4198_vm0, %v4197_v1  ;;  %3789 = vmatprep.subr.bf16.mxu0 %v4197_v1 }
 0x10f   : > { %v1251_v5 = vpop.f32.mrf.mxu0 }
 0x110   : > { %v1252_v6 = vadd.f32 %v3509_v3, %v1251_v5 }
 0x111   : > { %v3767_v8 = vpop.f32.mrf.mxu0 }
 0x112   : > { %v4529_v10 = vpack.c.bf16 %v1252_v6, %v1252_v6 }
 0x113   : > { %v1254_v12 = vpop.f32.mrf.mxu0 }
 0x114   : > { %v1414_v13 = vsel %vm1317_vm2, %v4529_v10, 0  ;;  %3780 = vmatmul.mubr.msk.bf16.vlgmr.msra.gmra.mxu0 %vm1317_vm2, %v1309_v9 }
 0x115   : > { %v3768_v14 = vpop.f32.mrf.mxu0  ;;  %3790 = vmatpush3.bf16.xpose.msra.mxu0 %v1414_v13  ;;  %3791 = vmatprep.mubr.msk.bf16.mxu0 %vm4198_vm0, %v4197_v1 }
 0x116   : > { %3801 = vmatprep.subr.bf16.mxu0 %v4197_v1 }
 0x11c   : > { %3792 = vmatmul.mubr.msk.bf16.vlgmr.msra.gmra.mxu0 %vm1317_vm2, %v1311_v16 }
 0x11d   : > { %3803 = vmatprep.mubr.msk.bf16.mxu0 %vm4198_vm0, %v4197_v1 }
 0x1c5   : > { %v1404_v17 = vpop.f32.mrf.mxu1 }
 0x1c6   : > { %v1504_v34 = vsel %vm1502_vm4, -1e+09, %v1404_v17 }
 0x1c7   : > { %v3787_v19 = vpop.f32.mrf.mxu1  ;;  %v1510_v37 = vsel %vm1317_vm2, %v1504_v34, -inf }
 0x1c9   : > { %v1407_v20 = vpop.f32.mrf.mxu1 }
 0x1cb   : > { %v3788_v23 = vpop.f32.mrf.mxu1 }
 0x1cd   : > { %v1496_v24 = vpop.f32.mrf.mxu1 }
 0x1ce   : > { %v1506_v42 = vsel %vm1502_vm4, -1e+09, %v1496_v24 }
 0x1cf   : > { %v3799_v25 = vpop.f32.mrf.mxu1  ;;  %v1516_v45 = vsel %vm1317_vm2, %v1506_v42, -inf }
 0x1d1   : > { %v1499_v26 = vpop.f32.mrf.mxu1 }
 0x1d3   : > { %v3800_v28 = vpop.f32.mrf.mxu1 }
 0x1d4   : > { %v1358_v29 = vpop.f32.mrf.mxu0  ;;  %v1764_v28 = vsel %vm1561_vm5, %v1756_v27, 0 }
 0x1d5   : > { %v1503_v30 = vsel %vm1502_vm4, -1e+09, %v1358_v29  ;;  %v1757_v29 = vld [vmem:[%s5026_s1 + $0x4] sm:$0xf] }
 0x1d6   : > { %v3781_v31 = vpop.f32.mrf.mxu0  ;;  %v1507_v32 = vsel %vm1317_vm2, %v1503_v30, -inf }
 0x1d7   : > { %1508 = vmax.xlane.f32.xlu0 %v1507_v32  ;;  %v1758_v31 = vld [vmem:[%s5026_s1 + $0x8] sm:$0xf] }
 0x1d8   : > { %v1361_v35 = vpop.f32.mrf.mxu0 }
 0x1d9   : > { %v1856_v35 = vsel %vm1561_vm5, %v1758_v31, 0 }
 0x1da   : > { %v3782_v36 = vpop.f32.mrf.mxu0 }
 0x1db   : > { %1511 = vmax.xlane.f32.xlu0 %v1510_v37  ;;  %v1759_v37 = vld [vmem:[%s5026_s1 + $0xc] sm:$0xf]  ;;  %s3602_s1 = sshll.u32 %s4352_s7, 7 }
 0x1dc   : > { %v1450_v38 = vpop.f32.mrf.mxu0 }
 0x1dd   : > { %v1505_v39 = vsel %vm1502_vm4, -1e+09, %v1450_v38 }
 0x1de   : > { %v3793_v40 = vpop.f32.mrf.mxu0  ;;  %v1513_v41 = vsel %vm1317_vm2, %v1505_v39, -inf }
 0x1df   : > { %1514 = vmax.xlane.f32.xlu1 %v1513_v41  ;;  %v1902_v41 = vsel %vm1561_vm5, %v1759_v37, 0  ;;  %v4077_v37 = vld [vmem:[%s5028_s11 + $0x20] sm:$0xff]  }
 0x1e0   : > { %v1453_v43 = vpop.f32.mrf.mxu0 }
 0x1e2   : > { %v3794_v44 = vpop.f32.mrf.mxu0 }
 0x1e3   : > { %1517 = vmax.xlane.f32.xlu1 %v1516_v45 }
 0x260   : > { %v1509_v46 = vpop.xlane.xlu0 %1508 }
 0x261   : > { %v1519_v47 = vsub.f32 %v1503_v30, %v1509_v46  ;;  %v1810_v30 = vsel %vm1561_vm5, %v1757_v29, 0 }
 0x263   : > { %v1523_v49 = vmul.f32 1.442695, %v1519_v47 }
 0x264   : > { %v1512_v50 = vpop.xlane.xlu0 %1511 }
 0x265   : > { %4097 = vpow2.f32 %v1523_v49  ;;  %v1520_v51 = vsub.f32 %v1504_v34, %v1512_v50 }
 0x267   : > { %v1525_v52 = vmul.f32 1.442695, %v1520_v51 }
 0x268   : > { %v1515_v53 = vpop.xlane.xlu1 %1514 }
 0x269   : > { %4099 = vpow2.f32 %v1525_v52  ;;  %v1521_v54 = vsub.f32 %v1505_v39, %v1515_v53 }
 0x26b   : > { %v1527_v55 = vmul.f32 1.442695, %v1521_v54 }
 0x26c   : > { %v1518_v56 = vpop.xlane.xlu1 %1517 }
 0x26d   : > { %4101 = vpow2.f32 %v1527_v55  ;;  %v1522_v57 = vsub.f32 %v1506_v42, %v1518_v56 }
 0x26f   : > { %v1529_v58 = vmul.f32 1.442695, %v1522_v57 }
 0x271   : > { %4103 = vpow2.f32 %v1529_v58 }
 0x272   : > { %v4098_v59 = vpop.eup %4097 }
 0x273   : > { %v1531_v60 = vsel %vm1317_vm2, %v4098_v59, 0.0 }
 0x274   : > { %1532 = vadd.xlane.f32.xlu0 %v1531_v60 }
 0x276   : > { %v4100_v62 = vpop.eup %4099 }
 0x277   : > { %v1534_v63 = vsel %vm1317_vm2, %v4100_v62, 0.0 }
 0x278   : > { %1535 = vadd.xlane.f32.xlu1 %v1534_v63 }
 0x27a   : > { %v4102_v0 = vpop.eup %4101 }
 0x27b   : > { %v1537_v2 = vsel %vm1317_vm2, %v4102_v0, 0.0 }
 0x27c   : > { %1538 = vadd.xlane.f32.xlu0 %v1537_v2 }
 0x27e   : > { %v4104_v3 = vpop.eup %4103 }
 0x27f   : > { %v1540_v4 = vsel %vm1317_vm2, %v4104_v3, 0.0 }
 0x280   : > { %1541 = vadd.xlane.f32.xlu1 %v1540_v4 }
 0x291   : > { %1606 = vrot.lane.b32.xlu1 %v4490_v33, %s4991_s28 }
 0x292   : > { %1556 = vrot.lane.b32.xlu0 %v4515_v61, %s4991_s28 }
 0x295   : > { %1655 = vrot.lane.b32.xlu1 %v4529_v10, %s4991_s28 }
 0x299   : > { %1704 = vrot.lane.b32.xlu1 %v4501_v48, %s4991_s28  ;;  %s5034_s28 = sld [smem:[#allocation13_spill]] }
 0x2fd   : > { %v1533_v5 = vpop.xlane.xlu0 %1532 }
 0x2fe   : > { %4105 = vrcp.f32 %v1533_v5 }
 0x301   : > { %v1536_v6 = vpop.xlane.xlu1 %1535 }
 0x302   : > { %4107 = vrcp.f32 %v1536_v6 }
 0x305   : > { %v1539_v8 = vpop.xlane.xlu0 %1538 }
 0x306   : > { %4109 = vrcp.f32 %v1539_v8 }
 0x309   : > { %v1557_v9 = vpop.permute.xlu0 %1556  ;;  %v1542_v11 = vpop.xlane.xlu1 %1541 }
 0x30a   : > { %v1563_v33 = vsel %vm1561_vm5, %v1557_v9, 0  ;;  %4111 = vrcp.f32 %v1542_v11  ;;  %v3535_v11 = vld [vmem:[%s5027_s6] ss:$0 sm:$0xff]  ;;  %s5031_s6 = sshll.u32 %s4401_s3, 3 }
 0x30b   : > { %v4106_v12 = vpop.eup %4105  ;;  %3802 = vmatpush3.bf16.msra.mxu0 %v1563_v33 }
 0x30c   : > { %v1547_v61 = vmul.f32 %v4106_v12, %v4098_v59  ;;  %3813 = vmatprep.subr.bf16.mxu0 %v4197_v1 }
 0x30d   : > { %v1607_v10 = vpop.permute.xlu1 %1606 }
 0x30e   : > { %v1612_v48 = vsel %vm1561_vm5, %v1607_v10, 0  ;;  %v1551_v13 = vpack.c.bf16 %v1547_v61, %v1547_v61 }
 0x30f   : > { %v4108_v14 = vpop.eup %4107  ;;  %3808 = vmatpush3.bf16.msra.mxu1 %v1612_v48 }
 0x310   : > { %3804 = vmatmul.mubr.msk.bf16.vlgmr.msra.gmra.mxu0 %vm1317_vm2, %v1551_v13  ;;  %v1548_v15 = vmul.f32 %v4108_v14, %v4100_v62  ;;  %3819 = vmatprep.subr.bf16.mxu1 %v4197_v1 }
 0x311   : > { %v1656_v16 = vpop.permute.xlu1 %1655  ;;  %3815 = vmatprep.mubr.msk.bf16.mxu0 %vm4198_vm0, %v4197_v1 }
 0x312   : > { %v1661_v17 = vsel %vm1561_vm5, %v1656_v16, 0  ;;  %v1552_v18 = vpack.c.bf16 %v1548_v15, %v1548_v15 }
 0x313   : > { %v4110_v19 = vpop.eup %4109  ;;  %3814 = vmatpush3.bf16.msra.mxu0 %v1661_v17 }
 0x314   : > { %3810 = vmatmul.mubr.msk.bf16.vlgmr.msra.gmra.mxu1 %vm1317_vm2, %v1552_v18  ;;  %v1549_v20 = vmul.f32 %v4110_v19, %v4102_v0  ;;  %3825 = vmatprep.subr.bf16.mxu0 %v4197_v1 }
 0x315   : > { %v1705_v21 = vpop.permute.xlu1 %1704  ;;  %3821 = vmatprep.mubr.msk.bf16.mxu1 %vm4198_vm0, %v4197_v1 }
 0x316   : > { %v1710_v22 = vsel %vm1561_vm5, %v1705_v21, 0  ;;  %v1553_v23 = vpack.c.bf16 %v1549_v20, %v1549_v20  ;;  %v4071_v21 = vld [vmem:[%s5028_s11 + $0x8] sm:$0xff]  }
 0x317   : > { %v4112_v24 = vpop.eup %4111  ;;  %3820 = vmatpush3.bf16.msra.mxu1 %v1710_v22  ;;  %v4072_v22 = vld [vmem:[%s5028_s11 + $0x18] sm:$0xff]  }
 0x318   : > { %3816 = vmatmul.mubr.msk.bf16.vlgmr.msra.gmra.mxu0 %vm1317_vm2, %v1553_v23  ;;  %v1550_v25 = vmul.f32 %v4112_v24, %v4104_v3  ;;  %3831 = vmatprep.subr.bf16.mxu1 %v4197_v1  ;;  %v4074_v23 = vld [vmem:[%s5028_s11 + $0x10] sm:$0xff]  }
 0x319   : > { %3827 = vmatprep.mubr.msk.bf16.mxu0 %vm4198_vm0, %v4197_v1  ;;  %3826 = vmatpush3.bf16.msra.mxu0 %v1764_v28  ;;  %v3536_v28 = vld [vmem:[%s5029_s8] ss:$0 sm:$0xff]  ;;  %s5032_s8 = sld [smem:[#allocation12_spill]] }
 0x31a   : > { %v1554_v26 = vpack.c.bf16 %v1550_v25, %v1550_v25  ;;  %3837 = vmatprep.subr.bf16.mxu0 %v4197_v1 }
 0x31c   : > { %3822 = vmatmul.mubr.msk.bf16.vlgmr.msra.gmra.mxu1 %vm1317_vm2, %v1554_v26 }
 0x31d   : > { %3833 = vmatprep.mubr.msk.bf16.mxu1 %vm4198_vm0, %v4197_v1  ;;  %3832 = vmatpush3.bf16.msra.mxu1 %v1810_v30  ;;  %v3537_v30 = vld [vmem:[%s5030_s10] ss:$0 sm:$0xff]  ;;  %s5036_s10 = sld [smem:[#allocation24_spill]] }
 0x31e   : > { %3843 = vmatprep.subr.bf16.mxu1 %v4197_v1 }
 0x31f   : > { %s787_s0 = scalar_lea.vmem %s5032_s8, %s5031_s6  ;;  %s790_s6 = scalar_lea.vmem %s5034_s28, %s4401_s3 }
 0x320   : > { %s5035_s3 = smov 120   ;;  %s4139_s8 = sshll.u32 %s4200_s30, 4  ;;  %s4140_s8 = int_to_ptr.vmem [resolvable:$false] %s4139_s8 }
 0x321   : > { %s4141_s7 = scalar_lea.vmem %s4140_s8, 256 }
 0x3d0   : > { %v1599_v32 = vpop.f32.mrf.mxu0 }
 0x3d1   : > { %v1752_v34 = vpack.c.bf16 %v1599_v32, %v1599_v32 }
 0x3d2   : > { %v3805_v36 = vpop.f32.mrf.mxu0 }
 0x3d3   : > { %3828 = vmatmul.mubr.msk.bf16.vlgmr.msra.gmra.mxu0 %vm1317_vm2, %v1752_v34  ;;  %v4075_v34 = vld [vmem:[%s5028_s11 + $0x28] sm:$0xff]  }
 0x3d4   : > { %v1602_v38 = vpop.f32.mrf.mxu0  ;;  %v1648_v39 = vpop.f32.mrf.mxu1  ;;  %3838 = vmatpush3.bf16.msra.mxu0 %v1856_v35  ;;  %3839 = vmatprep.mubr.msk.bf16.mxu0 %vm4198_vm0, %v4197_v1  ;;  %v4076_v35 = vld [vmem:[%s5028_s11 + $0x38] sm:$0xff]  }
 0x3d5   : > { %v1753_v40 = vpack.c.bf16 %v1648_v39, %v1648_v39  ;;  %3849 = vmatprep.subr.bf16.mxu0 %v4197_v1  ;;  %v4078_v38 = vld [vmem:[%s5028_s11 + $0x30] sm:$0xff]   ;;  %v4079_v39 = vld [vmem:[%s4966_s13 + $0x8] sm:$0xff]  }
 0x3d6   : > { %v3806_v42 = vpop.f32.mrf.mxu0  ;;  %v3811_v43 = vpop.f32.mrf.mxu1 }
 0x3d7   : > { %3834 = vmatmul.mubr.msk.bf16.vlgmr.msra.gmra.mxu1 %vm1317_vm2, %v1753_v40  ;;  %v4080_v40 = vld [vmem:[%s4966_s13 + $0x18] sm:$0xff]   ;;  %v4082_v42 = vld [vmem:[%s4966_s13 + $0x10] sm:$0xff]   ;;  %v793_v43 = vld [vmem:[%s787_s0] sm:$0xff] }
 0x3d8   : > { %v1651_v44 = vpop.f32.mrf.mxu1  ;;  %v1697_v45 = vpop.f32.mrf.mxu0  ;;  %3844 = vmatpush3.bf16.msra.mxu1 %v1902_v41  ;;  %3845 = vmatprep.mubr.msk.bf16.mxu1 %vm4198_vm0, %v4197_v1  ;;  %v4081_v41 = vld [vmem:[%s4966_s13] sm:$0xff]  }
 0x3d9   : > { %v1754_v46 = vpack.c.bf16 %v1697_v45, %v1697_v45  ;;  %3857 = vmatprep.subr.bf16.mxu1 %v4197_v1  ;;  %v1988_v44 = vpack.c.bf16 %v793_v43, %v793_v43  ;;  %v4083_v45 = vld [vmem:[%s4966_s13 + $0x28] sm:$0xff]  }
 0x3da   : > { %v3812_v47 = vpop.f32.mrf.mxu1  ;;  %v3817_v49 = vpop.f32.mrf.mxu0 }
 0x3db   : > { %3840 = vmatmul.mubr.msk.bf16.vlgmr.msra.gmra.mxu0 %vm1317_vm2, %v1754_v46  ;;  %v4084_v46 = vld [vmem:[%s4966_s13 + $0x38] sm:$0xff]   ;;  %v4085_v47 = vld [vmem:[%s4966_s13 + $0x20] sm:$0xff]   ;;  %v4086_v49 = vld [vmem:[%s4966_s13 + $0x30] sm:$0xff]  }
 0x3dc   : > { %v1700_v50 = vpop.f32.mrf.mxu0  ;;  %v1746_v51 = vpop.f32.mrf.mxu1  ;;  %3853 = vmatprep.mubr.msk.bf16.mxu0 %vm4198_vm0, %v4197_v1  ;;  %3850 = vmatpush3.bf16.msra.mxu0 %v4071_v21  ;;  %v3557_v21 = vld [vmem:[%s4967_s14 + $0x3] ss:$0 sm:$0xff] }
 0x3dd   : > { %v1755_v52 = vpack.c.bf16 %v1746_v51, %v1746_v51  ;;  %3851 = vmatprep.subr.bf16.mxu0 %v4197_v1 }
 0x3de   : > { %v3818_v53 = vpop.f32.mrf.mxu0  ;;  %v3823_v54 = vpop.f32.mrf.mxu1 }
 0x3df   : > { %3846 = vmatmul.mubr.msk.bf16.vlgmr.msra.gmra.mxu1 %vm1317_vm2, %v1755_v52 }
 0x3e0   : > { %v1749_v55 = vpop.f32.mrf.mxu1  ;;  %3861 = vmatprep.mubr.msk.bf16.mxu1 %vm4198_vm0, %v4197_v1  ;;  %3858 = vmatpush3.bf16.msra.mxu1 %v4072_v22 }
 0x3e1   : > { %3859 = vmatprep.subr.bf16.mxu1 %v4197_v1 }
 0x3e2   : > { %v3824_v56 = vpop.f32.mrf.mxu1 }
 0x3e4   : > { %3860 = vmatpush3.bf16.msra.mxu1 %v4074_v23 }
 0x3e5   : > { %3873 = vmatprep.subr.bf16.mxu1 %v4197_v1 }
 0x493   : > { %v1800_v57 = vpop.f32.mrf.mxu0 }
 0x495   : > { %v3829_v58 = vpop.f32.mrf.mxu0 }
 0x497   : > { %v1803_v59 = vpop.f32.mrf.mxu0  ;;  %v1846_v60 = vpop.f32.mrf.mxu1 }
 0x498   : > { %v1944_v3 = vadd.f32 %v1846_v60, %v1800_v57 }
 0x499   : > { %v3830_v62 = vpop.f32.mrf.mxu0  ;;  %v3835_v63 = vpop.f32.mrf.mxu1 }
 0x49b   : > { %v1849_v0 = vpop.f32.mrf.mxu1  ;;  %v1892_v2 = vpop.f32.mrf.mxu0 }
 0x49c   : > { %v1945_v6 = vadd.f32 %v1944_v3, %v1892_v2 }
 0x49d   : > { %v3836_v4 = vpop.f32.mrf.mxu1  ;;  %v3841_v5 = vpop.f32.mrf.mxu0 }
 0x49e   : > { %v3554_v4 = vld [vmem:[%s4967_s14] ss:$0 sm:$0xff]  ;;  %v3555_v5 = vld [vmem:[%s4967_s14 + $0x1] ss:$0 sm:$0xff] }
 0x49f   : > { %v1895_v8 = vpop.f32.mrf.mxu0  ;;  %v1938_v9 = vpop.f32.mrf.mxu1 }
 0x4a0   : > { %v1946_v33 = vadd.f32 %v1945_v6, %v1938_v9 }
 0x4a1   : > { %v3842_v12 = vpop.f32.mrf.mxu0  ;;  %v3847_v61 = vpop.f32.mrf.mxu1 }
 0x4a2   : > { %v1954_v10 = vadd.f32 %v3535_v11, %v1946_v33 }
 0x4a3   : > { %v1941_v48 = vpop.f32.mrf.mxu1 }
 0x4a4   : > { %v1955_v13 = vadd.f32 %v1954_v10, %v4416_v7  ;;  %v4073_v7 = vld [vmem:[%s5028_s11] sm:$0xff]   ;;  %s3402_s11 = scalar_lea.hbm %s5036_s10, %s3602_s1 }
 0x4a5   : > { %v3848_v14 = vpop.f32.mrf.mxu1  ;;  %3852 = vmatpush3.bf16.msra.mxu0 %v4073_v7  ;;  %v3538_v48 = vld [vmem:[%s5033_s12] ss:$0 sm:$0xff] }
 0x4a6   : > { %v1956_v15 = vsel %vm857_vm1, %v1955_v13, 0.0  ;;  %3865 = vmatprep.subr.bf16.mxu0 %v4197_v1 }
 0x4a7   : > { %1957 = vadd.xlane.f32.xlu0 %v1956_v15 }
 0x530   : > { %v1958_v16 = vpop.xlane.xlu0 %1957 }
 0x531   : > { %v1960_v17 = vmul.f32 0.03125, %v1958_v16 }
 0x533   : > { %v1961_v18 = vsub.f32 %v1955_v13, %v1960_v17  ;;  %v3539_v13 = vld [vmem:[%s5033_s12 + $0x1] ss:$0 sm:$0xff] }
 0x535   : > { %v1962_v19 = vmul.f32 %v1961_v18, %v1961_v18 }
 0x537   : > { %v1963_v20 = vsel %vm857_vm1, %v1962_v19, 0.0 }
 0x538   : > { %1964 = vadd.xlane.f32.xlu1 %v1963_v20  ;;  %v3556_v20 = vld [vmem:[%s4967_s14 + $0x2] ss:$0 sm:$0xff] }
 0x5c1   : > { %v1965_v24 = vpop.xlane.xlu1 %1964 }
 0x5c2   : > { %v1966_v25 = vmul.f32 0.03125, %v1965_v24 }
 0x5c4   : > { %v1967_v26 = vadd.f32 1e-05, %v1966_v25 }
 0x5c6   : > { %4113 = vrsqrt.f32 %v1967_v26 }
 0x5d3   : > { %v4114_v27 = vpop.eup %4113 }
 0x5d4   : > { %v1969_v29 = vmul.f32 %v4114_v27, %v1961_v18 }
 0x5d6   : > { %v1977_v31 = vmul.f32 %v3536_v28, %v1969_v29 }
 0x5d8   : > { %v4640_v32 = vadd.f32 %v3537_v30, %v1977_v31 }
 0x5da   : > { %v1987_v36 = vpack.c.bf16 %v4640_v32, %v4640_v32 }
 0x5dc   : > { %3854 = vmatmul.mubr.msk.bf16.vlgmr.msra.gmra.mxu0 %vm857_vm1, %v1987_v36  ;;  %3862 = vmatmul.mubr.msk.bf16.vlgmr.msra.gmra.mxu1 %vm857_vm1, %v1987_v36 }
 0x5dd   : > { %3866 = vmatpush3.bf16.msra.mxu0 %v4075_v34  ;;  %3874 = vmatpush3.bf16.msra.mxu1 %v4076_v35  ;;  %v3540_v35 = vld [vmem:[%s5033_s12 + $0x2] ss:$0 sm:$0xff] }
 0x5de   : > { %3867 = vmatprep.subr.bf16.mxu0 %v4197_v1  ;;  %3875 = vmatprep.subr.bf16.mxu1 %v4197_v1 }
 0x5df   : > { %3869 = vmatprep.mubr.msk.bf16.mxu0 %vm4198_vm0, %v4197_v1  ;;  %3877 = vmatprep.mubr.msk.bf16.mxu1 %vm4198_vm0, %v4197_v1 }
 0x5e1   : > { %3868 = vmatpush3.bf16.msra.mxu0 %v4077_v37  ;;  %3876 = vmatpush3.bf16.msra.mxu1 %v4078_v38 }
 0x5e2   : > { %3881 = vmatprep.subr.bf16.mxu0 %v4197_v1  ;;  %3889 = vmatprep.subr.bf16.mxu1 %v4197_v1 }
 0x5e4   : > { %3870 = vmatmul.mubr.msk.bf16.vlgmr.msra.gmra.mxu0 %vm857_vm1, %v1987_v36  ;;  %3878 = vmatmul.mubr.msk.bf16.vlgmr.msra.gmra.mxu1 %vm857_vm1, %v1987_v36  ;;  %v3541_v36 = vld [vmem:[%s5033_s12 + $0x3] ss:$0 sm:$0xff] }
 0x5e5   : > { %3882 = vmatpush3.bf16.msra.mxu0 %v4079_v39  ;;  %3890 = vmatpush3.bf16.msra.mxu1 %v4080_v40 }
 0x5e6   : > { %3883 = vmatprep.subr.bf16.mxu0 %v4197_v1  ;;  %3891 = vmatprep.subr.bf16.mxu1 %v4197_v1 }
 0x5e7   : > { %3885 = vmatprep.mubr.msk.bf16.mxu0 %vm4198_vm0, %v4197_v1  ;;  %3893 = vmatprep.mubr.msk.bf16.mxu1 %vm4198_vm0, %v4197_v1 }
 0x5e9   : > { %3884 = vmatpush3.bf16.msra.mxu0 %v4081_v41  ;;  %3892 = vmatpush3.bf16.msra.mxu1 %v4082_v42 }
 0x5ea   : > { %3897 = vmatprep.subr.bf16.mxu0 %v4197_v1  ;;  %3905 = vmatprep.subr.bf16.mxu1 %v4197_v1 }
 0x5ec   : > { %3886 = vmatmul.mubr.msk.bf16.vlgmr.msra.gmra.mxu0 %vm857_vm1, %v1988_v44  ;;  %3894 = vmatmul.mubr.msk.bf16.vlgmr.msra.gmra.mxu1 %vm857_vm1, %v1988_v44 }
 0x5ed   : > { %3898 = vmatpush3.bf16.msra.mxu0 %v4083_v45  ;;  %3906 = vmatpush3.bf16.msra.mxu1 %v4084_v46 }
 0x5ee   : > { %3899 = vmatprep.subr.bf16.mxu0 %v4197_v1  ;;  %3907 = vmatprep.subr.bf16.mxu1 %v4197_v1 }
 0x5ef   : > { %3901 = vmatprep.mubr.msk.bf16.mxu0 %vm4198_vm0, %v4197_v1  ;;  %3909 = vmatprep.mubr.msk.bf16.mxu1 %vm4198_vm0, %v4197_v1 }
 0x5f1   : > { %3900 = vmatpush3.bf16.msra.mxu0 %v4085_v47  ;;  %3908 = vmatpush3.bf16.msra.mxu1 %v4086_v49  ;;  %v3574_v47 = vld [vmem:[%s790_s6] ss:$0 sm:$0xff]  ;;  %s777_s6 = sand.u32 1, %s4187_s2  }
 0x5f2   : > { %3913 = vmatprep.subr.bf16.mxu0 %v4197_v1  ;;  %3919 = vmatprep.subr.bf16.mxu1 %v4197_v1  ;;  %vm2697_vm6 = vcmp.ne.f32.partialorder %v3574_v47, 0.0  ;;  %s3391_s12 = scalar_lea.sflag [#allocation3], %s777_s6 }
 0x5f4   : > { %3902 = vmatmul.mubr.msk.bf16.vlgmr.msra.gmra.mxu0 %vm857_vm1, %v1988_v44  ;;  %3910 = vmatmul.mubr.msk.bf16.vlgmr.msra.gmra.mxu1 %vm857_vm1, %v1988_v44 }
 0x5f5   : > { %3915 = vmatprep.mubr.msk.bf16.mxu0 %vm4198_vm0, %v4197_v1  ;;  %3921 = vmatprep.mubr.msk.bf16.mxu1 %vm4198_vm0, %v4197_v1 }
 0x69c   : > { %v2082_v50 = vpop.f32.mrf.mxu0  ;;  %v2134_v51 = vpop.f32.mrf.mxu1 }
 0x69d   : > { %v2083_v22 = vadd.f32 %v3538_v48, %v2082_v50  ;;  %v2135_v7 = vadd.f32 %v3539_v13, %v2134_v51 }
 0x69e   : > { %v3855_v52 = vpop.f32.mrf.mxu0  ;;  %v3863_v53 = vpop.f32.mrf.mxu1 }
 0x69f   : > { %v2499_v29 = vpack.c.bf16 %v2083_v22, %v2083_v22  ;;  %v2500_v30 = vpack.c.bf16 %v2135_v7, %v2135_v7 }
 0x6a0   : > { %v2085_v54 = vpop.f32.mrf.mxu0  ;;  %v2137_v55 = vpop.f32.mrf.mxu1 }
 0x6a2   : > { %v3856_v56 = vpop.f32.mrf.mxu0  ;;  %v3864_v57 = vpop.f32.mrf.mxu1 }
 0x6a4   : > { %v2186_v58 = vpop.f32.mrf.mxu0  ;;  %v2238_v59 = vpop.f32.mrf.mxu1 }
 0x6a5   : > { %v2187_v43 = vadd.f32 %v3540_v35, %v2186_v58  ;;  %v2239_v44 = vadd.f32 %v3541_v36, %v2238_v59 }
 0x6a6   : > { %v3871_v60 = vpop.f32.mrf.mxu0  ;;  %v3879_v62 = vpop.f32.mrf.mxu1 }
 0x6a7   : > { %v2501_v45 = vpack.c.bf16 %v2187_v43, %v2187_v43  ;;  %v2502_v46 = vpack.c.bf16 %v2239_v44, %v2239_v44 }
 0x6a8   : > { %v2189_v63 = vpop.f32.mrf.mxu0  ;;  %v2241_v0 = vpop.f32.mrf.mxu1 }
 0x6aa   : > { %v3872_v2 = vpop.f32.mrf.mxu0  ;;  %v3880_v3 = vpop.f32.mrf.mxu1 }
 0x6ac   : > { %v2337_v6 = vpop.f32.mrf.mxu0  ;;  %v2389_v8 = vpop.f32.mrf.mxu1 }
 0x6ad   : > { %v2338_v9 = vadd.f32 %v3554_v4, %v2337_v6  ;;  %v2390_v11 = vadd.f32 %v3555_v5, %v2389_v8 }
 0x6ae   : > { %v3887_v33 = vpop.f32.mrf.mxu0  ;;  %v3895_v12 = vpop.f32.mrf.mxu1 }
 0x6af   : > { %v4727_v61 = vpack.c.bf16 %v2338_v9, %v2338_v9  ;;  %v4729_v10 = vpack.c.bf16 %v2390_v11, %v2390_v11 }
 0x6b0   : > { %v2340_v14 = vpop.f32.mrf.mxu0  ;;  %v2392_v15 = vpop.f32.mrf.mxu1 }
 0x6b1   : > { %v2511_v16 = vsel %vm1317_vm2, %v4727_v61, 0  ;;  %v2557_v17 = vsel %vm1317_vm2, %v4729_v10, 0 }
 0x6b2   : > { %v3888_v18 = vpop.f32.mrf.mxu0  ;;  %v3896_v19 = vpop.f32.mrf.mxu1  ;;  %3914 = vmatpush3.bf16.xpose.msra.mxu0 %v2511_v16  ;;  %3920 = vmatpush3.bf16.xpose.msra.mxu1 %v2557_v17 }
 0x6b3   : > { %3925 = vmatprep.subr.bf16.mxu0 %v4197_v1  ;;  %3931 = vmatprep.subr.bf16.mxu1 %v4197_v1 }
 0x6b4   : > { %v2441_v23 = vpop.f32.mrf.mxu0  ;;  %v2493_v24 = vpop.f32.mrf.mxu1 }
 0x6b5   : > { %v2442_v25 = vadd.f32 %v3556_v20, %v2441_v23  ;;  %v2494_v26 = vadd.f32 %v3557_v21, %v2493_v24 }
 0x6b6   : > { %v3903_v27 = vpop.f32.mrf.mxu0  ;;  %v3911_v28 = vpop.f32.mrf.mxu1 }
 0x6b7   : > { %v4749_v31 = vpack.c.bf16 %v2442_v25, %v2442_v25  ;;  %v4751_v34 = vpack.c.bf16 %v2494_v26, %v2494_v26 }
 0x6b8   : > { %v2444_v37 = vpop.f32.mrf.mxu0  ;;  %v2496_v38 = vpop.f32.mrf.mxu1 }
 0x6b9   : > { %v2603_v39 = vsel %vm1317_vm2, %v4749_v31, 0  ;;  %v2649_v40 = vsel %vm1317_vm2, %v4751_v34, 0  ;;  %3916 = vmatmul.mubr.msk.bf16.vlgmr.msra.gmra.mxu0 %vm1317_vm2, %v2499_v29  ;;  %3922 = vmatmul.mubr.msk.bf16.vlgmr.msra.gmra.mxu1 %vm1317_vm2, %v2500_v30 }
 0x6ba   : > { %3926 = vmatpush3.bf16.xpose.msra.mxu0 %v2603_v39  ;;  %3932 = vmatpush3.bf16.xpose.msra.mxu1 %v2649_v40  ;;  %v3904_v41 = vpop.f32.mrf.mxu0  ;;  %v3912_v42 = vpop.f32.mrf.mxu1 }
 0x6bb   : > { %3927 = vmatprep.mubr.msk.bf16.mxu0 %vm4198_vm0, %v4197_v1  ;;  %3933 = vmatprep.mubr.msk.bf16.mxu1 %vm4198_vm0, %v4197_v1 }
 0x6bc   : > { %3943 = vmatprep.subr.bf16.mxu1 %v4197_v1  ;;  %3937 = vmatprep.subr.bf16.mxu0 %v4197_v1 }
 0x6c1   : > { %3928 = vmatmul.mubr.msk.bf16.vlgmr.msra.gmra.mxu0 %vm1317_vm2, %v2501_v45  ;;  %3934 = vmatmul.mubr.msk.bf16.vlgmr.msra.gmra.mxu1 %vm1317_vm2, %v2502_v46 }
 0x6c2   : > { %3939 = vmatprep.mubr.msk.bf16.mxu0 %vm4198_vm0, %v4197_v1  ;;  %3945 = vmatprep.mubr.msk.bf16.mxu1 %vm4198_vm0, %v4197_v1 }
 0x779   : > { %v2547_v49 = vpop.f32.mrf.mxu0  ;;  %v2593_v50 = vpop.f32.mrf.mxu1 }
 0x77a   : > { %v2698_v51 = vsel %vm2697_vm6, -1e+09, %v2547_v49  ;;  %v2699_v55 = vsel %vm2697_vm6, -1e+09, %v2593_v50 }
 0x77b   : > { %v3917_v52 = vpop.f32.mrf.mxu0  ;;  %v3923_v53 = vpop.f32.mrf.mxu1  ;;  %v2702_v54 = vsel %vm1317_vm2, %v2698_v51, -inf  ;;  %v2705_v60 = vsel %vm1317_vm2, %v2699_v55, -inf }
 0x77c   : > { %2703 = vmax.xlane.f32.xlu0 %v2702_v54 }
 0x77d   : > { %v2550_v56 = vpop.f32.mrf.mxu0  ;;  %v2596_v57 = vpop.f32.mrf.mxu1 }
 0x77e   : > { %v2951_v57 = vld [vmem:[%s4968_s15 + $0x4] sm:$0xf] }
 0x77f   : > { %v3918_v58 = vpop.f32.mrf.mxu0  ;;  %v3924_v59 = vpop.f32.mrf.mxu1 }
 0x780   : > { %2706 = vmax.xlane.f32.xlu0 %v2705_v60  ;;  %v3004_v58 = vsel %vm1561_vm5, %v2951_v57, 0  ;;  %v2952_v59 = vld [vmem:[%s4968_s15 + $0x8] sm:$0xf] }
 0x781   : > { %v2639_v62 = vpop.f32.mrf.mxu0  ;;  %v2685_v63 = vpop.f32.mrf.mxu1 }
 0x782   : > { %v2700_v0 = vsel %vm2697_vm6, -1e+09, %v2639_v62  ;;  %v2701_v2 = vsel %vm2697_vm6, -1e+09, %v2685_v63  ;;  %v3050_v63 = vsel %vm1561_vm5, %v2952_v59, 0 }
 0x783   : > { %v3929_v3 = vpop.f32.mrf.mxu0  ;;  %v3935_v4 = vpop.f32.mrf.mxu1  ;;  %v2711_v5 = vsel %vm1317_vm2, %v2701_v2, -inf  ;;  %v2708_v6 = vsel %vm1317_vm2, %v2700_v0, -inf }
 0x784   : > { %2712 = vmax.xlane.f32.xlu1 %v2711_v5  ;;  %2709 = vmax.xlane.f32.xlu0 %v2708_v6 }
 0x785   : > { %v2642_v8 = vpop.f32.mrf.mxu0  ;;  %v2688_v9 = vpop.f32.mrf.mxu1 }
 0x787   : > { %v3930_v11 = vpop.f32.mrf.mxu0  ;;  %v3936_v33 = vpop.f32.mrf.mxu1 }
 0x805   : > { %v2704_v12 = vpop.xlane.xlu0 %2703 }
 0x806   : > { %v2714_v48 = vsub.f32 %v2698_v51, %v2704_v12 }
 0x808   : > { %v2718_v13 = vmul.f32 1.442695, %v2714_v48 }
 0x809   : > { %v2707_v14 = vpop.xlane.xlu0 %2706 }
 0x80a   : > { %4115 = vpow2.f32 %v2718_v13  ;;  %v2715_v15 = vsub.f32 %v2699_v55, %v2707_v14  ;;  %v2950_v55 = vld [vmem:[%s4968_s15] sm:$0xf] }
 0x80b   : > { %v2958_v56 = vsel %vm1561_vm5, %v2950_v55, 0  ;;  %v4094_v55 = vld [vmem:[%s4974_s21 + $0x10] sm:$0xff]  }
 0x80c   : > { %v2720_v16 = vmul.f32 1.442695, %v2715_v15 }
 0x80d   : > { %v2710_v17 = vpop.xlane.xlu0 %2709  ;;  %v2713_v25 = vpop.xlane.xlu1 %2712 }
 0x80e   : > { %4117 = vpow2.f32 %v2720_v16  ;;  %v2716_v18 = vsub.f32 %v2700_v0, %v2710_v17  ;;  %v2717_v26 = vsub.f32 %v2701_v2, %v2713_v25  ;;  %v2953_v2 = vld [vmem:[%s4968_s15 + $0xc] sm:$0xf] }
 0x80f   : > { %v3096_v6 = vsel %vm1561_vm5, %v2953_v2, 0 }
 0x810   : > { %v2722_v19 = vmul.f32 1.442695, %v2716_v18  ;;  %v2724_v27 = vmul.f32 1.442695, %v2717_v26 }
 0x812   : > { %4119 = vpow2.f32 %v2722_v19 }
 0x813   : > { %4121 = vpow2.f32 %v2724_v27 }
 0x817   : > { %v4116_v20 = vpop.eup %4115 }
 0x818   : > { %v2726_v21 = vsel %vm1317_vm2, %v4116_v20, 0.0 }
 0x819   : > { %2727 = vadd.xlane.f32.xlu0 %v2726_v21 }
 0x81b   : > { %v4118_v22 = vpop.eup %4117 }
 0x81c   : > { %v2729_v7 = vsel %vm1317_vm2, %v4118_v22, 0.0 }
 0x81d   : > { %2730 = vadd.xlane.f32.xlu1 %v2729_v7 }
 0x81f   : > { %v4120_v23 = vpop.eup %4119 }
 0x820   : > { %v2732_v24 = vsel %vm1317_vm2, %v4120_v23, 0.0  ;;  %v4122_v28 = vpop.eup %4121 }
 0x821   : > { %2733 = vadd.xlane.f32.xlu0 %v2732_v24  ;;  %v2735_v29 = vsel %vm1317_vm2, %v4122_v28, 0.0 }
 0x82e   : > { %2800 = vrot.lane.b32.xlu1 %v4729_v10, %s5035_s3 }
 0x832   : > { %2849 = vrot.lane.b32.xlu1 %v4749_v31, %s5035_s3 }
 0x837   : > { %2751 = vrot.lane.b32.xlu0 %v4727_v61, %s5035_s3 }
 0x856   : > { %2736 = vadd.xlane.f32.xlu1 %v2735_v29 }
 0x867   : > { %2898 = vrot.lane.b32.xlu1 %v4751_v34, %s5035_s3  ;;  %s3488_s3 = sshll.u32 %s777_s6, 3 }
 0x868   : > { %s779_s5 = scalar_lea.vmem [#allocation2], %s3488_s3 }
 0x869   : > { %s3404_s27 = sshll.u32 %s779_s5, 4  ;;  %s3405_s27 = int_to_ptr.vmem [resolvable:$true] %s3404_s27 }
 0x86a   : > { %s4135_s29 = scalar_lea.vmem %s3405_s27, 128  ;;  %p4142_p0 = scmp.lt.s32.totalorder %s3405_s27, %s4140_s8 }
 0x86b   : > { %p4136_p11 = scmp.ne.s32.totalorder %s3405_s27, %s4135_s29  ;;  %p4143_p1 = scmp.lt.s32.totalorder %s4141_s7, %s4135_s29 }
 0x86d   : > { %p4137_p12 = pnand %p4136_p11, %p4369_p5  ;;  %p4144_p2 = por %p4143_p1, %p4142_p0 }
 0x86f   : > { %p4138_p13 = pneg %p4137_p12 }
 0x871   : > { %p4145_p3 = pnand %p4144_p2, %p4138_p13 }
 0x8a2   : > { %v2728_v30 = vpop.xlane.xlu0 %2727 }
 0x8a3   : > { %4123 = vrcp.f32 %v2728_v30 }
 0x8a6   : > { %v2731_v10 = vpop.xlane.xlu1 %2730 }
 0x8a7   : > { %4125 = vrcp.f32 %v2731_v10 }
 0x8aa   : > { %v2801_v35 = vpop.permute.xlu1 %2800  ;;  %v2734_v36 = vpop.xlane.xlu0 %2733 }
 0x8ab   : > { %v2806_v31 = vsel %vm1561_vm5, %v2801_v35, 0  ;;  %4127 = vrcp.f32 %v2734_v36 }
 0x8ac   : > { %3944 = vmatpush3.bf16.msra.mxu1 %v2806_v31 }
 0x8ad   : > { %3955 = vmatprep.subr.bf16.mxu1 %v4197_v1 }
 0x8ae   : > { %v2752_v61 = vpop.permute.xlu0 %2751  ;;  %v2850_v40 = vpop.permute.xlu1 %2849 }
 0x8af   : > { %v2757_v38 = vsel %vm1561_vm5, %v2752_v61, 0  ;;  %v2855_v42 = vsel %vm1561_vm5, %v2850_v40, 0  ;;  %v3583_v61 = vld [vmem:[%s4969_s16] ss:$0 sm:$0xff] }
 0x8b0   : > { %v4124_v37 = vpop.eup %4123  ;;  %3938 = vmatpush3.bf16.msra.mxu0 %v2757_v38 }
 0x8b1   : > { %v2742_v39 = vmul.f32 %v4124_v37, %v4116_v20  ;;  %3949 = vmatprep.subr.bf16.mxu0 %v4197_v1 }
 0x8b3   : > { %v2746_v34 = vpack.c.bf16 %v2742_v39, %v2742_v39 }
 0x8b4   : > { %v4126_v41 = vpop.eup %4125 }
 0x8b5   : > { %3940 = vmatmul.mubr.msk.bf16.vlgmr.msra.gmra.mxu0 %vm1317_vm2, %v2746_v34  ;;  %v2743_v43 = vmul.f32 %v4126_v41, %v4118_v22 }
 0x8b6   : > { %3950 = vmatpush3.bf16.msra.mxu0 %v2855_v42  ;;  %3951 = vmatprep.mubr.msk.bf16.mxu0 %vm4198_vm0, %v4197_v1 }
 0x8b7   : > { %v2747_v44 = vpack.c.bf16 %v2743_v43, %v2743_v43  ;;  %3961 = vmatprep.subr.bf16.mxu0 %v4197_v1 }
 0x8b8   : > { %v4128_v45 = vpop.eup %4127 }
 0x8b9   : > { %3946 = vmatmul.mubr.msk.bf16.vlgmr.msra.gmra.mxu1 %vm1317_vm2, %v2747_v44  ;;  %v2744_v46 = vmul.f32 %v4128_v45, %v4120_v23 }
 0x8ba   : > { %3957 = vmatprep.mubr.msk.bf16.mxu1 %vm4198_vm0, %v4197_v1 }
 0x8bb   : > { %v2748_v47 = vpack.c.bf16 %v2744_v46, %v2744_v46 }
 0x8bd   : > { %3952 = vmatmul.mubr.msk.bf16.vlgmr.msra.gmra.mxu0 %vm1317_vm2, %v2748_v47 }
 0x8be   : > { %3963 = vmatprep.mubr.msk.bf16.mxu0 %vm4198_vm0, %v4197_v1  ;;  %3962 = vmatpush3.bf16.msra.mxu0 %v2958_v56 }
 0x8bf   : > { %3973 = vmatprep.subr.bf16.mxu0 %v4197_v1 }
 0x8df   : > { %v2737_v49 = vpop.xlane.xlu1 %2736 }
 0x8e0   : > { %4129 = vrcp.f32 %v2737_v49  ;;  %v4087_v49 = vld [vmem:[%s4972_s19 + $0x8] sm:$0xff]  }
 0x8e3   : > { %v2899_v50 = vpop.permute.xlu1 %2898 }
 0x8e4   : > { %v2904_v51 = vsel %vm1561_vm5, %v2899_v50, 0  ;;  %v4089_v50 = vld [vmem:[%s4974_s21 + $0x38] sm:$0xff]  }
 0x8e5   : > { %3956 = vmatpush3.bf16.msra.mxu1 %v2904_v51  ;;  %v4090_v51 = vld [vmem:[%s4974_s21 + $0x30] sm:$0xff]  }
 0x8e6   : > { %3967 = vmatprep.subr.bf16.mxu1 %v4197_v1 }
 0x8ed   : > { %v4130_v52 = vpop.eup %4129 }
 0x8ee   : > { %v2745_v53 = vmul.f32 %v4130_v52, %v4122_v28  ;;  %v4091_v52 = vld [vmem:[%s4974_s21 + $0x28] sm:$0xff]  }
 0x8f0   : > { %v2749_v54 = vpack.c.bf16 %v2745_v53, %v2745_v53  ;;  %v4092_v53 = vld [vmem:[%s4974_s21 + $0x20] sm:$0xff]  }
 0x8f2   : > { %3958 = vmatmul.mubr.msk.bf16.vlgmr.msra.gmra.mxu1 %vm1317_vm2, %v2749_v54  ;;  %v4093_v54 = vld [vmem:[%s4974_s21 + $0x18] sm:$0xff]  }
 0x8f3   : > { %3969 = vmatprep.mubr.msk.bf16.mxu1 %vm4198_vm0, %v4197_v1  ;;  %3968 = vmatpush3.bf16.msra.mxu1 %v3004_v58 }
 0x8f4   : > { %3979 = vmatprep.subr.bf16.mxu1 %v4197_v1 }
 0x975   : > { %v2793_v60 = vpop.f32.mrf.mxu0 }
 0x976   : > { %v2946_v62 = vpack.c.bf16 %v2793_v60, %v2793_v60  ;;  %v3584_v60 = vld [vmem:[%s4970_s17] ss:$0 sm:$0xff] }
 0x977   : > { %v3941_v0 = vpop.f32.mrf.mxu0 }
 0x978   : > { %3964 = vmatmul.mubr.msk.bf16.vlgmr.msra.gmra.mxu0 %vm1317_vm2, %v2946_v62 }
 0x979   : > { %v2796_v3 = vpop.f32.mrf.mxu0  ;;  %v2842_v4 = vpop.f32.mrf.mxu1  ;;  %3974 = vmatpush3.bf16.msra.mxu0 %v3050_v63  ;;  %3975 = vmatprep.mubr.msk.bf16.mxu0 %vm4198_vm0, %v4197_v1  ;;  %v3585_v63 = vld [vmem:[%s4971_s18] ss:$0 sm:$0xff] }
 0x97a   : > { %v2947_v5 = vpack.c.bf16 %v2842_v4, %v2842_v4  ;;  %3985 = vmatprep.subr.bf16.mxu0 %v4197_v1  ;;  %v4095_v4 = vld [vmem:[%s4974_s21 + $0x8] sm:$0xff]  }
 0x97b   : > { %v3942_v8 = vpop.f32.mrf.mxu0  ;;  %v3947_v9 = vpop.f32.mrf.mxu1 }
 0x97c   : > { %3970 = vmatmul.mubr.msk.bf16.vlgmr.msra.gmra.mxu1 %vm1317_vm2, %v2947_v5  ;;  %v4096_v5 = vld [vmem:[%s4974_s21] sm:$0xff]  }
 0x97d   : > { %v2845_v11 = vpop.f32.mrf.mxu1  ;;  %3980 = vmatpush3.bf16.msra.mxu1 %v3096_v6  ;;  %3981 = vmatprep.mubr.msk.bf16.mxu1 %vm4198_vm0, %v4197_v1  ;;  %v2891_v33 = vpop.f32.mrf.mxu0  ;;  %v3586_v6 = vld [vmem:[%s4973_s20] ss:$0 sm:$0xff] }
 0x97e   : > { %3993 = vmatprep.subr.bf16.mxu1 %v4197_v1  ;;  %v2948_v12 = vpack.c.bf16 %v2891_v33, %v2891_v33 }
 0x97f   : > { %v3948_v48 = vpop.f32.mrf.mxu1  ;;  %v3953_v13 = vpop.f32.mrf.mxu0 }
 0x980   : > { %3976 = vmatmul.mubr.msk.bf16.vlgmr.msra.gmra.mxu0 %vm1317_vm2, %v2948_v12 }
 0x981   : > { %v2894_v14 = vpop.f32.mrf.mxu0  ;;  %3989 = vmatprep.mubr.msk.bf16.mxu0 %vm4198_vm0, %v4197_v1  ;;  %3986 = vmatpush3.bf16.msra.mxu0 %v4087_v49 }
 0x982   : > { %3987 = vmatprep.subr.bf16.mxu0 %v4197_v1 }
 0x983   : > { %v3954_v15 = vpop.f32.mrf.mxu0 }
 0x9b2   : > { %v2940_v16 = vpop.f32.mrf.mxu1 }
 0x9b3   : > { %v2949_v17 = vpack.c.bf16 %v2940_v16, %v2940_v16 }
 0x9b4   : > { %v3959_v18 = vpop.f32.mrf.mxu1 }
 0x9b5   : > { %3982 = vmatmul.mubr.msk.bf16.vlgmr.msra.gmra.mxu1 %vm1317_vm2, %v2949_v17 }
 0x9b6   : > { %v2943_v19 = vpop.f32.mrf.mxu1  ;;  %4009 = vmatprep.mubr.msk.bf16.mxu1 %vm4198_vm0, %v4197_v1  ;;  %3994 = vmatpush3.bf16.msra.mxu1 %v4089_v50 }
 0x9b7   : > { %3995 = vmatprep.subr.bf16.mxu1 %v4197_v1 }
 0x9b8   : > { %v3960_v20 = vpop.f32.mrf.mxu1 }
 0x9ba   : > { %3996 = vmatpush3.bf16.msra.mxu1 %v4090_v51 }
 0x9bb   : > { %3997 = vmatprep.subr.bf16.mxu1 %v4197_v1 }
 0x9be   : > { %3998 = vmatpush3.bf16.msra.mxu1 %v4091_v52 }
 0x9bf   : > { %3999 = vmatprep.subr.bf16.mxu1 %v4197_v1 }
 0x9c2   : > { %4000 = vmatpush3.bf16.msra.mxu1 %v4092_v53 }
 0x9c3   : > { %4001 = vmatprep.subr.bf16.mxu1 %v4197_v1 }
 0x9c6   : > { %4002 = vmatpush3.bf16.msra.mxu1 %v4093_v54 }
 0x9c7   : > { %4003 = vmatprep.subr.bf16.mxu1 %v4197_v1 }
 0x9ca   : > { %4004 = vmatpush3.bf16.msra.mxu1 %v4094_v55 }
 0x9cb   : > { %4005 = vmatprep.subr.bf16.mxu1 %v4197_v1 }
 0x9ce   : > { %4006 = vmatpush3.bf16.msra.mxu1 %v4095_v4 }
 0x9cf   : > { %4007 = vmatprep.subr.bf16.mxu1 %v4197_v1  ;;  %v3590_v1 = vld [vmem:[%s4975_s22] ss:$0 sm:$0xff] }
 0x9d2   : > { %4008 = vmatpush3.bf16.msra.mxu1 %v4096_v5 }
 0xa38   : > { %v2994_v21 = vpop.f32.mrf.mxu0 }
 0xa3a   : > { %v3965_v22 = vpop.f32.mrf.mxu0 }
 0xa3c   : > { %v2997_v7 = vpop.f32.mrf.mxu0  ;;  %v3040_v23 = vpop.f32.mrf.mxu1 }
 0xa3d   : > { %v3138_v35 = vadd.f32 %v3040_v23, %v2994_v21 }
 0xa3e   : > { %v3966_v24 = vpop.f32.mrf.mxu0  ;;  %v3971_v25 = vpop.f32.mrf.mxu1 }
 0xa40   : > { %v3043_v26 = vpop.f32.mrf.mxu1  ;;  %v3086_v27 = vpop.f32.mrf.mxu0 }
 0xa41   : > { %v3139_v31 = vadd.f32 %v3138_v35, %v3086_v27 }
 0xa42   : > { %v3972_v28 = vpop.f32.mrf.mxu1  ;;  %v3977_v29 = vpop.f32.mrf.mxu0 }
 0xa43   : > { %v3599_v29 = vld [vmem:[%s4976_s23] ss:$0 sm:$0xff] }
 0xa44   : > { %v3089_v30 = vpop.f32.mrf.mxu0 }
 0xa46   : > { %v3978_v10 = vpop.f32.mrf.mxu0 }
 0xa47   : > { %v3600_v10 = vld [vmem:[%s4977_s24] ss:$0 sm:$0xff] }
 0xa75   : > { %v3132_v36 = vpop.f32.mrf.mxu1 }
 0xa76   : > { %v3140_v37 = vadd.f32 %v3139_v31, %v3132_v36 }
 0xa77   : > { %v3983_v38 = vpop.f32.mrf.mxu1 }
 0xa78   : > { %v3148_v39 = vadd.f32 %v3583_v61, %v3140_v37 }
 0xa79   : > { %v3135_v40 = vpop.f32.mrf.mxu1 }
 0xa7a   : > { %v3149_v34 = vadd.f32 %v3148_v39, %v4640_v32  ;;  %v4088_v32 = vld [vmem:[%s4972_s19] sm:$0xff]  }
 0xa7b   : > { %v3984_v41 = vpop.f32.mrf.mxu1  ;;  %3988 = vmatpush3.bf16.msra.mxu0 %v4088_v32 }
 0xa7c   : > { %v3150_v42 = vsel %vm857_vm1, %v3149_v34, 0.0 }
 0xa7d   : > { %3151 = vadd.xlane.f32.xlu0 %v3150_v42 }
 0xb06   : > { %v3152_v43 = vpop.xlane.xlu0 %3151 }
 0xb07   : > { %v3153_v44 = vmul.f32 0.03125, %v3152_v43 }
 0xb09   : > { %v3154_v45 = vsub.f32 %v3149_v34, %v3153_v44 }
 0xb0b   : > { %v3155_v46 = vmul.f32 %v3154_v45, %v3154_v45 }
 0xb0d   : > { %v3156_v47 = vsel %vm857_vm1, %v3155_v46, 0.0 }
 0xb0e   : > { %3157 = vadd.xlane.f32.xlu1 %v3156_v47 }
 0xb97   : > { %v3158_v56 = vpop.xlane.xlu1 %3157 }
 0xb98   : > { %v3159_v57 = vmul.f32 0.03125, %v3158_v56 }
 0xb9a   : > { %v3160_v58 = vadd.f32 1e-05, %v3159_v57 }
 0xb9c   : > { %4131 = vrsqrt.f32 %v3160_v58 }
 0xba9   : > { %v4132_v59 = vpop.eup %4131 }
 0xbaa   : > { %v3162_v62 = vmul.f32 %v4132_v59, %v3154_v45 }
 0xbac   : > { %v3170_v0 = vmul.f32 %v3584_v60, %v3162_v62 }
 0xbae   : > { %v3178_v2 = vadd.f32 %v3585_v63, %v3170_v0 }
 0xbb0   : > { %v3179_v3 = vpack.c.bf16 %v3178_v2, %v3178_v2 }
 0xbb2   : > { %3990 = vmatmul.mubr.msk.bf16.vlgmr.msra.gmra.mxu0 %vm857_vm1, %v3179_v3 }
 0xc72   : > { %v3240_v8 = vpop.f32.mrf.mxu0 }
 0xc73   : > { %v3241_v9 = vadd.f32 %v3586_v6, %v3240_v8 }
 0xc74   : > { %v3991_v11 = vpop.f32.mrf.mxu0 }
 0xc75   : > { %v3246_v33 = vmax.f32 %v3241_v9, 0.0 }
 0xc76   : > { %v3243_v12 = vpop.f32.mrf.mxu0 }
 0xc77   : > { %v3247_v48 = vpack.c.bf16 %v3246_v33, %v3246_v33 }
 0xc78   : > { %v3992_v13 = vpop.f32.mrf.mxu0 }
 0xc79   : > { %4010 = vmatmul.mubr.bf16.vlgmr.msra.gmra.mxu1 %v3247_v48 }
 0xd39   : > { %v3353_v14 = vpop.f32.mrf.mxu1 }
 0xd3a   : > { %v3354_v15 = vadd.f32 %v3590_v1, %v3353_v14 }
 0xd3b   : > { %v4011_v16 = vpop.f32.mrf.mxu1 }
 0xd3c   : > { %v3359_v17 = vadd.f32 %v3354_v15, %v3178_v2 }
 0xd3d   : > { %v3356_v18 = vpop.f32.mrf.mxu1 }
 0xd3e   : > { %v3360_v19 = vsel %vm857_vm1, %v3359_v17, 0.0 }
 0xd3f   : > { %3361 = vadd.xlane.f32.xlu0 %v3360_v19  ;;  %v4012_v20 = vpop.f32.mrf.mxu1 }
 0xdc8   : > { %v3362_v21 = vpop.xlane.xlu0 %3361 }
 0xdc9   : > { %v3363_v22 = vmul.f32 0.03125, %v3362_v21 }
 0xdcb   : > { %v3364_v7 = vsub.f32 %v3359_v17, %v3363_v22 }
 0xdcd   : > { %v3365_v23 = vmul.f32 %v3364_v7, %v3364_v7 }
 0xdcf   : > { %v3366_v24 = vsel %vm857_vm1, %v3365_v23, 0.0 }
 0xdd0   : > { %3367 = vadd.xlane.f32.xlu0 %v3366_v24 }
 0xe59   : > { %v3368_v25 = vpop.xlane.xlu0 %3367 }
 0xe5a   : > { %v3369_v26 = vmul.f32 0.03125, %v3368_v25 }
 0xe5c   : > { %v3370_v27 = vadd.f32 1e-05, %v3369_v26 }
 0xe5e   : > { %4133 = vrsqrt.f32 %v3370_v27 }
 0xe6b   : > { %v4134_v28 = vpop.eup %4133 }
 0xe6c   : > { %v3372_v30 = vmul.f32 %v4134_v28, %v3364_v7 }
 0xe6e   : > { %v3380_v35 = vmul.f32 %v3599_v29, %v3372_v30 }
 0xe70   : > { %v3388_v31 = vadd.f32 %v3600_v10, %v3380_v35 }
 0xe72   : > { %3389 = vst.msk [vmem:[%s779_s5] sm:$0xff] %vm857_vm1, %v3388_v31 }
 0xe73   : > { %4148 = shalt.err (!%p4145_p3)
}
 0xe74   : > { %s4149_s9 = scalar_lea.hbm %s3402_s11, 128  ;;  %s4153_s0 = scalar_lea.hbm %s5036_s10, 256 }
 0xe75   : > { %p4150_p4 = scmp.ne.s32.totalorder %s3402_s11, %s4149_s9  ;;  %p4154_p9 = scmp.lt.s32.totalorder %s3402_s11, %s5036_s10 }
 0xe76   : > { %p4155_p10 = scmp.lt.s32.totalorder %s4153_s0, %s4149_s9 }
 0xe77   : > { %p4151_p7 = pnand %p4150_p4, %p4369_p5 }
 0xe78   : > { %p4156_p11 = por %p4155_p10, %p4154_p9 }
 0xe79   : > { %p4152_p8 = pneg %p4151_p7 }
 0xe7b   : > { %p4157_p12 = pnand %p4156_p11, %p4152_p8 }
 0xe7d   : > { %4160 = shalt.err (!%p4157_p12)
}
 0xe7e   : > { %4013 = dma.vmem_to_hbm [thread:$0]  (%p4369_p5), %s3405_s27, 128, %s3402_s11, %s3391_s12  }
 0xe7f PF: > { %s5037_s28 = sld [smem:[#allocation7_spill]] }
 0xe80   : > { %s5038_s29 = sld [smem:[#allocation5_spill]] }
 0xe85   : > { %p4019_p13 = scmp.ge.s32.totalorder %s5037_s28, 2 }
 0xe86   : > { %s3416_s8 = sand.u32 1, %s5038_s29  }
 0xe87   : > { %p4016_p0 = pnand %p4019_p13, %p4373_p6  ;;  %s3417_s7 = scalar_lea.sflag [#allocation3], %s3416_s8 }
 0xe89   : > { %p4017_p1 = pneg %p4016_p0 }
 0xe8b   : > { %4178 = dma.done.wait (%p4017_p1), %s3417_s7, 128  }
 0xe8c   : > { %4180 = vsyncadd (%p4017_p1), %s3417_s7, 4294967168  ;;  %s5040_s30 = sld [smem:[#allocation8_spill]]  ;;  %s5043_s29 = smov %s4187_s2 }
 0xe8d   : > { %s5041_s9 = sld [smem:[#allocation6_spill]] }
 0xe8e   : > { %s5042_s6 = sld [smem:[#allocation9_spill]] }
 0xe92   : > { %p35_p2 = scmp.ge.s32.totalorder %s5040_s30, 4  }
 0xe93   : > { %s5044_s2 = smov %s5041_s9 }
 0xe94   :  { %37 = sbr.rel (!%p35_p2) target bundleno = 18 (0x12), region = 161 }
 0xe99   :  { %3422 = vsyncpa [#allocation3], 1 }
 0xe9a   :  { %3424 = vsyncpa [#allocation3 + $0x1], 1 }

// kernel: tpu_custom_call.1
= control target key start
LH: loop header
LB: loop body
LE: loop exit
PB: predicated region body
PF: predicated region fallthrough
CT: control target
= control target key end

     0   :  { %s4953_s0 = inlined_call_operand.vmem [shape: f32[2,8,32], index: 0, kind: input, shape index: {}]   ;;  %s4954_s1 = inlined_call_operand.vmem [shape: f32[2,8,32], index: 1, kind: input, shape index: {}]   ;;  %s4955_s2 = inlined_call_operand.vmem [shape: f32[2,1,8], index: 2, kind: input, shape index: {}]   ;;  %s4956_s3 = inlined_call_operand.vmem [shape: bf16[4,32,8], index: 3, kind: input, shape index: {}]   ;;  %s4957_s4 = inlined_call_operand.vmem [shape: f32[4,1,8], index: 4, kind: input, shape index: {}]   ;;  %s4958_s5 = inlined_call_operand.vmem [shape: bf16[4,32,16], index: 5, kind: input, shape index: {}]   ;;  %s4959_s6 = inlined_call_operand.vmem [shape: f32[4,1,16], index: 6, kind: input, shape index: {}]   ;;  %s4960_s7 = inlined_call_operand.vmem [shape: bf16[4,8,32], index: 7, kind: input, shape index: {}]   ;;  %s4961_s8 = inlined_call_operand.vmem [shape: f32[1,32], index: 8, kind: input, shape index: {}]   ;;  %s4962_s9 = inlined_call_operand.vmem [shape: f32[1,32], index: 9, kind: input, shape index: {}]   ;;  %s4963_s10 = inlined_call_operand.vmem [shape: f32[1,32], index: 10, kind: input, shape index: {}]   ;;  %s4964_s11 = inlined_call_operand.vmem [shape: bf16[4,32,8], index: 11, kind: input, shape index: {}]   ;;  %s4965_s12 = inlined_call_operand.vmem [shape: f32[4,1,8], index: 12, kind: input, shape index: {}]   ;;  %s4966_s13 = inlined_call_operand.vmem [shape: bf16[4,32,16], index: 13, kind: input, shape index: {}]   ;;  %s4967_s14 = inlined_call_operand.vmem [shape: f32[4,1,16], index: 14, kind: input, shape index: {}]   ;;  %s4968_s15 = inlined_call_operand.vmem [shape: bf16[4,8,32], index: 15, kind: input, shape index: {}]   ;;  %s4969_s16 = inlined_call_operand.vmem [shape: f32[1,32], index: 16, kind: input, shape index: {}]   ;;  %s4970_s17 = inlined_call_operand.vmem [shape: f32[1,32], index: 17, kind: input, shape index: {}]   ;;  %s4971_s18 = inlined_call_operand.vmem [shape: f32[1,32], index: 18, kind: input, shape index: {}]   ;;  %s4972_s19 = inlined_call_operand.vmem [shape: bf16[32,128], index: 19, kind: input, shape index: {}]   ;;  %s4973_s20 = inlined_call_operand.vmem [shape: f32[1,128], index: 20, kind: input, shape index: {}]   ;;  %s4974_s21 = inlined_call_operand.vmem [shape: bf16[128,32], index: 21, kind: input, shape index: {}]   ;;  %s4975_s22 = inlined_call_operand.vmem [shape: f32[1,32], index: 22, kind: input, shape index: {}]   ;;  %s4976_s23 = inlined_call_operand.vmem [shape: f32[1,32], index: 23, kind: input, shape index: {}]   ;;  %s4977_s24 = inlined_call_operand.vmem [shape: f32[1,32], index: 24, kind: input, shape index: {}]   ;;  %s4978_s25 = inlined_call_operand.hbm [shape: f32[2,8,32], index: 25, kind: output, shape index: {}]  }
   0x1   :  { %4997 = sst [smem:[#allocation11_spill]] %s4953_s0 }
   0x2   :  { %4998 = sst [smem:[#allocation12_spill]] %s4954_s1 }
   0x3   :  { %4999 = sst [smem:[#allocation13_spill]] %s4955_s2 }
   0x4   :  { %5000 = sst [smem:[#allocation14_spill]] %s4956_s3 }
   0x5   :  { %5001 = sst [smem:[#allocation15_spill]] %s4957_s4 }
   0x6   :  { %5002 = sst [smem:[#allocation16_spill]] %s4958_s5 }
   0x7   :  { %5003 = sst [smem:[#allocation17_spill]] %s4959_s6 }
   0x8   :  { %5004 = sst [smem:[#allocation18_spill]] %s4960_s7 }
   0x9   :  { %5005 = sst [smem:[#allocation19_spill]] %s4961_s8 }
   0xa   :  { %5006 = sst [smem:[#allocation20_spill]] %s4962_s9 }
   0xb   :  { %5007 = sst [smem:[#allocation21_spill]] %s4963_s10 }
   0xc   :  { %5008 = sst [smem:[#allocation22_spill]] %s4964_s11 }
   0xd   :  { %5009 = sst [smem:[#allocation23_spill]] %s4965_s12 }
   0xe   :  { %5010 = sst [smem:[#allocation24_spill]] %s4978_s25 }
   0xf   :  { %30 = vsyncpa [#allocation3], 0 }
  0x10   :  { %32 = vsyncpa [#allocation3 + $0x1], 0  ;;  %s4331_s29 = smov 0   ;;  %s4333_s2 = smov 0  }
  0x11   :  { %s4335_s6 = smov 0   ;;  %s4337_s30 = smov 0  }
  0x12 LB: > { %5011 = sst [smem:[#allocation5_spill]] %s4183_s29  ;;  %s4352_s7 = sadd.s32 4294967295, %s4195_s30   ;;  %s4195_s30 = sphi %s4337_s30, %s5040_s30   ;;  %s4191_s6 = sphi %s4335_s6, %s5042_s6   ;;  %s4187_s2 = sphi %s4333_s2, %s5044_s2   ;;  %s4183_s29 = sphi %s4331_s29, %s5043_s29  }
  0x13   : > { %5012 = sst [smem:[#allocation6_spill]] %s4191_s6  ;;  %s3484_s3 = sadd.s32 4294967294, %s4195_s30  }
  0x14   : > { %5013 = sst [smem:[#allocation7_spill]] %s4195_s30  ;;  %s4356_s26 = sadd.s32 1, %s4195_s30  }
  0x15   : > { %5014 = sst [smem:[#allocation8_spill]] %s4356_s26  ;;  %s585_s1 = sadd.s32 1, %s4191_s6 }
  0x16   : > { %s582_s8 = ssub.s32 %s4195_s30, %s4356_s26  ;;  %p595_p0 = scmp.ne.s32.totalorder %s4191_s6, %s4187_s2 }
  0x17   : > { %p583_p1 = scmp.eq.s32.totalorder %s582_s8, 0  ;;  %p596_p2 = scmp.eq.s32.totalorder %s4352_s7, 1 }
  0x18   : > { %p601_p3 = scmp.ne.s32.totalorder %s4187_s2, %s4183_s29  ;;  %p602_p4 = scmp.eq.s32.totalorder %s3484_s3, 1 }
  0x19   : > { %s4367_s27 = scalar_select %p583_p1, %s4191_s6, %s585_s1  }
  0x1a   : > { %p4369_p5 = por %p596_p2, %p595_p0  ;;  %p4373_p6 = por %p602_p4, %p601_p3 }
  0x1b   : > { %5015 = sst [smem:[#allocation9_spill]] %s4367_s27  ;;  %p3487_p7 = scmp.ge.s32.totalorder %s4195_s30, 1 }
  0x1c   : > { %s5017_s28 = scalar_select %p4373_p6, 1, 0 }
  0x1d   : > { %p706_p8 = scmp.lt.s32.totalorder %s4195_s30, 3 }
  0x1e   : > { %5018 = sst [smem:[#allocation10_spill]] %s5017_s28 }
  0x1f   : > { %p707_p9 = pnand %p3487_p7, %p706_p8 }
  0x20   : > { %s5019_s0 = sld [smem:[#allocation14_spill]] (!%p707_p9)  ;;  %p780_p10 = scmp.lt.s32.totalorder (!%p707_p9), %s4352_s7, 1 }
  0x21   : > { %710 = sbr.rel (%p707_p9) target bundleno = 3711 (0xe7f), region = 120  ;;  %s5020_s5 = sld [smem:[#allocation11_spill]] (!%p707_p9) }
  0x22   : > { %s5021_s30 = sld [smem:[#allocation16_spill]] (!%p707_p9)  ;;  %s4991_s28 = smov (!%p707_p9), 120  }
  0x23   : > { %s5024_s9 = sld [smem:[#allocation15_spill]] (!%p707_p9) }
  0x24   : > { %s5025_s6 = sld [smem:[#allocation18_spill]] (!%p707_p9) }
  0x25   : > { %s5028_s11 = sld [smem:[#allocation22_spill]] (!%p707_p9) }
  0x26   : > { %v4055_v0 = vld [vmem:[%s5019_s0 + $0x8] sm:$0xff]   ;;  %v4197_v1 = vmov 0.0   ;;  %v4056_v2 = vld [vmem:[%s5019_s0 + $0x38] sm:$0xff]   ;;  %v4057_v3 = vld [vmem:[%s5019_s0] sm:$0xff]   ;;  %vm4198_vm0 = vmmov 0   ;;  %s4401_s3 = scalar_select %p780_p10, %s4352_s7, 1 }
  0x27   : > { %3713 = vmatprep.subr.bf16.mxu0 %v4197_v1  ;;  %3737 = vmatprep.subr.bf16.mxu1 %v4197_v1  ;;  %v4058_v4 = vld [vmem:[%s5019_s0 + $0x30] sm:$0xff]   ;;  %v4059_v5 = vld [vmem:[%s5019_s0 + $0x18] sm:$0xff]   ;;  %vm857_vm1 = vcmask 261120   ;;  %v4063_v11 = vld [vmem:[%s5019_s0 + $0x28] sm:$0xff]   ;;  %vm1317_vm2 = vcmask 64512   ;;  %vm1561_vm5 = vcmask 1043456  }
  0x28   : > { %3714 = vmatpush3.bf16.msra.mxu0 %v4055_v0  ;;  %3717 = vmatprep.mubr.msk.bf16.mxu0 %vm4198_vm0, %v4197_v1  ;;  %s4993_s27 = sshll.u32 %s4401_s3, 3  ;;  %s5022_s25 = smov %s5021_s30  ;;  %v4060_v6 = vld [vmem:[%s5021_s30 + $0x18] sm:$0xff]   ;;  %v4061_v9 = vld [vmem:[%s5019_s0 + $0x10] sm:$0xff]   ;;  %v4065_v13 = vld [vmem:[%s5019_s0 + $0x20] sm:$0xff]  }
  0x29   : > { %3738 = vmatpush3.bf16.msra.mxu1 %v4056_v2  ;;  %3715 = vmatprep.subr.bf16.mxu0 %v4197_v1  ;;  %s783_s26 = scalar_lea.vmem %s5020_s5, %s4993_s27  ;;  %v4062_v10 = vld [vmem:[%s5022_s25 + $0x10] sm:$0xff]   ;;  %v4064_v12 = vld [vmem:[%s5022_s25 + $0x38] sm:$0xff]   ;;  %v4067_v15 = vld [vmem:[%s5022_s25 + $0x8] sm:$0xff]   ;;  %s5029_s8 = sld [smem:[#allocation20_spill]] }
  0x2a   : > { %3739 = vmatprep.subr.bf16.mxu1 %v4197_v1  ;;  %3741 = vmatprep.mubr.msk.bf16.mxu1 %vm4198_vm0, %v4197_v1  ;;  %v4416_v7 = vld [vmem:[%s783_s26] sm:$0xff]  ;;  %v4066_v14 = vld [vmem:[%s5022_s25 + $0x30] sm:$0xff]   ;;  %v4069_v17 = vld [vmem:[%s5022_s25 + $0x28] sm:$0xff]   ;;  %s5023_s26 = sld [smem:[#allocation17_spill]]  ;;  %s5026_s1 = smov %s5025_s6 }
  0x2b   : > { %v800_v8 = vpack.c.bf16 %v4416_v7, %v4416_v7  ;;  %v4068_v16 = vld [vmem:[%s5022_s25] sm:$0xff]   ;;  %s5030_s10 = sld [smem:[#allocation21_spill]]  ;;  %s4200_s30 = smov [#allocation2]  }
  0x2c   : > { %3716 = vmatpush3.bf16.msra.mxu0 %v4057_v3  ;;  %v4070_v18 = vld [vmem:[%s5022_s25 + $0x20] sm:$0xff]   ;;  %s5033_s12 = sld [smem:[#allocation23_spill]] }
  0x2d   : > { %3740 = vmatpush3.bf16.msra.mxu1 %v4058_v4  ;;  %3721 = vmatprep.subr.bf16.mxu0 %v4197_v1  ;;  %v3492_v34 = vld [vmem:[%s5024_s9 + $0x1] ss:$0 sm:$0xff]  ;;  %v3494_v49 = vld [vmem:[%s5024_s9 + $0x3] ss:$0 sm:$0xff]  ;;  %v3491_v62 = vld [vmem:[%s5024_s9] ss:$0 sm:$0xff] }
  0x2e   : > { %3753 = vmatprep.subr.bf16.mxu1 %v4197_v1 }
  0x2f   : > { %3718 = vmatmul.mubr.msk.bf16.vlgmr.msra.gmra.mxu0 %vm857_vm1, %v800_v8 }
  0x30   : > { %3742 = vmatmul.mubr.msk.bf16.vlgmr.msra.gmra.mxu1 %vm857_vm1, %v800_v8  ;;  %3722 = vmatpush3.bf16.msra.mxu0 %v4059_v5  ;;  %v3508_v27 = vld [vmem:[%s5023_s26 + $0x1] ss:$0 sm:$0xff]  ;;  %v3510_v40 = vld [vmem:[%s5023_s26 + $0x3] ss:$0 sm:$0xff]  ;;  %v3507_v54 = vld [vmem:[%s5023_s26] ss:$0 sm:$0xff] }
  0x31   : > { %3754 = vmatpush3.bf16.msra.mxu1 %v4060_v6  ;;  %3723 = vmatprep.subr.bf16.mxu0 %v4197_v1  ;;  %v3509_v3 = vld [vmem:[%s5023_s26 + $0x2] ss:$0 sm:$0xff] }
  0x32   : > { %3755 = vmatprep.subr.bf16.mxu1 %v4197_v1  ;;  %3725 = vmatprep.mubr.msk.bf16.mxu0 %vm4198_vm0, %v4197_v1 }
  0x33   : > { %3757 = vmatprep.mubr.msk.bf16.mxu1 %vm4198_vm0, %v4197_v1 }
  0x34   : > { %3724 = vmatpush3.bf16.msra.mxu0 %v4061_v9 }
  0x35   : > { %3756 = vmatpush3.bf16.msra.mxu1 %v4062_v10  ;;  %3729 = vmatprep.subr.bf16.mxu0 %v4197_v1 }
  0x36   : > { %3769 = vmatprep.subr.bf16.mxu1 %v4197_v1 }
  0x37   : > { %3726 = vmatmul.mubr.msk.bf16.vlgmr.msra.gmra.mxu0 %vm857_vm1, %v800_v8 }
  0x38   : > { %3758 = vmatmul.mubr.msk.bf16.vlgmr.msra.gmra.mxu1 %vm857_vm1, %v800_v8  ;;  %3730 = vmatpush3.bf16.msra.mxu0 %v4063_v11  ;;  %v3493_v11 = vld [vmem:[%s5024_s9 + $0x2] ss:$0 sm:$0xff] }
  0x39   : > { %3770 = vmatpush3.bf16.msra.mxu1 %v4064_v12  ;;  %3731 = vmatprep.subr.bf16.mxu0 %v4197_v1 }
  0x3a   : > { %3771 = vmatprep.subr.bf16.mxu1 %v4197_v1  ;;  %3733 = vmatprep.mubr.msk.bf16.mxu0 %vm4198_vm0, %v4197_v1 }
  0x3b   : > { %3773 = vmatprep.mubr.msk.bf16.mxu1 %vm4198_vm0, %v4197_v1 }
  0x3c   : > { %3732 = vmatpush3.bf16.msra.mxu0 %v4065_v13 }
  0x3d   : > { %3772 = vmatpush3.bf16.msra.mxu1 %v4066_v14  ;;  %3745 = vmatprep.subr.bf16.mxu0 %v4197_v1 }
  0x3e   : > { %3783 = vmatprep.subr.bf16.mxu1 %v4197_v1 }
  0x3f   : > { %3734 = vmatmul.mubr.msk.bf16.vlgmr.msra.gmra.mxu0 %vm857_vm1, %v800_v8 }
  0x40   : > { %3774 = vmatmul.mubr.msk.bf16.vlgmr.msra.gmra.mxu1 %vm857_vm1, %v800_v8  ;;  %3746 = vmatpush3.bf16.msra.mxu0 %v4067_v15 }
  0x41   : > { %3749 = vmatprep.mubr.msk.bf16.mxu0 %vm4198_vm0, %v4197_v1  ;;  %3747 = vmatprep.subr.bf16.mxu0 %v4197_v1 }
  0x42   : > { %3785 = vmatprep.mubr.msk.bf16.mxu1 %vm4198_vm0, %v4197_v1 }
  0x44   : > { %3748 = vmatpush3.bf16.msra.mxu0 %v4068_v16 }
  0x45   : > { %3761 = vmatprep.subr.bf16.mxu0 %v4197_v1 }
  0x47   : > { %3750 = vmatmul.mubr.msk.bf16.vlgmr.msra.gmra.mxu0 %vm857_vm1, %v800_v8 }
  0x48   : > { %3762 = vmatpush3.bf16.msra.mxu0 %v4069_v17  ;;  %3765 = vmatprep.mubr.msk.bf16.mxu0 %vm4198_vm0, %v4197_v1 }
  0x49   : > { %3763 = vmatprep.subr.bf16.mxu0 %v4197_v1 }
  0x4c   : > { %3764 = vmatpush3.bf16.msra.mxu0 %v4070_v18  ;;  %v794_v18 = vlaneseq }
  0x4d   : > { %3777 = vmatprep.subr.bf16.mxu0 %v4197_v1 }
  0x4f   : > { %3766 = vmatmul.mubr.msk.bf16.vlgmr.msra.gmra.mxu0 %vm857_vm1, %v800_v8 }
  0x50   : > { %3779 = vmatprep.mubr.msk.bf16.mxu0 %vm4198_vm0, %v4197_v1 }
  0xef   : > { %v895_v19 = vpop.f32.mrf.mxu0 }
  0xf0   : > { %v1051_v20 = vpop.f32.mrf.mxu1  ;;  %v896_v4 = vadd.f32 %v3491_v62, %v895_v19 }
  0xf1   : > { %v3719_v21 = vpop.f32.mrf.mxu0  ;;  %v1052_v56 = vadd.f32 %v3494_v49, %v1051_v20 }
  0xf2   : > { %v3743_v22 = vpop.f32.mrf.mxu1  ;;  %v1309_v9 = vpack.c.bf16 %v896_v4, %v896_v4  ;;  %v795_v21 = vshrl.u32 %v794_v18, 7 }
  0xf3   : > { %v898_v23 = vpop.f32.mrf.mxu0  ;;  %v1312_v60 = vpack.c.bf16 %v1052_v56, %v1052_v56  ;;  %v797_v22 = vand.u32 127, %v794_v18 }
  0xf4   : > { %v1054_v24 = vpop.f32.mrf.mxu1 }
  0xf5   : > { %v3720_v25 = vpop.f32.mrf.mxu0  ;;  %vm798_vm3 = vcmp.gt.s32.totalorder %v797_v22, %v795_v21 }
  0xf6   : > { %v3744_v26 = vpop.f32.mrf.mxu1 }
  0xf7   : > { %v947_v28 = vpop.f32.mrf.mxu0 }
  0xf8   : > { %v1199_v29 = vpop.f32.mrf.mxu1  ;;  %v948_v41 = vadd.f32 %v3492_v34, %v947_v28 }
  0xf9   : > { %v1200_v30 = vadd.f32 %v3508_v27, %v1199_v29  ;;  %v3727_v31 = vpop.f32.mrf.mxu0  ;;  %v799_v27 = vsel %vm798_vm3, 1.0, %v4197_v1 }
  0xfa   : > { %v3759_v32 = vpop.f32.mrf.mxu1  ;;  %v1310_v47 = vpack.c.bf16 %v948_v41, %v948_v41  ;;  %vm1502_vm4 = vcmp.ne.f32.partialorder %v799_v27, 0.0  ;;  %v1756_v27 = vld [vmem:[%s5025_s6] sm:$0xf]  ;;  %s5027_s6 = sld [smem:[#allocation19_spill]] }
  0xfb   : > { %v4490_v33 = vpack.c.bf16 %v1200_v30, %v1200_v30  ;;  %v950_v35 = vpop.f32.mrf.mxu0 }
  0xfc   : > { %v1202_v36 = vpop.f32.mrf.mxu1 }
  0xfd   : > { %v1368_v37 = vsel %vm1317_vm2, %v4490_v33, 0  ;;  %v3728_v38 = vpop.f32.mrf.mxu0 }
  0xfe   : > { %v3760_v39 = vpop.f32.mrf.mxu1  ;;  %3784 = vmatpush3.bf16.xpose.msra.mxu1 %v1368_v37 }
  0xff   : > { %3795 = vmatprep.subr.bf16.mxu1 %v4197_v1  ;;  %v999_v42 = vpop.f32.mrf.mxu0 }
 0x100   : > { %v1303_v43 = vpop.f32.mrf.mxu1  ;;  %v1000_v15 = vadd.f32 %v3493_v11, %v999_v42 }
 0x101   : > { %v1304_v44 = vadd.f32 %v3510_v40, %v1303_v43  ;;  %v3735_v45 = vpop.f32.mrf.mxu0 }
 0x102   : > { %v3775_v46 = vpop.f32.mrf.mxu1  ;;  %v1311_v16 = vpack.c.bf16 %v1000_v15, %v1000_v15 }
 0x103   : > { %v4501_v48 = vpack.c.bf16 %v1304_v44, %v1304_v44  ;;  %v1002_v50 = vpop.f32.mrf.mxu0 }
 0x104   : > { %v1306_v51 = vpop.f32.mrf.mxu1 }
 0x105   : > { %v1460_v52 = vsel %vm1317_vm2, %v4501_v48, 0  ;;  %3786 = vmatmul.mubr.msk.bf16.vlgmr.msra.gmra.mxu1 %vm1317_vm2, %v1310_v47  ;;  %v3736_v53 = vpop.f32.mrf.mxu0 }
 0x106   : > { %3796 = vmatpush3.bf16.xpose.msra.mxu1 %v1460_v52  ;;  %3797 = vmatprep.mubr.msk.bf16.mxu1 %vm4198_vm0, %v4197_v1  ;;  %v3776_v55 = vpop.f32.mrf.mxu1 }
 0x107   : > { %3807 = vmatprep.subr.bf16.mxu1 %v4197_v1  ;;  %v1147_v57 = vpop.f32.mrf.mxu0 }
 0x108   : > { %v1148_v58 = vadd.f32 %v3507_v54, %v1147_v57 }
 0x109   : > { %v3751_v59 = vpop.f32.mrf.mxu0 }
 0x10a   : > { %v4515_v61 = vpack.c.bf16 %v1148_v58, %v1148_v58 }
 0x10b   : > { %v1150_v63 = vpop.f32.mrf.mxu0 }
 0x10c   : > { %v1322_v0 = vsel %vm1317_vm2, %v4515_v61, 0 }
 0x10d   : > { %3798 = vmatmul.mubr.msk.bf16.vlgmr.msra.gmra.mxu1 %vm1317_vm2, %v1312_v60  ;;  %v3752_v2 = vpop.f32.mrf.mxu0  ;;  %3778 = vmatpush3.bf16.xpose.msra.mxu0 %v1322_v0 }
 0x10e   : > { %3809 = vmatprep.mubr.msk.bf16.mxu1 %vm4198_vm0, %v4197_v1  ;;  %3789 = vmatprep.subr.bf16.mxu0 %v4197_v1 }
 0x10f   : > { %v1251_v5 = vpop.f32.mrf.mxu0 }
 0x110   : > { %v1252_v6 = vadd.f32 %v3509_v3, %v1251_v5 }
 0x111   : > { %v3767_v8 = vpop.f32.mrf.mxu0 }
 0x112   : > { %v4529_v10 = vpack.c.bf16 %v1252_v6, %v1252_v6 }
 0x113   : > { %v1254_v12 = vpop.f32.mrf.mxu0 }
 0x114   : > { %v1414_v13 = vsel %vm1317_vm2, %v4529_v10, 0  ;;  %3780 = vmatmul.mubr.msk.bf16.vlgmr.msra.gmra.mxu0 %vm1317_vm2, %v1309_v9 }
 0x115   : > { %v3768_v14 = vpop.f32.mrf.mxu0  ;;  %3790 = vmatpush3.bf16.xpose.msra.mxu0 %v1414_v13  ;;  %3791 = vmatprep.mubr.msk.bf16.mxu0 %vm4198_vm0, %v4197_v1 }
 0x116   : > { %3801 = vmatprep.subr.bf16.mxu0 %v4197_v1 }
 0x11c   : > { %3792 = vmatmul.mubr.msk.bf16.vlgmr.msra.gmra.mxu0 %vm1317_vm2, %v1311_v16 }
 0x11d   : > { %3803 = vmatprep.mubr.msk.bf16.mxu0 %vm4198_vm0, %v4197_v1 }
 0x1c5   : > { %v1404_v17 = vpop.f32.mrf.mxu1 }
 0x1c6   : > { %v1504_v34 = vsel %vm1502_vm4, -1e+09, %v1404_v17 }
 0x1c7   : > { %v3787_v19 = vpop.f32.mrf.mxu1  ;;  %v1510_v37 = vsel %vm1317_vm2, %v1504_v34, -inf }
 0x1c9   : > { %v1407_v20 = vpop.f32.mrf.mxu1 }
 0x1cb   : > { %v3788_v23 = vpop.f32.mrf.mxu1 }
 0x1cd   : > { %v1496_v24 = vpop.f32.mrf.mxu1 }
 0x1ce   : > { %v1506_v42 = vsel %vm1502_vm4, -1e+09, %v1496_v24 }
 0x1cf   : > { %v3799_v25 = vpop.f32.mrf.mxu1  ;;  %v1516_v45 = vsel %vm1317_vm2, %v1506_v42, -inf }
 0x1d1   : > { %v1499_v26 = vpop.f32.mrf.mxu1 }
 0x1d3   : > { %v3800_v28 = vpop.f32.mrf.mxu1 }
 0x1d4   : > { %v1358_v29 = vpop.f32.mrf.mxu0  ;;  %v1764_v28 = vsel %vm1561_vm5, %v1756_v27, 0 }
 0x1d5   : > { %v1503_v30 = vsel %vm1502_vm4, -1e+09, %v1358_v29  ;;  %v1757_v29 = vld [vmem:[%s5026_s1 + $0x4] sm:$0xf] }
 0x1d6   : > { %v3781_v31 = vpop.f32.mrf.mxu0  ;;  %v1507_v32 = vsel %vm1317_vm2, %v1503_v30, -inf }
 0x1d7   : > { %1508 = vmax.xlane.f32.xlu0 %v1507_v32  ;;  %v1758_v31 = vld [vmem:[%s5026_s1 + $0x8] sm:$0xf] }
 0x1d8   : > { %v1361_v35 = vpop.f32.mrf.mxu0 }
 0x1d9   : > { %v1856_v35 = vsel %vm1561_vm5, %v1758_v31, 0 }
 0x1da   : > { %v3782_v36 = vpop.f32.mrf.mxu0 }
 0x1db   : > { %1511 = vmax.xlane.f32.xlu0 %v1510_v37  ;;  %v1759_v37 = vld [vmem:[%s5026_s1 + $0xc] sm:$0xf]  ;;  %s3602_s1 = sshll.u32 %s4352_s7, 7 }
 0x1dc   : > { %v1450_v38 = vpop.f32.mrf.mxu0 }
 0x1dd   : > { %v1505_v39 = vsel %vm1502_vm4, -1e+09, %v1450_v38 }
 0x1de   : > { %v3793_v40 = vpop.f32.mrf.mxu0  ;;  %v1513_v41 = vsel %vm1317_vm2, %v1505_v39, -inf }
 0x1df   : > { %1514 = vmax.xlane.f32.xlu1 %v1513_v41  ;;  %v1902_v41 = vsel %vm1561_vm5, %v1759_v37, 0  ;;  %v4077_v37 = vld [vmem:[%s5028_s11 + $0x20] sm:$0xff]  }
 0x1e0   : > { %v1453_v43 = vpop.f32.mrf.mxu0 }
 0x1e2   : > { %v3794_v44 = vpop.f32.mrf.mxu0 }
 0x1e3   : > { %1517 = vmax.xlane.f32.xlu1 %v1516_v45 }
 0x260   : > { %v1509_v46 = vpop.xlane.xlu0 %1508 }
 0x261   : > { %v1519_v47 = vsub.f32 %v1503_v30, %v1509_v46  ;;  %v1810_v30 = vsel %vm1561_vm5, %v1757_v29, 0 }
 0x263   : > { %v1523_v49 = vmul.f32 1.442695, %v1519_v47 }
 0x264   : > { %v1512_v50 = vpop.xlane.xlu0 %1511 }
 0x265   : > { %4097 = vpow2.f32 %v1523_v49  ;;  %v1520_v51 = vsub.f32 %v1504_v34, %v1512_v50 }
 0x267   : > { %v1525_v52 = vmul.f32 1.442695, %v1520_v51 }
 0x268   : > { %v1515_v53 = vpop.xlane.xlu1 %1514 }
 0x269   : > { %4099 = vpow2.f32 %v1525_v52  ;;  %v1521_v54 = vsub.f32 %v1505_v39, %v1515_v53 }
 0x26b   : > { %v1527_v55 = vmul.f32 1.442695, %v1521_v54 }
 0x26c   : > { %v1518_v56 = vpop.xlane.xlu1 %1517 }
 0x26d   : > { %4101 = vpow2.f32 %v1527_v55  ;;  %v1522_v57 = vsub.f32 %v1506_v42, %v1518_v56 }
 0x26f   : > { %v1529_v58 = vmul.f32 1.442695, %v1522_v57 }
 0x271   : > { %4103 = vpow2.f32 %v1529_v58 }
 0x272   : > { %v4098_v59 = vpop.eup %4097 }
 0x273   : > { %v1531_v60 = vsel %vm1317_vm2, %v4098_v59, 0.0 }
 0x274   : > { %1532 = vadd.xlane.f32.xlu0 %v1531_v60 }
 0x276   : > { %v4100_v62 = vpop.eup %4099 }
 0x277   : > { %v1534_v63 = vsel %vm1317_vm2, %v4100_v62, 0.0 }
 0x278   : > { %1535 = vadd.xlane.f32.xlu1 %v1534_v63 }
 0x27a   : > { %v4102_v0 = vpop.eup %4101 }
 0x27b   : > { %v1537_v2 = vsel %vm1317_vm2, %v4102_v0, 0.0 }
 0x27c   : > { %1538 = vadd.xlane.f32.xlu0 %v1537_v2 }
 0x27e   : > { %v4104_v3 = vpop.eup %4103 }
 0x27f   : > { %v1540_v4 = vsel %vm1317_vm2, %v4104_v3, 0.0 }
 0x280   : > { %1541 = vadd.xlane.f32.xlu1 %v1540_v4 }
 0x291   : > { %1606 = vrot.lane.b32.xlu1 %v4490_v33, %s4991_s28 }
 0x292   : > { %1556 = vrot.lane.b32.xlu0 %v4515_v61, %s4991_s28 }
 0x295   : > { %1655 = vrot.lane.b32.xlu1 %v4529_v10, %s4991_s28 }
 0x299   : > { %1704 = vrot.lane.b32.xlu1 %v4501_v48, %s4991_s28  ;;  %s5034_s28 = sld [smem:[#allocation13_spill]] }
 0x2fd   : > { %v1533_v5 = vpop.xlane.xlu0 %1532 }
 0x2fe   : > { %4105 = vrcp.f32 %v1533_v5 }
 0x301   : > { %v1536_v6 = vpop.xlane.xlu1 %1535 }
 0x302   : > { %4107 = vrcp.f32 %v1536_v6 }
 0x305   : > { %v1539_v8 = vpop.xlane.xlu0 %1538 }
 0x306   : > { %4109 = vrcp.f32 %v1539_v8 }
 0x309   : > { %v1557_v9 = vpop.permute.xlu0 %1556  ;;  %v1542_v11 = vpop.xlane.xlu1 %1541 }
 0x30a   : > { %v1563_v33 = vsel %vm1561_vm5, %v1557_v9, 0  ;;  %4111 = vrcp.f32 %v1542_v11  ;;  %v3535_v11 = vld [vmem:[%s5027_s6] ss:$0 sm:$0xff]  ;;  %s5031_s6 = sshll.u32 %s4401_s3, 3 }
 0x30b   : > { %v4106_v12 = vpop.eup %4105  ;;  %3802 = vmatpush3.bf16.msra.mxu0 %v1563_v33 }
 0x30c   : > { %v1547_v61 = vmul.f32 %v4106_v12, %v4098_v59  ;;  %3813 = vmatprep.subr.bf16.mxu0 %v4197_v1 }
 0x30d   : > { %v1607_v10 = vpop.permute.xlu1 %1606 }
 0x30e   : > { %v1612_v48 = vsel %vm1561_vm5, %v1607_v10, 0  ;;  %v1551_v13 = vpack.c.bf16 %v1547_v61, %v1547_v61 }
 0x30f   : > { %v4108_v14 = vpop.eup %4107  ;;  %3808 = vmatpush3.bf16.msra.mxu1 %v1612_v48 }
 0x310   : > { %3804 = vmatmul.mubr.msk.bf16.vlgmr.msra.gmra.mxu0 %vm1317_vm2, %v1551_v13  ;;  %v1548_v15 = vmul.f32 %v4108_v14, %v4100_v62  ;;  %3819 = vmatprep.subr.bf16.mxu1 %v4197_v1 }
 0x311   : > { %v1656_v16 = vpop.permute.xlu1 %1655  ;;  %3815 = vmatprep.mubr.msk.bf16.mxu0 %vm4198_vm0, %v4197_v1 }
 0x312   : > { %v1661_v17 = vsel %vm1561_vm5, %v1656_v16, 0  ;;  %v1552_v18 = vpack.c.bf16 %v1548_v15, %v1548_v15 }
 0x313   : > { %v4110_v19 = vpop.eup %4109  ;;  %3814 = vmatpush3.bf16.msra.mxu0 %v1661_v17 }
 0x314   : > { %3810 = vmatmul.mubr.msk.bf16.vlgmr.msra.gmra.mxu1 %vm1317_vm2, %v1552_v18  ;;  %v1549_v20 = vmul.f32 %v4110_v19, %v4102_v0  ;;  %3825 = vmatprep.subr.bf16.mxu0 %v4197_v1 }
 0x315   : > { %v1705_v21 = vpop.permute.xlu1 %1704  ;;  %3821 = vmatprep.mubr.msk.bf16.mxu1 %vm4198_vm0, %v4197_v1 }
 0x316   : > { %v1710_v22 = vsel %vm1561_vm5, %v1705_v21, 0  ;;  %v1553_v23 = vpack.c.bf16 %v1549_v20, %v1549_v20  ;;  %v4071_v21 = vld [vmem:[%s5028_s11 + $0x8] sm:$0xff]  }
 0x317   : > { %v4112_v24 = vpop.eup %4111  ;;  %3820 = vmatpush3.bf16.msra.mxu1 %v1710_v22  ;;  %v4072_v22 = vld [vmem:[%s5028_s11 + $0x18] sm:$0xff]  }
 0x318   : > { %3816 = vmatmul.mubr.msk.bf16.vlgmr.msra.gmra.mxu0 %vm1317_vm2, %v1553_v23  ;;  %v1550_v25 = vmul.f32 %v4112_v24, %v4104_v3  ;;  %3831 = vmatprep.subr.bf16.mxu1 %v4197_v1  ;;  %v4074_v23 = vld [vmem:[%s5028_s11 + $0x10] sm:$0xff]  }
 0x319   : > { %3827 = vmatprep.mubr.msk.bf16.mxu0 %vm4198_vm0, %v4197_v1  ;;  %3826 = vmatpush3.bf16.msra.mxu0 %v1764_v28  ;;  %v3536_v28 = vld [vmem:[%s5029_s8] ss:$0 sm:$0xff]  ;;  %s5032_s8 = sld [smem:[#allocation12_spill]] }
 0x31a   : > { %v1554_v26 = vpack.c.bf16 %v1550_v25, %v1550_v25  ;;  %3837 = vmatprep.subr.bf16.mxu0 %v4197_v1 }
 0x31c   : > { %3822 = vmatmul.mubr.msk.bf16.vlgmr.msra.gmra.mxu1 %vm1317_vm2, %v1554_v26 }
 0x31d   : > { %3833 = vmatprep.mubr.msk.bf16.mxu1 %vm4198_vm0, %v4197_v1  ;;  %3832 = vmatpush3.bf16.msra.mxu1 %v1810_v30  ;;  %v3537_v30 = vld [vmem:[%s5030_s10] ss:$0 sm:$0xff]  ;;  %s5036_s10 = sld [smem:[#allocation24_spill]] }
 0x31e   : > { %3843 = vmatprep.subr.bf16.mxu1 %v4197_v1 }
 0x31f   : > { %s787_s0 = scalar_lea.vmem %s5032_s8, %s5031_s6  ;;  %s790_s6 = scalar_lea.vmem %s5034_s28, %s4401_s3 }
 0x320   : > { %s5035_s3 = smov 120   ;;  %s4139_s8 = sshll.u32 %s4200_s30, 4  ;;  %s4140_s8 = int_to_ptr.vmem [resolvable:$false] %s4139_s8 }
 0x321   : > { %s4141_s7 = scalar_lea.vmem %s4140_s8, 256 }
 0x3d0   : > { %v1599_v32 = vpop.f32.mrf.mxu0 }
 0x3d1   : > { %v1752_v34 = vpack.c.bf16 %v1599_v32, %v1599_v32 }
 0x3d2   : > { %v3805_v36 = vpop.f32.mrf.mxu0 }
 0x3d3   : > { %3828 = vmatmul.mubr.msk.bf16.vlgmr.msra.gmra.mxu0 %vm1317_vm2, %v1752_v34  ;;  %v4075_v34 = vld [vmem:[%s5028_s11 + $0x28] sm:$0xff]  }
 0x3d4   : > { %v1602_v38 = vpop.f32.mrf.mxu0  ;;  %v1648_v39 = vpop.f32.mrf.mxu1  ;;  %3838 = vmatpush3.bf16.msra.mxu0 %v1856_v35  ;;  %3839 = vmatprep.mubr.msk.bf16.mxu0 %vm4198_vm0, %v4197_v1  ;;  %v4076_v35 = vld [vmem:[%s5028_s11 + $0x38] sm:$0xff]  }
 0x3d5   : > { %v1753_v40 = vpack.c.bf16 %v1648_v39, %v1648_v39  ;;  %3849 = vmatprep.subr.bf16.mxu0 %v4197_v1  ;;  %v4078_v38 = vld [vmem:[%s5028_s11 + $0x30] sm:$0xff]   ;;  %v4079_v39 = vld [vmem:[%s4966_s13 + $0x8] sm:$0xff]  }
 0x3d6   : > { %v3806_v42 = vpop.f32.mrf.mxu0  ;;  %v3811_v43 = vpop.f32.mrf.mxu1 }
 0x3d7   : > { %3834 = vmatmul.mubr.msk.bf16.vlgmr.msra.gmra.mxu1 %vm1317_vm2, %v1753_v40  ;;  %v4080_v40 = vld [vmem:[%s4966_s13 + $0x18] sm:$0xff]   ;;  %v4082_v42 = vld [vmem:[%s4966_s13 + $0x10] sm:$0xff]   ;;  %v793_v43 = vld [vmem:[%s787_s0] sm:$0xff] }
 0x3d8   : > { %v1651_v44 = vpop.f32.mrf.mxu1  ;;  %v1697_v45 = vpop.f32.mrf.mxu0  ;;  %3844 = vmatpush3.bf16.msra.mxu1 %v1902_v41  ;;  %3845 = vmatprep.mubr.msk.bf16.mxu1 %vm4198_vm0, %v4197_v1  ;;  %v4081_v41 = vld [vmem:[%s4966_s13] sm:$0xff]  }
 0x3d9   : > { %v1754_v46 = vpack.c.bf16 %v1697_v45, %v1697_v45  ;;  %3857 = vmatprep.subr.bf16.mxu1 %v4197_v1  ;;  %v1988_v44 = vpack.c.bf16 %v793_v43, %v793_v43  ;;  %v4083_v45 = vld [vmem:[%s4966_s13 + $0x28] sm:$0xff]  }
 0x3da   : > { %v3812_v47 = vpop.f32.mrf.mxu1  ;;  %v3817_v49 = vpop.f32.mrf.mxu0 }
 0x3db   : > { %3840 = vmatmul.mubr.msk.bf16.vlgmr.msra.gmra.mxu0 %vm1317_vm2, %v1754_v46  ;;  %v4084_v46 = vld [vmem:[%s4966_s13 + $0x38] sm:$0xff]   ;;  %v4085_v47 = vld [vmem:[%s4966_s13 + $0x20] sm:$0xff]   ;;  %v4086_v49 = vld [vmem:[%s4966_s13 + $0x30] sm:$0xff]  }
 0x3dc   : > { %v1700_v50 = vpop.f32.mrf.mxu0  ;;  %v1746_v51 = vpop.f32.mrf.mxu1  ;;  %3853 = vmatprep.mubr.msk.bf16.mxu0 %vm4198_vm0, %v4197_v1  ;;  %3850 = vmatpush3.bf16.msra.mxu0 %v4071_v21  ;;  %v3557_v21 = vld [vmem:[%s4967_s14 + $0x3] ss:$0 sm:$0xff] }
 0x3dd   : > { %v1755_v52 = vpack.c.bf16 %v1746_v51, %v1746_v51  ;;  %3851 = vmatprep.subr.bf16.mxu0 %v4197_v1 }
 0x3de   : > { %v3818_v53 = vpop.f32.mrf.mxu0  ;;  %v3823_v54 = vpop.f32.mrf.mxu1 }
 0x3df   : > { %3846 = vmatmul.mubr.msk.bf16.vlgmr.msra.gmra.mxu1 %vm1317_vm2, %v1755_v52 }
 0x3e0   : > { %v1749_v55 = vpop.f32.mrf.mxu1  ;;  %3861 = vmatprep.mubr.msk.bf16.mxu1 %vm4198_vm0, %v4197_v1  ;;  %3858 = vmatpush3.bf16.msra.mxu1 %v4072_v22 }
 0x3e1   : > { %3859 = vmatprep.subr.bf16.mxu1 %v4197_v1 }
 0x3e2   : > { %v3824_v56 = vpop.f32.mrf.mxu1 }
 0x3e4   : > { %3860 = vmatpush3.bf16.msra.mxu1 %v4074_v23 }
 0x3e5   : > { %3873 = vmatprep.subr.bf16.mxu1 %v4197_v1 }
 0x493   : > { %v1800_v57 = vpop.f32.mrf.mxu0 }
 0x495   : > { %v3829_v58 = vpop.f32.mrf.mxu0 }
 0x497   : > { %v1803_v59 = vpop.f32.mrf.mxu0  ;;  %v1846_v60 = vpop.f32.mrf.mxu1 }
 0x498   : > { %v1944_v3 = vadd.f32 %v1846_v60, %v1800_v57 }
 0x499   : > { %v3830_v62 = vpop.f32.mrf.mxu0  ;;  %v3835_v63 = vpop.f32.mrf.mxu1 }
 0x49b   : > { %v1849_v0 = vpop.f32.mrf.mxu1  ;;  %v1892_v2 = vpop.f32.mrf.mxu0 }
 0x49c   : > { %v1945_v6 = vadd.f32 %v1944_v3, %v1892_v2 }
 0x49d   : > { %v3836_v4 = vpop.f32.mrf.mxu1  ;;  %v3841_v5 = vpop.f32.mrf.mxu0 }
 0x49e   : > { %v3554_v4 = vld [vmem:[%s4967_s14] ss:$0 sm:$0xff]  ;;  %v3555_v5 = vld [vmem:[%s4967_s14 + $0x1] ss:$0 sm:$0xff] }
 0x49f   : > { %v1895_v8 = vpop.f32.mrf.mxu0  ;;  %v1938_v9 = vpop.f32.mrf.mxu1 }
 0x4a0   : > { %v1946_v33 = vadd.f32 %v1945_v6, %v1938_v9 }
 0x4a1   : > { %v3842_v12 = vpop.f32.mrf.mxu0  ;;  %v3847_v61 = vpop.f32.mrf.mxu1 }
 0x4a2   : > { %v1954_v10 = vadd.f32 %v3535_v11, %v1946_v33 }
 0x4a3   : > { %v1941_v48 = vpop.f32.mrf.mxu1 }
 0x4a4   : > { %v1955_v13 = vadd.f32 %v1954_v10, %v4416_v7  ;;  %v4073_v7 = vld [vmem:[%s5028_s11] sm:$0xff]   ;;  %s3402_s11 = scalar_lea.hbm %s5036_s10, %s3602_s1 }
 0x4a5   : > { %v3848_v14 = vpop.f32.mrf.mxu1  ;;  %3852 = vmatpush3.bf16.msra.mxu0 %v4073_v7  ;;  %v3538_v48 = vld [vmem:[%s5033_s12] ss:$0 sm:$0xff] }
 0x4a6   : > { %v1956_v15 = vsel %vm857_vm1, %v1955_v13, 0.0  ;;  %3865 = vmatprep.subr.bf16.mxu0 %v4197_v1 }
 0x4a7   : > { %1957 = vadd.xlane.f32.xlu0 %v1956_v15 }
 0x530   : > { %v1958_v16 = vpop.xlane.xlu0 %1957 }
 0x531   : > { %v1960_v17 = vmul.f32 0.03125, %v1958_v16 }
 0x533   : > { %v1961_v18 = vsub.f32 %v1955_v13, %v1960_v17  ;;  %v3539_v13 = vld [vmem:[%s5033_s12 + $0x1] ss:$0 sm:$0xff] }
 0x535   : > { %v1962_v19 = vmul.f32 %v1961_v18, %v1961_v18 }
 0x537   : > { %v1963_v20 = vsel %vm857_vm1, %v1962_v19, 0.0 }
 0x538   : > { %1964 = vadd.xlane.f32.xlu1 %v1963_v20  ;;  %v3556_v20 = vld [vmem:[%s4967_s14 + $0x2] ss:$0 sm:$0xff] }
 0x5c1   : > { %v1965_v24 = vpop.xlane.xlu1 %1964 }
 0x5c2   : > { %v1966_v25 = vmul.f32 0.03125, %v1965_v24 }
 0x5c4   : > { %v1967_v26 = vadd.f32 1e-05, %v1966_v25 }
 0x5c6   : > { %4113 = vrsqrt.f32 %v1967_v26 }
 0x5d3   : > { %v4114_v27 = vpop.eup %4113 }
 0x5d4   : > { %v1969_v29 = vmul.f32 %v4114_v27, %v1961_v18 }
 0x5d6   : > { %v1977_v31 = vmul.f32 %v3536_v28, %v1969_v29 }
 0x5d8   : > { %v4640_v32 = vadd.f32 %v3537_v30, %v1977_v31 }
 0x5da   : > { %v1987_v36 = vpack.c.bf16 %v4640_v32, %v4640_v32 }
 0x5dc   : > { %3854 = vmatmul.mubr.msk.bf16.vlgmr.msra.gmra.mxu0 %vm857_vm1, %v1987_v36  ;;  %3862 = vmatmul.mubr.msk.bf16.vlgmr.msra.gmra.mxu1 %vm857_vm1, %v1987_v36 }
 0x5dd   : > { %3866 = vmatpush3.bf16.msra.mxu0 %v4075_v34  ;;  %3874 = vmatpush3.bf16.msra.mxu1 %v4076_v35  ;;  %v3540_v35 = vld [vmem:[%s5033_s12 + $0x2] ss:$0 sm:$0xff] }
 0x5de   : > { %3867 = vmatprep.subr.bf16.mxu0 %v4197_v1  ;;  %3875 = vmatprep.subr.bf16.mxu1 %v4197_v1 }
 0x5df   : > { %3869 = vmatprep.mubr.msk.bf16.mxu0 %vm4198_vm0, %v4197_v1  ;;  %3877 = vmatprep.mubr.msk.bf16.mxu1 %vm4198_vm0, %v4197_v1 }
 0x5e1   : > { %3868 = vmatpush3.bf16.msra.mxu0 %v4077_v37  ;;  %3876 = vmatpush3.bf16.msra.mxu1 %v4078_v38 }
 0x5e2   : > { %3881 = vmatprep.subr.bf16.mxu0 %v4197_v1  ;;  %3889 = vmatprep.subr.bf16.mxu1 %v4197_v1 }
 0x5e4   : > { %3870 = vmatmul.mubr.msk.bf16.vlgmr.msra.gmra.mxu0 %vm857_vm1, %v1987_v36  ;;  %3878 = vmatmul.mubr.msk.bf16.vlgmr.msra.gmra.mxu1 %vm857_vm1, %v1987_v36  ;;  %v3541_v36 = vld [vmem:[%s5033_s12 + $0x3] ss:$0 sm:$0xff] }
 0x5e5   : > { %3882 = vmatpush3.bf16.msra.mxu0 %v4079_v39  ;;  %3890 = vmatpush3.bf16.msra.mxu1 %v4080_v40 }
 0x5e6   : > { %3883 = vmatprep.subr.bf16.mxu0 %v4197_v1  ;;  %3891 = vmatprep.subr.bf16.mxu1 %v4197_v1 }
 0x5e7   : > { %3885 = vmatprep.mubr.msk.bf16.mxu0 %vm4198_vm0, %v4197_v1  ;;  %3893 = vmatprep.mubr.msk.bf16.mxu1 %vm4198_vm0, %v4197_v1 }
 0x5e9   : > { %3884 = vmatpush3.bf16.msra.mxu0 %v4081_v41  ;;  %3892 = vmatpush3.bf16.msra.mxu1 %v4082_v42 }
 0x5ea   : > { %3897 = vmatprep.subr.bf16.mxu0 %v4197_v1  ;;  %3905 = vmatprep.subr.bf16.mxu1 %v4197_v1 }
 0x5ec   : > { %3886 = vmatmul.mubr.msk.bf16.vlgmr.msra.gmra.mxu0 %vm857_vm1, %v1988_v44  ;;  %3894 = vmatmul.mubr.msk.bf16.vlgmr.msra.gmra.mxu1 %vm857_vm1, %v1988_v44 }
 0x5ed   : > { %3898 = vmatpush3.bf16.msra.mxu0 %v4083_v45  ;;  %3906 = vmatpush3.bf16.msra.mxu1 %v4084_v46 }
 0x5ee   : > { %3899 = vmatprep.subr.bf16.mxu0 %v4197_v1  ;;  %3907 = vmatprep.subr.bf16.mxu1 %v4197_v1 }
 0x5ef   : > { %3901 = vmatprep.mubr.msk.bf16.mxu0 %vm4198_vm0, %v4197_v1  ;;  %3909 = vmatprep.mubr.msk.bf16.mxu1 %vm4198_vm0, %v4197_v1 }
 0x5f1   : > { %3900 = vmatpush3.bf16.msra.mxu0 %v4085_v47  ;;  %3908 = vmatpush3.bf16.msra.mxu1 %v4086_v49  ;;  %v3574_v47 = vld [vmem:[%s790_s6] ss:$0 sm:$0xff]  ;;  %s777_s6 = sand.u32 1, %s4187_s2  }
 0x5f2   : > { %3913 = vmatprep.subr.bf16.mxu0 %v4197_v1  ;;  %3919 = vmatprep.subr.bf16.mxu1 %v4197_v1  ;;  %vm2697_vm6 = vcmp.ne.f32.partialorder %v3574_v47, 0.0  ;;  %s3391_s12 = scalar_lea.sflag [#allocation3], %s777_s6 }
 0x5f4   : > { %3902 = vmatmul.mubr.msk.bf16.vlgmr.msra.gmra.mxu0 %vm857_vm1, %v1988_v44  ;;  %3910 = vmatmul.mubr.msk.bf16.vlgmr.msra.gmra.mxu1 %vm857_vm1, %v1988_v44 }
 0x5f5   : > { %3915 = vmatprep.mubr.msk.bf16.mxu0 %vm4198_vm0, %v4197_v1  ;;  %3921 = vmatprep.mubr.msk.bf16.mxu1 %vm4198_vm0, %v4197_v1 }
 0x69c   : > { %v2082_v50 = vpop.f32.mrf.mxu0  ;;  %v2134_v51 = vpop.f32.mrf.mxu1 }
 0x69d   : > { %v2083_v22 = vadd.f32 %v3538_v48, %v2082_v50  ;;  %v2135_v7 = vadd.f32 %v3539_v13, %v2134_v51 }
 0x69e   : > { %v3855_v52 = vpop.f32.mrf.mxu0  ;;  %v3863_v53 = vpop.f32.mrf.mxu1 }
 0x69f   : > { %v2499_v29 = vpack.c.bf16 %v2083_v22, %v2083_v22  ;;  %v2500_v30 = vpack.c.bf16 %v2135_v7, %v2135_v7 }
 0x6a0   : > { %v2085_v54 = vpop.f32.mrf.mxu0  ;;  %v2137_v55 = vpop.f32.mrf.mxu1 }
 0x6a2   : > { %v3856_v56 = vpop.f32.mrf.mxu0  ;;  %v3864_v57 = vpop.f32.mrf.mxu1 }
 0x6a4   : > { %v2186_v58 = vpop.f32.mrf.mxu0  ;;  %v2238_v59 = vpop.f32.mrf.mxu1 }
 0x6a5   : > { %v2187_v43 = vadd.f32 %v3540_v35, %v2186_v58  ;;  %v2239_v44 = vadd.f32 %v3541_v36, %v2238_v59 }
 0x6a6   : > { %v3871_v60 = vpop.f32.mrf.mxu0  ;;  %v3879_v62 = vpop.f32.mrf.mxu1 }
 0x6a7   : > { %v2501_v45 = vpack.c.bf16 %v2187_v43, %v2187_v43  ;;  %v2502_v46 = vpack.c.bf16 %v2239_v44, %v2239_v44 }
 0x6a8   : > { %v2189_v63 = vpop.f32.mrf.mxu0  ;;  %v2241_v0 = vpop.f32.mrf.mxu1 }
 0x6aa   : > { %v3872_v2 = vpop.f32.mrf.mxu0  ;;  %v3880_v3 = vpop.f32.mrf.mxu1 }
 0x6ac   : > { %v2337_v6 = vpop.f32.mrf.mxu0  ;;  %v2389_v8 = vpop.f32.mrf.mxu1 }
 0x6ad   : > { %v2338_v9 = vadd.f32 %v3554_v4, %v2337_v6  ;;  %v2390_v11 = vadd.f32 %v3555_v5, %v2389_v8 }
 0x6ae   : > { %v3887_v33 = vpop.f32.mrf.mxu0  ;;  %v3895_v12 = vpop.f32.mrf.mxu1 }
 0x6af   : > { %v4727_v61 = vpack.c.bf16 %v2338_v9, %v2338_v9  ;;  %v4729_v10 = vpack.c.bf16 %v2390_v11, %v2390_v11 }
 0x6b0   : > { %v2340_v14 = vpop.f32.mrf.mxu0  ;;  %v2392_v15 = vpop.f32.mrf.mxu1 }
 0x6b1   : > { %v2511_v16 = vsel %vm1317_vm2, %v4727_v61, 0  ;;  %v2557_v17 = vsel %vm1317_vm2, %v4729_v10, 0 }
 0x6b2   : > { %v3888_v18 = vpop.f32.mrf.mxu0  ;;  %v3896_v19 = vpop.f32.mrf.mxu1  ;;  %3914 = vmatpush3.bf16.xpose.msra.mxu0 %v2511_v16  ;;  %3920 = vmatpush3.bf16.xpose.msra.mxu1 %v2557_v17 }
 0x6b3   : > { %3925 = vmatprep.subr.bf16.mxu0 %v4197_v1  ;;  %3931 = vmatprep.subr.bf16.mxu1 %v4197_v1 }
 0x6b4   : > { %v2441_v23 = vpop.f32.mrf.mxu0  ;;  %v2493_v24 = vpop.f32.mrf.mxu1 }
 0x6b5   : > { %v2442_v25 = vadd.f32 %v3556_v20, %v2441_v23  ;;  %v2494_v26 = vadd.f32 %v3557_v21, %v2493_v24 }
 0x6b6   : > { %v3903_v27 = vpop.f32.mrf.mxu0  ;;  %v3911_v28 = vpop.f32.mrf.mxu1 }
 0x6b7   : > { %v4749_v31 = vpack.c.bf16 %v2442_v25, %v2442_v25  ;;  %v4751_v34 = vpack.c.bf16 %v2494_v26, %v2494_v26 }
 0x6b8   : > { %v2444_v37 = vpop.f32.mrf.mxu0  ;;  %v2496_v38 = vpop.f32.mrf.mxu1 }
 0x6b9   : > { %v2603_v39 = vsel %vm1317_vm2, %v4749_v31, 0  ;;  %v2649_v40 = vsel %vm1317_vm2, %v4751_v34, 0  ;;  %3916 = vmatmul.mubr.msk.bf16.vlgmr.msra.gmra.mxu0 %vm1317_vm2, %v2499_v29  ;;  %3922 = vmatmul.mubr.msk.bf16.vlgmr.msra.gmra.mxu1 %vm1317_vm2, %v2500_v30 }
 0x6ba   : > { %3926 = vmatpush3.bf16.xpose.msra.mxu0 %v2603_v39  ;;  %3932 = vmatpush3.bf16.xpose.msra.mxu1 %v2649_v40  ;;  %v3904_v41 = vpop.f32.mrf.mxu0  ;;  %v3912_v42 = vpop.f32.mrf.mxu1 }
 0x6bb   : > { %3927 = vmatprep.mubr.msk.bf16.mxu0 %vm4198_vm0, %v4197_v1  ;;  %3933 = vmatprep.mubr.msk.bf16.mxu1 %vm4198_vm0, %v4197_v1 }
 0x6bc   : > { %3943 = vmatprep.subr.bf16.mxu1 %v4197_v1  ;;  %3937 = vmatprep.subr.bf16.mxu0 %v4197_v1 }
 0x6c1   : > { %3928 = vmatmul.mubr.msk.bf16.vlgmr.msra.gmra.mxu0 %vm1317_vm2, %v2501_v45  ;;  %3934 = vmatmul.mubr.msk.bf16.vlgmr.msra.gmra.mxu1 %vm1317_vm2, %v2502_v46 }
 0x6c2   : > { %3939 = vmatprep.mubr.msk.bf16.mxu0 %vm4198_vm0, %v4197_v1  ;;  %3945 = vmatprep.mubr.msk.bf16.mxu1 %vm4198_vm0, %v4197_v1 }
 0x779   : > { %v2547_v49 = vpop.f32.mrf.mxu0  ;;  %v2593_v50 = vpop.f32.mrf.mxu1 }
 0x77a   : > { %v2698_v51 = vsel %vm2697_vm6, -1e+09, %v2547_v49  ;;  %v2699_v55 = vsel %vm2697_vm6, -1e+09, %v2593_v50 }
 0x77b   : > { %v3917_v52 = vpop.f32.mrf.mxu0  ;;  %v3923_v53 = vpop.f32.mrf.mxu1  ;;  %v2702_v54 = vsel %vm1317_vm2, %v2698_v51, -inf  ;;  %v2705_v60 = vsel %vm1317_vm2, %v2699_v55, -inf }
 0x77c   : > { %2703 = vmax.xlane.f32.xlu0 %v2702_v54 }
 0x77d   : > { %v2550_v56 = vpop.f32.mrf.mxu0  ;;  %v2596_v57 = vpop.f32.mrf.mxu1 }
 0x77e   : > { %v2951_v57 = vld [vmem:[%s4968_s15 + $0x4] sm:$0xf] }
 0x77f   : > { %v3918_v58 = vpop.f32.mrf.mxu0  ;;  %v3924_v59 = vpop.f32.mrf.mxu1 }
 0x780   : > { %2706 = vmax.xlane.f32.xlu0 %v2705_v60  ;;  %v3004_v58 = vsel %vm1561_vm5, %v2951_v57, 0  ;;  %v2952_v59 = vld [vmem:[%s4968_s15 + $0x8] sm:$0xf] }
 0x781   : > { %v2639_v62 = vpop.f32.mrf.mxu0  ;;  %v2685_v63 = vpop.f32.mrf.mxu1 }
 0x782   : > { %v2700_v0 = vsel %vm2697_vm6, -1e+09, %v2639_v62  ;;  %v2701_v2 = vsel %vm2697_vm6, -1e+09, %v2685_v63  ;;  %v3050_v63 = vsel %vm1561_vm5, %v2952_v59, 0 }
 0x783   : > { %v3929_v3 = vpop.f32.mrf.mxu0  ;;  %v3935_v4 = vpop.f32.mrf.mxu1  ;;  %v2711_v5 = vsel %vm1317_vm2, %v2701_v2, -inf  ;;  %v2708_v6 = vsel %vm1317_vm2, %v2700_v0, -inf }
 0x784   : > { %2712 = vmax.xlane.f32.xlu1 %v2711_v5  ;;  %2709 = vmax.xlane.f32.xlu0 %v2708_v6 }
 0x785   : > { %v2642_v8 = vpop.f32.mrf.mxu0  ;;  %v2688_v9 = vpop.f32.mrf.mxu1 }
 0x787   : > { %v3930_v11 = vpop.f32.mrf.mxu0  ;;  %v3936_v33 = vpop.f32.mrf.mxu1 }
 0x805   : > { %v2704_v12 = vpop.xlane.xlu0 %2703 }
 0x806   : > { %v2714_v48 = vsub.f32 %v2698_v51, %v2704_v12 }
 0x808   : > { %v2718_v13 = vmul.f32 1.442695, %v2714_v48 }
 0x809   : > { %v2707_v14 = vpop.xlane.xlu0 %2706 }
 0x80a   : > { %4115 = vpow2.f32 %v2718_v13  ;;  %v2715_v15 = vsub.f32 %v2699_v55, %v2707_v14  ;;  %v2950_v55 = vld [vmem:[%s4968_s15] sm:$0xf] }
 0x80b   : > { %v2958_v56 = vsel %vm1561_vm5, %v2950_v55, 0  ;;  %v4094_v55 = vld [vmem:[%s4974_s21 + $0x10] sm:$0xff]  }
 0x80c   : > { %v2720_v16 = vmul.f32 1.442695, %v2715_v15 }
 0x80d   : > { %v2710_v17 = vpop.xlane.xlu0 %2709  ;;  %v2713_v25 = vpop.xlane.xlu1 %2712 }
 0x80e   : > { %4117 = vpow2.f32 %v2720_v16  ;;  %v2716_v18 = vsub.f32 %v2700_v0, %v2710_v17  ;;  %v2717_v26 = vsub.f32 %v2701_v2, %v2713_v25  ;;  %v2953_v2 = vld [vmem:[%s4968_s15 + $0xc] sm:$0xf] }
 0x80f   : > { %v3096_v6 = vsel %vm1561_vm5, %v2953_v2, 0 }
 0x810   : > { %v2722_v19 = vmul.f32 1.442695, %v2716_v18  ;;  %v2724_v27 = vmul.f32 1.442695, %v2717_v26 }
 0x812   : > { %4119 = vpow2.f32 %v2722_v19 }
 0x813   : > { %4121 = vpow2.f32 %v2724_v27 }
 0x817   : > { %v4116_v20 = vpop.eup %4115 }
 0x818   : > { %v2726_v21 = vsel %vm1317_vm2, %v4116_v20, 0.0 }
 0x819   : > { %2727 = vadd.xlane.f32.xlu0 %v2726_v21 }
 0x81b   : > { %v4118_v22 = vpop.eup %4117 }
 0x81c   : > { %v2729_v7 = vsel %vm1317_vm2, %v4118_v22, 0.0 }
 0x81d   : > { %2730 = vadd.xlane.f32.xlu1 %v2729_v7 }
 0x81f   : > { %v4120_v23 = vpop.eup %4119 }
 0x820   : > { %v2732_v24 = vsel %vm1317_vm2, %v4120_v23, 0.0  ;;  %v4122_v28 = vpop.eup %4121 }
 0x821   : > { %2733 = vadd.xlane.f32.xlu0 %v2732_v24  ;;  %v2735_v29 = vsel %vm1317_vm2, %v4122_v28, 0.0 }
 0x82e   : > { %2800 = vrot.lane.b32.xlu1 %v4729_v10, %s5035_s3 }
 0x832   : > { %2849 = vrot.lane.b32.xlu1 %v4749_v31, %s5035_s3 }
 0x837   : > { %2751 = vrot.lane.b32.xlu0 %v4727_v61, %s5035_s3 }
 0x856   : > { %2736 = vadd.xlane.f32.xlu1 %v2735_v29 }
 0x867   : > { %2898 = vrot.lane.b32.xlu1 %v4751_v34, %s5035_s3  ;;  %s3488_s3 = sshll.u32 %s777_s6, 3 }
 0x868   : > { %s779_s5 = scalar_lea.vmem [#allocation2], %s3488_s3 }
 0x869   : > { %s3404_s27 = sshll.u32 %s779_s5, 4  ;;  %s3405_s27 = int_to_ptr.vmem [resolvable:$true] %s3404_s27 }
 0x86a   : > { %s4135_s29 = scalar_lea.vmem %s3405_s27, 128  ;;  %p4142_p0 = scmp.lt.s32.totalorder %s3405_s27, %s4140_s8 }
 0x86b   : > { %p4136_p11 = scmp.ne.s32.totalorder %s3405_s27, %s4135_s29  ;;  %p4143_p1 = scmp.lt.s32.totalorder %s4141_s7, %s4135_s29 }
 0x86d   : > { %p4137_p12 = pnand %p4136_p11, %p4369_p5  ;;  %p4144_p2 = por %p4143_p1, %p4142_p0 }
 0x86f   : > { %p4138_p13 = pneg %p4137_p12 }
 0x871   : > { %p4145_p3 = pnand %p4144_p2, %p4138_p13 }
 0x8a2   : > { %v2728_v30 = vpop.xlane.xlu0 %2727 }
 0x8a3   : > { %4123 = vrcp.f32 %v2728_v30 }
 0x8a6   : > { %v2731_v10 = vpop.xlane.xlu1 %2730 }
 0x8a7   : > { %4125 = vrcp.f32 %v2731_v10 }
 0x8aa   : > { %v2801_v35 = vpop.permute.xlu1 %2800  ;;  %v2734_v36 = vpop.xlane.xlu0 %2733 }
 0x8ab   : > { %v2806_v31 = vsel %vm1561_vm5, %v2801_v35, 0  ;;  %4127 = vrcp.f32 %v2734_v36 }
 0x8ac   : > { %3944 = vmatpush3.bf16.msra.mxu1 %v2806_v31 }
 0x8ad   : > { %3955 = vmatprep.subr.bf16.mxu1 %v4197_v1 }
 0x8ae   : > { %v2752_v61 = vpop.permute.xlu0 %2751  ;;  %v2850_v40 = vpop.permute.xlu1 %2849 }
 0x8af   : > { %v2757_v38 = vsel %vm1561_vm5, %v2752_v61, 0  ;;  %v2855_v42 = vsel %vm1561_vm5, %v2850_v40, 0  ;;  %v3583_v61 = vld [vmem:[%s4969_s16] ss:$0 sm:$0xff] }
 0x8b0   : > { %v4124_v37 = vpop.eup %4123  ;;  %3938 = vmatpush3.bf16.msra.mxu0 %v2757_v38 }
 0x8b1   : > { %v2742_v39 = vmul.f32 %v4124_v37, %v4116_v20  ;;  %3949 = vmatprep.subr.bf16.mxu0 %v4197_v1 }
 0x8b3   : > { %v2746_v34 = vpack.c.bf16 %v2742_v39, %v2742_v39 }
 0x8b4   : > { %v4126_v41 = vpop.eup %4125 }
 0x8b5   : > { %3940 = vmatmul.mubr.msk.bf16.vlgmr.msra.gmra.mxu0 %vm1317_vm2, %v2746_v34  ;;  %v2743_v43 = vmul.f32 %v4126_v41, %v4118_v22 }
 0x8b6   : > { %3950 = vmatpush3.bf16.msra.mxu0 %v2855_v42  ;;  %3951 = vmatprep.mubr.msk.bf16.mxu0 %vm4198_vm0, %v4197_v1 }
 0x8b7   : > { %v2747_v44 = vpack.c.bf16 %v2743_v43, %v2743_v43  ;;  %3961 = vmatprep.subr.bf16.mxu0 %v4197_v1 }
 0x8b8   : > { %v4128_v45 = vpop.eup %4127 }
 0x8b9   : > { %3946 = vmatmul.mubr.msk.bf16.vlgmr.msra.gmra.mxu1 %vm1317_vm2, %v2747_v44  ;;  %v2744_v46 = vmul.f32 %v4128_v45, %v4120_v23 }
 0x8ba   : > { %3957 = vmatprep.mubr.msk.bf16.mxu1 %vm4198_vm0, %v4197_v1 }
 0x8bb   : > { %v2748_v47 = vpack.c.bf16 %v2744_v46, %v2744_v46 }
 0x8bd   : > { %3952 = vmatmul.mubr.msk.bf16.vlgmr.msra.gmra.mxu0 %vm1317_vm2, %v2748_v47 }
 0x8be   : > { %3963 = vmatprep.mubr.msk.bf16.mxu0 %vm4198_vm0, %v4197_v1  ;;  %3962 = vmatpush3.bf16.msra.mxu0 %v2958_v56 }
 0x8bf   : > { %3973 = vmatprep.subr.bf16.mxu0 %v4197_v1 }
 0x8df   : > { %v2737_v49 = vpop.xlane.xlu1 %2736 }
 0x8e0   : > { %4129 = vrcp.f32 %v2737_v49  ;;  %v4087_v49 = vld [vmem:[%s4972_s19 + $0x8] sm:$0xff]  }
 0x8e3   : > { %v2899_v50 = vpop.permute.xlu1 %2898 }
 0x8e4   : > { %v2904_v51 = vsel %vm1561_vm5, %v2899_v50, 0  ;;  %v4089_v50 = vld [vmem:[%s4974_s21 + $0x38] sm:$0xff]  }
 0x8e5   : > { %3956 = vmatpush3.bf16.msra.mxu1 %v2904_v51  ;;  %v4090_v51 = vld [vmem:[%s4974_s21 + $0x30] sm:$0xff]  }
 0x8e6   : > { %3967 = vmatprep.subr.bf16.mxu1 %v4197_v1 }
 0x8ed   : > { %v4130_v52 = vpop.eup %4129 }
 0x8ee   : > { %v2745_v53 = vmul.f32 %v4130_v52, %v4122_v28  ;;  %v4091_v52 = vld [vmem:[%s4974_s21 + $0x28] sm:$0xff]  }
 0x8f0   : > { %v2749_v54 = vpack.c.bf16 %v2745_v53, %v2745_v53  ;;  %v4092_v53 = vld [vmem:[%s4974_s21 + $0x20] sm:$0xff]  }
 0x8f2   : > { %3958 = vmatmul.mubr.msk.bf16.vlgmr.msra.gmra.mxu1 %vm1317_vm2, %v2749_v54  ;;  %v4093_v54 = vld [vmem:[%s4974_s21 + $0x18] sm:$0xff]  }
 0x8f3   : > { %3969 = vmatprep.mubr.msk.bf16.mxu1 %vm4198_vm0, %v4197_v1  ;;  %3968 = vmatpush3.bf16.msra.mxu1 %v3004_v58 }
 0x8f4   : > { %3979 = vmatprep.subr.bf16.mxu1 %v4197_v1 }
 0x975   : > { %v2793_v60 = vpop.f32.mrf.mxu0 }
 0x976   : > { %v2946_v62 = vpack.c.bf16 %v2793_v60, %v2793_v60  ;;  %v3584_v60 = vld [vmem:[%s4970_s17] ss:$0 sm:$0xff] }
 0x977   : > { %v3941_v0 = vpop.f32.mrf.mxu0 }
 0x978   : > { %3964 = vmatmul.mubr.msk.bf16.vlgmr.msra.gmra.mxu0 %vm1317_vm2, %v2946_v62 }
 0x979   : > { %v2796_v3 = vpop.f32.mrf.mxu0  ;;  %v2842_v4 = vpop.f32.mrf.mxu1  ;;  %3974 = vmatpush3.bf16.msra.mxu0 %v3050_v63  ;;  %3975 = vmatprep.mubr.msk.bf16.mxu0 %vm4198_vm0, %v4197_v1  ;;  %v3585_v63 = vld [vmem:[%s4971_s18] ss:$0 sm:$0xff] }
 0x97a   : > { %v2947_v5 = vpack.c.bf16 %v2842_v4, %v2842_v4  ;;  %3985 = vmatprep.subr.bf16.mxu0 %v4197_v1  ;;  %v4095_v4 = vld [vmem:[%s4974_s21 + $0x8] sm:$0xff]  }
 0x97b   : > { %v3942_v8 = vpop.f32.mrf.mxu0  ;;  %v3947_v9 = vpop.f32.mrf.mxu1 }
 0x97c   : > { %3970 = vmatmul.mubr.msk.bf16.vlgmr.msra.gmra.mxu1 %vm1317_vm2, %v2947_v5  ;;  %v4096_v5 = vld [vmem:[%s4974_s21] sm:$0xff]  }
 0x97d   : > { %v2845_v11 = vpop.f32.mrf.mxu1  ;;  %3980 = vmatpush3.bf16.msra.mxu1 %v3096_v6  ;;  %3981 = vmatprep.mubr.msk.bf16.mxu1 %vm4198_vm0, %v4197_v1  ;;  %v2891_v33 = vpop.f32.mrf.mxu0  ;;  %v3586_v6 = vld [vmem:[%s4973_s20] ss:$0 sm:$0xff] }
 0x97e   : > { %3993 = vmatprep.subr.bf16.mxu1 %v4197_v1  ;;  %v2948_v12 = vpack.c.bf16 %v2891_v33, %v2891_v33 }
 0x97f   : > { %v3948_v48 = vpop.f32.mrf.mxu1  ;;  %v3953_v13 = vpop.f32.mrf.mxu0 }
 0x980   : > { %3976 = vmatmul.mubr.msk.bf16.vlgmr.msra.gmra.mxu0 %vm1317_vm2, %v2948_v12 }
 0x981   : > { %v2894_v14 = vpop.f32.mrf.mxu0  ;;  %3989 = vmatprep.mubr.msk.bf16.mxu0 %vm4198_vm0, %v4197_v1  ;;  %3986 = vmatpush3.bf16.msra.mxu0 %v4087_v49 }
 0x982   : > { %3987 = vmatprep.subr.bf16.mxu0 %v4197_v1 }
 0x983   : > { %v3954_v15 = vpop.f32.mrf.mxu0 }
 0x9b2   : > { %v2940_v16 = vpop.f32.mrf.mxu1 }
 0x9b3   : > { %v2949_v17 = vpack.c.bf16 %v2940_v16, %v2940_v16 }
 0x9b4   : > { %v3959_v18 = vpop.f32.mrf.mxu1 }
 0x9b5   : > { %3982 = vmatmul.mubr.msk.bf16.vlgmr.msra.gmra.mxu1 %vm1317_vm2, %v2949_v17 }
 0x9b6   : > { %v2943_v19 = vpop.f32.mrf.mxu1  ;;  %4009 = vmatprep.mubr.msk.bf16.mxu1 %vm4198_vm0, %v4197_v1  ;;  %3994 = vmatpush3.bf16.msra.mxu1 %v4089_v50 }
 0x9b7   : > { %3995 = vmatprep.subr.bf16.mxu1 %v4197_v1 }
 0x9b8   : > { %v3960_v20 = vpop.f32.mrf.mxu1 }
 0x9ba   : > { %3996 = vmatpush3.bf16.msra.mxu1 %v4090_v51 }
 0x9bb   : > { %3997 = vmatprep.subr.bf16.mxu1 %v4197_v1 }
 0x9be   : > { %3998 = vmatpush3.bf16.msra.mxu1 %v4091_v52 }
 0x9bf   : > { %3999 = vmatprep.subr.bf16.mxu1 %v4197_v1 }
 0x9c2   : > { %4000 = vmatpush3.bf16.msra.mxu1 %v4092_v53 }
 0x9c3   : > { %4001 = vmatprep.subr.bf16.mxu1 %v4197_v1 }
 0x9c6   : > { %4002 = vmatpush3.bf16.msra.mxu1 %v4093_v54 }
 0x9c7   : > { %4003 = vmatprep.subr.bf16.mxu1 %v4197_v1 }
 0x9ca   : > { %4004 = vmatpush3.bf16.msra.mxu1 %v4094_v55 }
 0x9cb   : > { %4005 = vmatprep.subr.bf16.mxu1 %v4197_v1 }
 0x9ce   : > { %4006 = vmatpush3.bf16.msra.mxu1 %v4095_v4 }
 0x9cf   : > { %4007 = vmatprep.subr.bf16.mxu1 %v4197_v1  ;;  %v3590_v1 = vld [vmem:[%s4975_s22] ss:$0 sm:$0xff] }
 0x9d2   : > { %4008 = vmatpush3.bf16.msra.mxu1 %v4096_v5 }
 0xa38   : > { %v2994_v21 = vpop.f32.mrf.mxu0 }
 0xa3a   : > { %v3965_v22 = vpop.f32.mrf.mxu0 }
 0xa3c   : > { %v2997_v7 = vpop.f32.mrf.mxu0  ;;  %v3040_v23 = vpop.f32.mrf.mxu1 }
 0xa3d   : > { %v3138_v35 = vadd.f32 %v3040_v23, %v2994_v21 }
 0xa3e   : > { %v3966_v24 = vpop.f32.mrf.mxu0  ;;  %v3971_v25 = vpop.f32.mrf.mxu1 }
 0xa40   : > { %v3043_v26 = vpop.f32.mrf.mxu1  ;;  %v3086_v27 = vpop.f32.mrf.mxu0 }
 0xa41   : > { %v3139_v31 = vadd.f32 %v3138_v35, %v3086_v27 }
 0xa42   : > { %v3972_v28 = vpop.f32.mrf.mxu1  ;;  %v3977_v29 = vpop.f32.mrf.mxu0 }
 0xa43   : > { %v3599_v29 = vld [vmem:[%s4976_s23] ss:$0 sm:$0xff] }
 0xa44   : > { %v3089_v30 = vpop.f32.mrf.mxu0 }
 0xa46   : > { %v3978_v10 = vpop.f32.mrf.mxu0 }
 0xa47   : > { %v3600_v10 = vld [vmem:[%s4977_s24] ss:$0 sm:$0xff] }
 0xa75   : > { %v3132_v36 = vpop.f32.mrf.mxu1 }
 0xa76   : > { %v3140_v37 = vadd.f32 %v3139_v31, %v3132_v36 }
 0xa77   : > { %v3983_v38 = vpop.f32.mrf.mxu1 }
 0xa78   : > { %v3148_v39 = vadd.f32 %v3583_v61, %v3140_v37 }
 0xa79   : > { %v3135_v40 = vpop.f32.mrf.mxu1 }
 0xa7a   : > { %v3149_v34 = vadd.f32 %v3148_v39, %v4640_v32  ;;  %v4088_v32 = vld [vmem:[%s4972_s19] sm:$0xff]  }
 0xa7b   : > { %v3984_v41 = vpop.f32.mrf.mxu1  ;;  %3988 = vmatpush3.bf16.msra.mxu0 %v4088_v32 }
 0xa7c   : > { %v3150_v42 = vsel %vm857_vm1, %v3149_v34, 0.0 }
 0xa7d   : > { %3151 = vadd.xlane.f32.xlu0 %v3150_v42 }
 0xb06   : > { %v3152_v43 = vpop.xlane.xlu0 %3151 }
 0xb07   : > { %v3153_v44 = vmul.f32 0.03125, %v3152_v43 }
 0xb09   : > { %v3154_v45 = vsub.f32 %v3149_v34, %v3153_v44 }
 0xb0b   : > { %v3155_v46 = vmul.f32 %v3154_v45, %v3154_v45 }
 0xb0d   : > { %v3156_v47 = vsel %vm857_vm1, %v3155_v46, 0.0 }
 0xb0e   : > { %3157 = vadd.xlane.f32.xlu1 %v3156_v47 }
 0xb97   : > { %v3158_v56 = vpop.xlane.xlu1 %3157 }
 0xb98   : > { %v3159_v57 = vmul.f32 0.03125, %v3158_v56 }
 0xb9a   : > { %v3160_v58 = vadd.f32 1e-05, %v3159_v57 }
 0xb9c   : > { %4131 = vrsqrt.f32 %v3160_v58 }
 0xba9   : > { %v4132_v59 = vpop.eup %4131 }
 0xbaa   : > { %v3162_v62 = vmul.f32 %v4132_v59, %v3154_v45 }
 0xbac   : > { %v3170_v0 = vmul.f32 %v3584_v60, %v3162_v62 }
 0xbae   : > { %v3178_v2 = vadd.f32 %v3585_v63, %v3170_v0 }
 0xbb0   : > { %v3179_v3 = vpack.c.bf16 %v3178_v2, %v3178_v2 }
 0xbb2   : > { %3990 = vmatmul.mubr.msk.bf16.vlgmr.msra.gmra.mxu0 %vm857_vm1, %v3179_v3 }
 0xc72   : > { %v3240_v8 = vpop.f32.mrf.mxu0 }
 0xc73   : > { %v3241_v9 = vadd.f32 %v3586_v6, %v3240_v8 }
 0xc74   : > { %v3991_v11 = vpop.f32.mrf.mxu0 }
 0xc75   : > { %v3246_v33 = vmax.f32 %v3241_v9, 0.0 }
 0xc76   : > { %v3243_v12 = vpop.f32.mrf.mxu0 }
 0xc77   : > { %v3247_v48 = vpack.c.bf16 %v3246_v33, %v3246_v33 }
 0xc78   : > { %v3992_v13 = vpop.f32.mrf.mxu0 }
 0xc79   : > { %4010 = vmatmul.mubr.bf16.vlgmr.msra.gmra.mxu1 %v3247_v48 }
 0xd39   : > { %v3353_v14 = vpop.f32.mrf.mxu1 }
 0xd3a   : > { %v3354_v15 = vadd.f32 %v3590_v1, %v3353_v14 }
 0xd3b   : > { %v4011_v16 = vpop.f32.mrf.mxu1 }
 0xd3c   : > { %v3359_v17 = vadd.f32 %v3354_v15, %v3178_v2 }
 0xd3d   : > { %v3356_v18 = vpop.f32.mrf.mxu1 }
 0xd3e   : > { %v3360_v19 = vsel %vm857_vm1, %v3359_v17, 0.0 }
 0xd3f   : > { %3361 = vadd.xlane.f32.xlu0 %v3360_v19  ;;  %v4012_v20 = vpop.f32.mrf.mxu1 }
 0xdc8   : > { %v3362_v21 = vpop.xlane.xlu0 %3361 }
 0xdc9   : > { %v3363_v22 = vmul.f32 0.03125, %v3362_v21 }
 0xdcb   : > { %v3364_v7 = vsub.f32 %v3359_v17, %v3363_v22 }
 0xdcd   : > { %v3365_v23 = vmul.f32 %v3364_v7, %v3364_v7 }
 0xdcf   : > { %v3366_v24 = vsel %vm857_vm1, %v3365_v23, 0.0 }
 0xdd0   : > { %3367 = vadd.xlane.f32.xlu0 %v3366_v24 }
 0xe59   : > { %v3368_v25 = vpop.xlane.xlu0 %3367 }
 0xe5a   : > { %v3369_v26 = vmul.f32 0.03125, %v3368_v25 }
 0xe5c   : > { %v3370_v27 = vadd.f32 1e-05, %v3369_v26 }
 0xe5e   : > { %4133 = vrsqrt.f32 %v3370_v27 }
 0xe6b   : > { %v4134_v28 = vpop.eup %4133 }
 0xe6c   : > { %v3372_v30 = vmul.f32 %v4134_v28, %v3364_v7 }
 0xe6e   : > { %v3380_v35 = vmul.f32 %v3599_v29, %v3372_v30 }
 0xe70   : > { %v3388_v31 = vadd.f32 %v3600_v10, %v3380_v35 }
 0xe72   : > { %3389 = vst.msk [vmem:[%s779_s5] sm:$0xff] %vm857_vm1, %v3388_v31 }
 0xe73   : > { %4148 = shalt.err (!%p4145_p3)
}
 0xe74   : > { %s4149_s9 = scalar_lea.hbm %s3402_s11, 128  ;;  %s4153_s0 = scalar_lea.hbm %s5036_s10, 256 }
 0xe75   : > { %p4150_p4 = scmp.ne.s32.totalorder %s3402_s11, %s4149_s9  ;;  %p4154_p9 = scmp.lt.s32.totalorder %s3402_s11, %s5036_s10 }
 0xe76   : > { %p4155_p10 = scmp.lt.s32.totalorder %s4153_s0, %s4149_s9 }
 0xe77   : > { %p4151_p7 = pnand %p4150_p4, %p4369_p5 }
 0xe78   : > { %p4156_p11 = por %p4155_p10, %p4154_p9 }
 0xe79   : > { %p4152_p8 = pneg %p4151_p7 }
 0xe7b   : > { %p4157_p12 = pnand %p4156_p11, %p4152_p8 }
 0xe7d   : > { %4160 = shalt.err (!%p4157_p12)
}
 0xe7e   : > { %4013 = dma.vmem_to_hbm [thread:$0]  (%p4369_p5), %s3405_s27, 128, %s3402_s11, %s3391_s12  }
 0xe7f PF: > { %s5037_s28 = sld [smem:[#allocation7_spill]] }
 0xe80   : > { %s5038_s29 = sld [smem:[#allocation5_spill]] }
 0xe85   : > { %p4019_p13 = scmp.ge.s32.totalorder %s5037_s28, 2 }
 0xe86   : > { %s3416_s8 = sand.u32 1, %s5038_s29  }
 0xe87   : > { %p4016_p0 = pnand %p4019_p13, %p4373_p6  ;;  %s3417_s7 = scalar_lea.sflag [#allocation3], %s3416_s8 }
 0xe89   : > { %p4017_p1 = pneg %p4016_p0 }
 0xe8b   : > { %4178 = dma.done.wait (%p4017_p1), %s3417_s7, 128  }
 0xe8c   : > { %4180 = vsyncadd (%p4017_p1), %s3417_s7, 4294967168  ;;  %s5040_s30 = sld [smem:[#allocation8_spill]]  ;;  %s5043_s29 = smov %s4187_s2 }
 0xe8d   : > { %s5041_s9 = sld [smem:[#allocation6_spill]] }
 0xe8e   : > { %s5042_s6 = sld [smem:[#allocation9_spill]] }
 0xe92   : > { %p35_p2 = scmp.ge.s32.totalorder %s5040_s30, 4  }
 0xe93   : > { %s5044_s2 = smov %s5041_s9 }
 0xe94   :  { %37 = sbr.rel (!%p35_p2) target bundleno = 18 (0x12), region = 161 }
 0xe99   :  { %3422 = vsyncpa [#allocation3], 1 }
 0xe9a   :  { %3424 = vsyncpa [#allocation3 + $0x1], 1 }

</bundles_post_ra>
